<compile_context>
chip_gen: v5e
topology: v5e:2x2
jax: 0.10.0
libtpu: 0.0.40
codegen_flags: <defaults>
</compile_context>

<pallas_src>
import numpy as np
import jax
import jax.numpy as jnp
from jax import lax
from jax.experimental import pallas as pl
from jax.experimental.pallas import tpu as pltpu  # noqa: F401  (TPU backend context)

# ---- model hyper-parameters (small, consistent with the module) ----
D_MODEL = 32                  # args.d_model
N_HEADS = 16                  # _MultiheadAttention(dim, 16, ...)
D_HEAD = D_MODEL // N_HEADS   # 2
FFN_HIDDEN = 2 * D_MODEL      # FFN = Linear(dim, 2*dim) -> GELU -> Linear(2*dim, dim)
SEQ = 14                      # multiple of 7 so rs_after's reshape(B, 7, -1) is row-aligned
BATCH = 2
REF_BLOCK_NUM = 1             # args.ref_block_num
RS_GROUPS = 7                 # rs_after = norm(reshape(B, 7, -1))

# args flags used on the executed path
ARGS = dict(refiner=True, refiner_residual=True, add_FFN=True, add_norm=False,
            no_tmp=False, ref_dropout=0.2, dropout=0.2)

NEG_BIG = -1e30   # finite "-inf" for the block-diagonal attention mask (no NaN risk)


# ----------------------------- in-kernel index helpers -----------------------------

def _iota_f32(shape, dim):
    # TPU iota must be >= 2D; generate int32 and widen (exact for our tiny ranges).
    return lax.broadcasted_iota(jnp.int32, shape, dim).astype(jnp.float32)


def _fdiv(a, m):
    # exact floor(a / m) for small non-negative integer-valued f32 tensors.
    # (multiply + floor; avoids relying on vector integer div/mod lowering)
    return jnp.floor(a * (1.0 / m) + 0.5 / m)


def _fmod(a, m):
    return a - m * _fdiv(a, m)


# ----------------------------- Pallas kernel -----------------------------

def refiner_kernel(x_ref, wqkv_ref, bqkv_ref, wo_ref, bo_ref,
                   w1_ref, b1_ref, w2_ref, b2_ref,
                   xout_ref, rs_ref):
    """Whole Refiner (all Ref_blocks, all B*C sequences) + rs_after in one invocation.

    x_ref:    (BC, D, L)      channels-first input
    w*_ref:   stacked per-Ref_block weights, bf16 (biases f32)
    xout_ref: (BC, D, L)      refined output (channels-first, same as input)
    rs_ref:   (BC*7, 1)       rs_after side output (flattened; wrapper reshapes to (B, 7))
    """
    bc, d, seq = x_ref.shape
    n_blocks = wqkv_ref.shape[0]
    bcl = bc * seq                      # all sequences stacked along the row/sublane axis
    hr = N_HEADS * bcl                  # head-packed rows: r = h*bcl + (b*seq + l)
    n_groups = rs_ref.shape[0]          # bc * 7 (C == 1 path of the module)
    tpg = bcl // n_groups               # tokens per rs_after group (= seq // 7)

    # ---- constants generated in-kernel (iota + compare; no constant DMAs) ----
    ri = _iota_f32((hr, bcl), 0)
    ji = _iota_f32((hr, bcl), 1)
    rtok = _fmod(ri, bcl)                                          # token of packed row r
    psel = (ji == rtok).astype(jnp.bfloat16)                       # (hr, bcl) row -> token selector
    okmask = _fdiv(ji, seq) == _fdiv(rtok, seq)                    # block-diag: no cross-sequence attn

    rih = _iota_f32((hr, d), 0)
    cih = _iota_f32((hr, d), 1)
    hmask = (_fmod(cih, N_HEADS) == _fdiv(rih, bcl)).astype(jnp.float32)   # (hr, d) head-column mask

    pj = _iota_f32((bcl, hr), 0)
    pr = _fmod(_iota_f32((bcl, hr), 1), bcl)
    pselt = (pj == pr).astype(jnp.bfloat16)                        # (bcl, hr) head collapse

    gk = _iota_f32((n_groups, bcl), 0)
    gj = _fdiv(_iota_f32((n_groups, bcl), 1), tpg)
    gsel = (gk == gj).astype(jnp.float32)                          # (n_groups, bcl) rs grouping

    # ---- fused input permute: (bc, d, seq) channels-first -> stacked token-major (bcl, d) ----
    x_cf = jnp.concatenate([x_ref[b] for b in range(bc)], axis=1).astype(jnp.float32)  # (d, bcl)
    x0 = x_cf.T                                                    # (bcl, d) rows = b*seq + l
    x_cur = x0

    for blk in range(n_blocks):                                    # static unroll over Ref_blocks
        x_bf = x_cur.astype(jnp.bfloat16)
        # fused QKV projection for ALL sequences at once; softmax scale pre-folded into Q
        qkv = jnp.dot(x_bf, wqkv_ref[blk],
                      preferred_element_type=jnp.float32) + bqkv_ref[blk]      # (bcl, 3d) f32
        q_bf = qkv[:, 0 * d:1 * d].astype(jnp.bfloat16)
        k_bf = qkv[:, 1 * d:2 * d].astype(jnp.bfloat16)
        v_bf = qkv[:, 2 * d:3 * d].astype(jnp.bfloat16)

        # Multi-head attention with heads packed along sublanes (row r = h*bcl + token):
        # selector/mask matmuls replace a 16-way per-head loop with width-2 lane slices.
        aexp = jnp.dot(psel, q_bf, preferred_element_type=jnp.float32)         # (hr, d)
        aexp_bf = (aexp * hmask).astype(jnp.bfloat16)
        s = lax.dot_general(aexp_bf, k_bf, (((1,), (1,)), ((), ())),
                            preferred_element_type=jnp.float32)                # (hr, bcl)
        s = jnp.where(okmask, s, NEG_BIG)                                      # block-diagonal mask
        s = s - jnp.max(s, axis=-1, keepdims=True)
        p = jnp.exp(s)
        p = p * pl.reciprocal(jnp.sum(p, axis=-1, keepdims=True), approx=True)
        ov = jnp.dot(p.astype(jnp.bfloat16), v_bf,
                     preferred_element_type=jnp.float32)                       # (hr, d)
        ov_bf = (ov * hmask).astype(jnp.bfloat16)
        o = jnp.dot(pselt, ov_bf, preferred_element_type=jnp.float32)          # (bcl, d)

        # output projection + (args.refiner_residual) residual; dropouts = identity (eval)
        out1 = (jnp.dot(o.astype(jnp.bfloat16), wo_ref[blk],
                        preferred_element_type=jnp.float32)
                + bo_ref[blk] + x_cur)

        # args.add_FFN: out1 = out1 + FFN(out1)
        h1 = jnp.dot(out1.astype(jnp.bfloat16), w1_ref[blk],
                     preferred_element_type=jnp.float32) + b1_ref[blk]
        h1 = jax.nn.gelu(h1)   # TODO(synk): torch.nn.GELU is exact erf; tanh approx here
        ffn = jnp.dot(h1.astype(jnp.bfloat16), w2_ref[blk],
                      preferred_element_type=jnp.float32) + b2_ref[blk]
        x_cur = out1 + ffn                                                     # (bcl, d) f32

    # ---- fused inverse permute + per-sequence channels-first stores ----
    y_cf = x_cur.T                                                 # (d, bcl)
    for b in range(bc):
        xout_ref[b] = y_cf[:, b * seq:(b + 1) * seq].astype(xout_ref.dtype)

    # ---- rs_after: grouped L2 norm of the refinement residual (stacked, no concat/MXU) ----
    diff = x_cf - y_cf                                             # (d, bcl)
    cs = jnp.sum(diff * diff, axis=0, keepdims=True)               # (1, bcl) per-token squared L2
    rs_sq = jnp.sum(gsel * cs, axis=1, keepdims=True)              # (n_groups, 1)
    rs_ref[...] = jnp.sqrt(rs_sq).astype(rs_ref.dtype)


# ----------------------------- wrappers (glue) -----------------------------

def refiner_call(x_bdl, params):
    """x_bdl: (B*C, d_model, L) channels-first -> (refined (B*C, d_model, L), rs (B*C, 7))."""
    bc, d_model, seq = x_bdl.shape
    n_groups = bc * RS_GROUPS            # rs_after grouping assumes C == 1 and L % 7 == 0
    out_shapes = (jax.ShapeDtypeStruct((bc, d_model, seq), x_bdl.dtype),
                  jax.ShapeDtypeStruct((n_groups, 1), jnp.float32))
    x_out, rs_col = pl.pallas_call(
        refiner_kernel,
        out_shape=out_shapes,            # grid-less: whole (~100 KB) problem in one invocation
    )(x_bdl,
      params["wqkv"], params["bqkv"], params["wo"], params["bo"],
      params["w1"], params["b1"], params["w2"], params["b2"])
    return x_out, rs_col.reshape(bc, RS_GROUPS)   # contiguous (bc*7,1) -> (bc,7): metadata only


def correction_module_forward(x, params):
    """x: (B, d_model, L) channels-first.  Returns (x_refined (B,1,d_model,L), rs_after (B,7))."""
    if x.ndim == 3:
        x = x[:, None, :, :]                        # unsqueeze(1) -> (B, 1, D, L)
    B, C, D, L = x.shape
    # rs_after's reshape(B, 7, -1) grouping is row-aligned for C == 1 (the module's own
    # unsqueeze path); the permutes, refine blocks and the norm are fused into the kernel.
    x_flat = x.reshape(B * C, D, L)                 # metadata-only reshape (C == 1)
    x_ref, rs_after = refiner_call(x_flat, params)
    x_refined = x_ref.reshape(B, C, D, L)
    return x_refined, rs_after


def model_forward(x, params):
    # TODO(synk): base_model is external (eval(args.model_name)); we run the module's own
    # Correction_Module compute path.
    return correction_module_forward(x, params)


# ----------------------------- parameter init -----------------------------

def init_params(key):
    def lin(kw, kb, fi, fo):
        bound = 1.0 / (fi ** 0.5)
        w = jax.random.uniform(kw, (fi, fo), jnp.float32, -bound, bound)
        b = jax.random.uniform(kb, (1, fo), jnp.float32, -bound, bound)
        return w, b

    # permutation that de-interleaves heads: standard column order
    # [h0d0, h0d1, h1d0, ...] -> kernel order [d0 of all heads | d1 of all heads]
    perm = np.concatenate([np.arange(0, D_MODEL, 2), np.arange(1, D_MODEL, 2)])
    scale = 1.0 / (D_HEAD ** 0.5)        # softmax scale, folded into Q on the host

    acc = {k: [] for k in ("wqkv", "bqkv", "wo", "bo", "w1", "b1", "w2", "b2")}
    for i in range(REF_BLOCK_NUM):
        ks = jax.random.split(jax.random.fold_in(key, i), 12)
        wq, bq = lin(ks[0], ks[1], D_MODEL, D_MODEL)
        wk, bk = lin(ks[2], ks[3], D_MODEL, D_MODEL)
        wv, bv = lin(ks[4], ks[5], D_MODEL, D_MODEL)
        wo, bo = lin(ks[6], ks[7], D_MODEL, D_MODEL)
        w1, b1 = lin(ks[8], ks[9], D_MODEL, FFN_HIDDEN)
        w2, b2 = lin(ks[10], ks[11], FFN_HIDDEN, D_MODEL)
        wq = wq * scale
        bq = bq * scale
        # fuse QKV (one (32, 96) weight) and de-interleave head columns; permute W_O rows
        # to match the kernel's de-interleaved head-concat output (x @ W convention).
        acc["wqkv"].append(jnp.concatenate([wq[:, perm], wk[:, perm], wv[:, perm]], axis=1))
        acc["bqkv"].append(jnp.concatenate([bq[:, perm], bk[:, perm], bv[:, perm]], axis=1))
        acc["wo"].append(wo[perm, :])
        acc["bo"].append(bo)
        acc["w1"].append(w1)
        acc["b1"].append(b1)
        acc["w2"].append(w2)
        acc["b2"].append(b2)
    # stack all Ref_blocks so the block loop runs inside the single kernel call
    params = {k: jnp.stack(v, axis=0) for k, v in acc.items()}
    # MXU operands in bf16 (f32 accumulation inside the kernel); biases stay f32
    for k in ("wqkv", "wo", "w1", "w2"):
        params[k] = params[k].astype(jnp.bfloat16)
    return params


if __name__ == "__main__":
    key = jax.random.PRNGKey(0)
    kx, kp = jax.random.split(key)
    x = jax.random.normal(kx, (BATCH, D_MODEL, SEQ), jnp.float32)   # (B, d_model, L)
    params = init_params(kp)

    fwd = jax.jit(model_forward)
    x_refined, rs_after = fwd(x, params)
    jax.block_until_ready((x_refined, rs_after))

    assert x_refined.shape == (BATCH, 1, D_MODEL, SEQ)
    assert rs_after.shape == (BATCH, 7)
    print("KERNEL_OK")
</pallas_src>

<mosaic_0001>
module attributes {stable_mosaic.version = 11 : i64} {
  func.func @refiner_kernel(%arg0: memref<2x32x14xf32, #tpu.memory_space<vmem>>, %arg1: memref<1x32x96xbf16, #tpu.memory_space<vmem>>, %arg2: memref<1x1x96xf32, #tpu.memory_space<vmem>>, %arg3: memref<1x32x32xbf16, #tpu.memory_space<vmem>>, %arg4: memref<1x1x32xf32, #tpu.memory_space<vmem>>, %arg5: memref<1x32x64xbf16, #tpu.memory_space<vmem>>, %arg6: memref<1x1x64xf32, #tpu.memory_space<vmem>>, %arg7: memref<1x64x32xbf16, #tpu.memory_space<vmem>>, %arg8: memref<1x1x32xf32, #tpu.memory_space<vmem>>, %arg9: memref<2x32x14xf32, #tpu.memory_space<vmem>>, %arg10: memref<14x1xf32, #tpu.memory_space<vmem>>) attributes {dimension_semantics = [], scalar_prefetch = 0 : i64, scratch_operands = 0 : i64, tpu.core_type = #tpu.core_type<tc>} {
    %0 = tpu.iota {dimensions = array<i32: 0>} : vector<448x28xi32>
    %1 = arith.sitofp %0 : vector<448x28xi32> to vector<448x28xf32>
    %2 = tpu.iota {dimensions = array<i32: 1>} : vector<448x28xi32>
    %3 = arith.sitofp %2 : vector<448x28xi32> to vector<448x28xf32>
    %cst = arith.constant 0.0357142873 : f32
    %4 = vector.broadcast %cst : f32 to vector<448x28xf32>
    %5 = arith.mulf %1, %4 : vector<448x28xf32>
    %cst_0 = arith.constant 0.0178571437 : f32
    %6 = vector.broadcast %cst_0 : f32 to vector<448x28xf32>
    %7 = arith.addf %5, %6 : vector<448x28xf32>
    %8 = math.floor %7 : vector<448x28xf32>
    %cst_1 = arith.constant 2.800000e+01 : f32
    %9 = vector.broadcast %cst_1 : f32 to vector<448x28xf32>
    %10 = arith.mulf %9, %8 : vector<448x28xf32>
    %11 = arith.subf %1, %10 : vector<448x28xf32>
    %12 = arith.cmpf oeq, %3, %11 : vector<448x28xf32>
    %13 = arith.extui %12 : vector<448x28xi1> to vector<448x28xi32>
    %14 = arith.sitofp %13 : vector<448x28xi32> to vector<448x28xf32>
    %15 = arith.truncf %14 : vector<448x28xf32> to vector<448x28xbf16>
    %cst_2 = arith.constant 0.0714285746 : f32
    %16 = vector.broadcast %cst_2 : f32 to vector<448x28xf32>
    %17 = arith.mulf %3, %16 : vector<448x28xf32>
    %cst_3 = arith.constant 0.0357142873 : f32
    %18 = vector.broadcast %cst_3 : f32 to vector<448x28xf32>
    %19 = arith.addf %17, %18 : vector<448x28xf32>
    %20 = math.floor %19 : vector<448x28xf32>
    %cst_4 = arith.constant 0.0714285746 : f32
    %21 = vector.broadcast %cst_4 : f32 to vector<448x28xf32>
    %22 = arith.mulf %11, %21 : vector<448x28xf32>
    %cst_5 = arith.constant 0.0357142873 : f32
    %23 = vector.broadcast %cst_5 : f32 to vector<448x28xf32>
    %24 = arith.addf %22, %23 : vector<448x28xf32>
    %25 = math.floor %24 : vector<448x28xf32>
    %26 = arith.cmpf oeq, %20, %25 : vector<448x28xf32>
    %27 = tpu.iota {dimensions = array<i32: 0>} : vector<448x32xi32>
    %28 = arith.sitofp %27 : vector<448x32xi32> to vector<448x32xf32>
    %29 = tpu.iota {dimensions = array<i32: 1>} : vector<448x32xi32>
    %30 = arith.sitofp %29 : vector<448x32xi32> to vector<448x32xf32>
    %cst_6 = arith.constant 6.250000e-02 : f32
    %31 = vector.broadcast %cst_6 : f32 to vector<448x32xf32>
    %32 = arith.mulf %30, %31 : vector<448x32xf32>
    %cst_7 = arith.constant 3.125000e-02 : f32
    %33 = vector.broadcast %cst_7 : f32 to vector<448x32xf32>
    %34 = arith.addf %32, %33 : vector<448x32xf32>
    %35 = math.floor %34 : vector<448x32xf32>
    %cst_8 = arith.constant 1.600000e+01 : f32
    %36 = vector.broadcast %cst_8 : f32 to vector<448x32xf32>
    %37 = arith.mulf %36, %35 : vector<448x32xf32>
    %38 = arith.subf %30, %37 : vector<448x32xf32>
    %cst_9 = arith.constant 0.0357142873 : f32
    %39 = vector.broadcast %cst_9 : f32 to vector<448x32xf32>
    %40 = arith.mulf %28, %39 : vector<448x32xf32>
    %cst_10 = arith.constant 0.0178571437 : f32
    %41 = vector.broadcast %cst_10 : f32 to vector<448x32xf32>
    %42 = arith.addf %40, %41 : vector<448x32xf32>
    %43 = math.floor %42 : vector<448x32xf32>
    %44 = arith.cmpf oeq, %38, %43 : vector<448x32xf32>
    %45 = arith.extui %44 : vector<448x32xi1> to vector<448x32xi32>
    %46 = arith.sitofp %45 : vector<448x32xi32> to vector<448x32xf32>
    %47 = tpu.iota {dimensions = array<i32: 0>} : vector<28x448xi32>
    %48 = arith.sitofp %47 : vector<28x448xi32> to vector<28x448xf32>
    %49 = tpu.iota {dimensions = array<i32: 1>} : vector<28x448xi32>
    %50 = arith.sitofp %49 : vector<28x448xi32> to vector<28x448xf32>
    %cst_11 = arith.constant 0.0357142873 : f32
    %51 = vector.broadcast %cst_11 : f32 to vector<28x448xf32>
    %52 = arith.mulf %50, %51 : vector<28x448xf32>
    %cst_12 = arith.constant 0.0178571437 : f32
    %53 = vector.broadcast %cst_12 : f32 to vector<28x448xf32>
    %54 = arith.addf %52, %53 : vector<28x448xf32>
    %55 = math.floor %54 : vector<28x448xf32>
    %cst_13 = arith.constant 2.800000e+01 : f32
    %56 = vector.broadcast %cst_13 : f32 to vector<28x448xf32>
    %57 = arith.mulf %56, %55 : vector<28x448xf32>
    %58 = arith.subf %50, %57 : vector<28x448xf32>
    %59 = arith.cmpf oeq, %48, %58 : vector<28x448xf32>
    %60 = arith.extui %59 : vector<28x448xi1> to vector<28x448xi32>
    %61 = arith.sitofp %60 : vector<28x448xi32> to vector<28x448xf32>
    %62 = arith.truncf %61 : vector<28x448xf32> to vector<28x448xbf16>
    %63 = tpu.iota {dimensions = array<i32: 0>} : vector<14x28xi32>
    %64 = arith.sitofp %63 : vector<14x28xi32> to vector<14x28xf32>
    %65 = tpu.iota {dimensions = array<i32: 1>} : vector<14x28xi32>
    %66 = arith.sitofp %65 : vector<14x28xi32> to vector<14x28xf32>
    %cst_14 = arith.constant 5.000000e-01 : f32
    %67 = vector.broadcast %cst_14 : f32 to vector<14x28xf32>
    %68 = arith.mulf %66, %67 : vector<14x28xf32>
    %cst_15 = arith.constant 2.500000e-01 : f32
    %69 = vector.broadcast %cst_15 : f32 to vector<14x28xf32>
    %70 = arith.addf %68, %69 : vector<14x28xf32>
    %71 = math.floor %70 : vector<14x28xf32>
    %72 = arith.cmpf oeq, %64, %71 : vector<14x28xf32>
    %73 = arith.extui %72 : vector<14x28xi1> to vector<14x28xi32>
    %74 = arith.sitofp %73 : vector<14x28xi32> to vector<14x28xf32>
    %c0 = arith.constant 0 : index
    %c0_16 = arith.constant 0 : index
    %c0_17 = arith.constant 0 : index
    %75 = vector.load %arg0[%c0, %c0_16, %c0_17] : memref<2x32x14xf32, #tpu.memory_space<vmem>>, vector<1x32x14xf32>
    %76 = vector.shape_cast %75 : vector<1x32x14xf32> to vector<32x14xf32>
    %c1 = arith.constant 1 : index
    %c0_18 = arith.constant 0 : index
    %c0_19 = arith.constant 0 : index
    %77 = vector.load %arg0[%c1, %c0_18, %c0_19] : memref<2x32x14xf32, #tpu.memory_space<vmem>>, vector<1x32x14xf32>
    %78 = vector.shape_cast %77 : vector<1x32x14xf32> to vector<32x14xf32>
    %79 = tpu.concatenate %76, %78 in 1 : vector<32x14xf32>, vector<32x14xf32> -> vector<32x28xf32>
    %80 = tpu.transpose %79, [1, 0] : vector<32x28xf32> -> vector<28x32xf32>
    %81 = arith.truncf %80 : vector<28x32xf32> to vector<28x32xbf16>
    %c0_20 = arith.constant 0 : index
    %c0_21 = arith.constant 0 : index
    %c0_22 = arith.constant 0 : index
    %82 = vector.load %arg1[%c0_20, %c0_21, %c0_22] : memref<1x32x96xbf16, #tpu.memory_space<vmem>>, vector<1x32x96xbf16>
    %83 = vector.shape_cast %82 : vector<1x32x96xbf16> to vector<32x96xbf16>
    %cst_23 = arith.constant dense<0.000000e+00> : vector<28x96xf32>
    %84 = tpu.matmul %81, %83, %cst_23 {dimension_numbers = #tpu.dot_dimension_numbers<[1], [0], [0], [1], [0, 0, 1, 1], [], []>} : vector<28x32xbf16>, vector<32x96xbf16>, vector<28x96xf32> -> vector<28x96xf32>
    %c0_24 = arith.constant 0 : index
    %c0_25 = arith.constant 0 : index
    %c0_26 = arith.constant 0 : index
    %85 = vector.load %arg2[%c0_24, %c0_25, %c0_26] : memref<1x1x96xf32, #tpu.memory_space<vmem>>, vector<1x1x96xf32>
    %86 = vector.shape_cast %85 : vector<1x1x96xf32> to vector<1x96xf32>
    %87 = vector.broadcast %86 : vector<1x96xf32> to vector<28x96xf32>
    %88 = arith.addf %84, %87 : vector<28x96xf32>
    %89 = vector.extract_strided_slice %88 {offsets = [0, 0], sizes = [28, 32], strides = [1, 1]} : vector<28x96xf32> to vector<28x32xf32>
    %90 = arith.truncf %89 : vector<28x32xf32> to vector<28x32xbf16>
    %91 = vector.extract_strided_slice %88 {offsets = [0, 32], sizes = [28, 32], strides = [1, 1]} : vector<28x96xf32> to vector<28x32xf32>
    %92 = arith.truncf %91 : vector<28x32xf32> to vector<28x32xbf16>
    %93 = vector.extract_strided_slice %88 {offsets = [0, 64], sizes = [28, 32], strides = [1, 1]} : vector<28x96xf32> to vector<28x32xf32>
    %94 = arith.truncf %93 : vector<28x32xf32> to vector<28x32xbf16>
    %cst_27 = arith.constant dense<0.000000e+00> : vector<448x32xf32>
    %95 = tpu.matmul %15, %90, %cst_27 {dimension_numbers = #tpu.dot_dimension_numbers<[1], [0], [0], [1], [0, 0, 1, 1], [], []>} : vector<448x28xbf16>, vector<28x32xbf16>, vector<448x32xf32> -> vector<448x32xf32>
    %96 = arith.mulf %95, %46 : vector<448x32xf32>
    %97 = arith.truncf %96 : vector<448x32xf32> to vector<448x32xbf16>
    %cst_28 = arith.constant dense<0.000000e+00> : vector<448x28xf32>
    %98 = tpu.matmul %97, %92, %cst_28 {dimension_numbers = #tpu.dot_dimension_numbers<[1], [1], [0], [0], [0, 0, 1, 0], [], []>} : vector<448x32xbf16>, vector<28x32xbf16>, vector<448x28xf32> -> vector<448x28xf32>
    %cst_29 = arith.constant -1.000000e+30 : f32
    %99 = vector.broadcast %cst_29 : f32 to vector<448x28xf32>
    %100 = arith.select %26, %98, %99 : vector<448x28xi1>, vector<448x28xf32>
    %cst_30 = arith.constant dense<0xFF800000> : vector<448xf32>
    %101 = vector.multi_reduction <maximumf>, %100, %cst_30 [1] : vector<448x28xf32> to vector<448xf32>
    %102 = vector.shape_cast %101 : vector<448xf32> to vector<448x1xf32>
    %103 = vector.broadcast %102 : vector<448x1xf32> to vector<448x28xf32>
    %104 = arith.subf %100, %103 : vector<448x28xf32>
    %105 = math.exp %104 : vector<448x28xf32>
    %cst_31 = arith.constant dense<0.000000e+00> : vector<448xf32>
    %106 = vector.multi_reduction <add>, %105, %cst_31 [1] : vector<448x28xf32> to vector<448xf32>
    %107 = vector.shape_cast %106 : vector<448xf32> to vector<448x1xf32>
    %108 = tpu.reciprocal %107 {approx = true} : vector<448x1xf32> -> vector<448x1xf32>
    %109 = vector.broadcast %108 : vector<448x1xf32> to vector<448x28xf32>
    %110 = arith.mulf %105, %109 : vector<448x28xf32>
    %111 = arith.truncf %110 : vector<448x28xf32> to vector<448x28xbf16>
    %cst_32 = arith.constant dense<0.000000e+00> : vector<448x32xf32>
    %112 = tpu.matmul %111, %94, %cst_32 {dimension_numbers = #tpu.dot_dimension_numbers<[1], [0], [0], [1], [0, 0, 1, 1], [], []>} : vector<448x28xbf16>, vector<28x32xbf16>, vector<448x32xf32> -> vector<448x32xf32>
    %113 = arith.mulf %112, %46 : vector<448x32xf32>
    %114 = arith.truncf %113 : vector<448x32xf32> to vector<448x32xbf16>
    %cst_33 = arith.constant dense<0.000000e+00> : vector<28x32xf32>
    %115 = tpu.matmul %62, %114, %cst_33 {dimension_numbers = #tpu.dot_dimension_numbers<[1], [0], [0], [1], [0, 0, 1, 1], [], []>} : vector<28x448xbf16>, vector<448x32xbf16>, vector<28x32xf32> -> vector<28x32xf32>
    %116 = arith.truncf %115 : vector<28x32xf32> to vector<28x32xbf16>
    %c0_34 = arith.constant 0 : index
    %c0_35 = arith.constant 0 : index
    %c0_36 = arith.constant 0 : index
    %117 = vector.load %arg3[%c0_34, %c0_35, %c0_36] : memref<1x32x32xbf16, #tpu.memory_space<vmem>>, vector<1x32x32xbf16>
    %118 = vector.shape_cast %117 : vector<1x32x32xbf16> to vector<32x32xbf16>
    %cst_37 = arith.constant dense<0.000000e+00> : vector<28x32xf32>
    %119 = tpu.matmul %116, %118, %cst_37 {dimension_numbers = #tpu.dot_dimension_numbers<[1], [0], [0], [1], [0, 0, 1, 1], [], []>} : vector<28x32xbf16>, vector<32x32xbf16>, vector<28x32xf32> -> vector<28x32xf32>
    %c0_38 = arith.constant 0 : index
    %c0_39 = arith.constant 0 : index
    %c0_40 = arith.constant 0 : index
    %120 = vector.load %arg4[%c0_38, %c0_39, %c0_40] : memref<1x1x32xf32, #tpu.memory_space<vmem>>, vector<1x1x32xf32>
    %121 = vector.shape_cast %120 : vector<1x1x32xf32> to vector<1x32xf32>
    %122 = vector.broadcast %121 : vector<1x32xf32> to vector<28x32xf32>
    %123 = arith.addf %119, %122 : vector<28x32xf32>
    %124 = arith.addf %123, %80 : vector<28x32xf32>
    %125 = arith.truncf %124 : vector<28x32xf32> to vector<28x32xbf16>
    %c0_41 = arith.constant 0 : index
    %c0_42 = arith.constant 0 : index
    %c0_43 = arith.constant 0 : index
    %126 = vector.load %arg5[%c0_41, %c0_42, %c0_43] : memref<1x32x64xbf16, #tpu.memory_space<vmem>>, vector<1x32x64xbf16>
    %127 = vector.shape_cast %126 : vector<1x32x64xbf16> to vector<32x64xbf16>
    %cst_44 = arith.constant dense<0.000000e+00> : vector<28x64xf32>
    %128 = tpu.matmul %125, %127, %cst_44 {dimension_numbers = #tpu.dot_dimension_numbers<[1], [0], [0], [1], [0, 0, 1, 1], [], []>} : vector<28x32xbf16>, vector<32x64xbf16>, vector<28x64xf32> -> vector<28x64xf32>
    %c0_45 = arith.constant 0 : index
    %c0_46 = arith.constant 0 : index
    %c0_47 = arith.constant 0 : index
    %129 = vector.load %arg6[%c0_45, %c0_46, %c0_47] : memref<1x1x64xf32, #tpu.memory_space<vmem>>, vector<1x1x64xf32>
    %130 = vector.shape_cast %129 : vector<1x1x64xf32> to vector<1x64xf32>
    %131 = vector.broadcast %130 : vector<1x64xf32> to vector<28x64xf32>
    %132 = arith.addf %128, %131 : vector<28x64xf32>
    %133 = arith.mulf %132, %132 : vector<28x64xf32>
    %134 = arith.mulf %132, %133 : vector<28x64xf32>
    %cst_48 = arith.constant 4.471500e-02 : f32
    %135 = vector.broadcast %cst_48 : f32 to vector<28x64xf32>
    %136 = arith.mulf %135, %134 : vector<28x64xf32>
    %137 = arith.addf %132, %136 : vector<28x64xf32>
    %cst_49 = arith.constant 0.797884583 : f32
    %138 = vector.broadcast %cst_49 : f32 to vector<28x64xf32>
    %139 = arith.mulf %138, %137 : vector<28x64xf32>
    %140 = math.tanh %139 : vector<28x64xf32>
    %cst_50 = arith.constant 1.000000e+00 : f32
    %141 = vector.broadcast %cst_50 : f32 to vector<28x64xf32>
    %142 = arith.addf %141, %140 : vector<28x64xf32>
    %cst_51 = arith.constant 5.000000e-01 : f32
    %143 = vector.broadcast %cst_51 : f32 to vector<28x64xf32>
    %144 = arith.mulf %143, %142 : vector<28x64xf32>
    %145 = arith.mulf %132, %144 : vector<28x64xf32>
    %146 = arith.truncf %145 : vector<28x64xf32> to vector<28x64xbf16>
    %c0_52 = arith.constant 0 : index
    %c0_53 = arith.constant 0 : index
    %c0_54 = arith.constant 0 : index
    %147 = vector.load %arg7[%c0_52, %c0_53, %c0_54] : memref<1x64x32xbf16, #tpu.memory_space<vmem>>, vector<1x64x32xbf16>
    %148 = vector.shape_cast %147 : vector<1x64x32xbf16> to vector<64x32xbf16>
    %cst_55 = arith.constant dense<0.000000e+00> : vector<28x32xf32>
    %149 = tpu.matmul %146, %148, %cst_55 {dimension_numbers = #tpu.dot_dimension_numbers<[1], [0], [0], [1], [0, 0, 1, 1], [], []>} : vector<28x64xbf16>, vector<64x32xbf16>, vector<28x32xf32> -> vector<28x32xf32>
    %c0_56 = arith.constant 0 : index
    %c0_57 = arith.constant 0 : index
    %c0_58 = arith.constant 0 : index
    %150 = vector.load %arg8[%c0_56, %c0_57, %c0_58] : memref<1x1x32xf32, #tpu.memory_space<vmem>>, vector<1x1x32xf32>
    %151 = vector.shape_cast %150 : vector<1x1x32xf32> to vector<1x32xf32>
    %152 = vector.broadcast %151 : vector<1x32xf32> to vector<28x32xf32>
    %153 = arith.addf %149, %152 : vector<28x32xf32>
    %154 = arith.addf %124, %153 : vector<28x32xf32>
    %155 = tpu.transpose %154, [1, 0] : vector<28x32xf32> -> vector<32x28xf32>
    %156 = vector.extract_strided_slice %155 {offsets = [0, 0], sizes = [32, 14], strides = [1, 1]} : vector<32x28xf32> to vector<32x14xf32>
    %c0_59 = arith.constant 0 : index
    %c0_60 = arith.constant 0 : index
    %c0_61 = arith.constant 0 : index
    %157 = vector.load %arg9[%c0_59, %c0_60, %c0_61] : memref<2x32x14xf32, #tpu.memory_space<vmem>>, vector<1x32x14xf32>
    %158 = vector.shape_cast %157 : vector<1x32x14xf32> to vector<32x14xf32>
    %159 = vector.shape_cast %156 : vector<32x14xf32> to vector<1x32x14xf32>
    tpu.vector_store %arg9[%c0_59, %c0_60, %c0_61], %159 {strides = array<i32>} : memref<2x32x14xf32, #tpu.memory_space<vmem>>, vector<1x32x14xf32>,
    %160 = vector.extract_strided_slice %155 {offsets = [0, 14], sizes = [32, 14], strides = [1, 1]} : vector<32x28xf32> to vector<32x14xf32>
    %c1_62 = arith.constant 1 : index
    %c0_63 = arith.constant 0 : index
    %c0_64 = arith.constant 0 : index
    %161 = vector.load %arg9[%c1_62, %c0_63, %c0_64] : memref<2x32x14xf32, #tpu.memory_space<vmem>>, vector<1x32x14xf32>
    %162 = vector.shape_cast %161 : vector<1x32x14xf32> to vector<32x14xf32>
    %163 = vector.shape_cast %160 : vector<32x14xf32> to vector<1x32x14xf32>
    tpu.vector_store %arg9[%c1_62, %c0_63, %c0_64], %163 {strides = array<i32>} : memref<2x32x14xf32, #tpu.memory_space<vmem>>, vector<1x32x14xf32>,
    %164 = arith.subf %79, %155 : vector<32x28xf32>
    %165 = arith.mulf %164, %164 : vector<32x28xf32>
    %cst_65 = arith.constant dense<0.000000e+00> : vector<28xf32>
    %166 = vector.multi_reduction <add>, %165, %cst_65 [0] : vector<32x28xf32> to vector<28xf32>
    %167 = vector.shape_cast %166 : vector<28xf32> to vector<1x28xf32>
    %168 = vector.broadcast %167 : vector<1x28xf32> to vector<14x28xf32>
    %169 = arith.mulf %74, %168 : vector<14x28xf32>
    %cst_66 = arith.constant dense<0.000000e+00> : vector<14xf32>
    %170 = vector.multi_reduction <add>, %169, %cst_66 [1] : vector<14x28xf32> to vector<14xf32>
    %171 = vector.shape_cast %170 : vector<14xf32> to vector<14x1xf32>
    %172 = math.sqrt %171 : vector<14x1xf32>
    %c0_67 = arith.constant 0 : index
    %c0_68 = arith.constant 0 : index
    %173 = vector.load %arg10[%c0_67, %c0_68] : memref<14x1xf32, #tpu.memory_space<vmem>>, vector<14x1xf32>
    tpu.vector_store %arg10[%c0_67, %c0_68], %172 {strides = array<i32>} : memref<14x1xf32, #tpu.memory_space<vmem>>, vector<14x1xf32>,
    return
  }
}

</mosaic_0001>

<bundles_post_ra>
// kernel: model_forward.1
= control target key start
LH: loop header
LB: loop body
LE: loop exit
PB: predicated region body
PF: predicated region fallthrough
CT: control target
= control target key end

     0   :  { %s3775_s17 = smov 14   ;;  %vm1143_vm0 = vcmask 113664   ;;  %vm1202_vm1 = vcmask 261120   ;;  %v35_v24 = vlaneseq  ;;  %vm1315_vm2 = vcmask 1045504   ;;  %s3778_s14 = smov 64   ;;  %s6217_s0 = inlined_call_operand.vmem [shape: f32[2,32,14], index: 0, kind: input, shape index: {}]   ;;  %s6218_s2 = inlined_call_operand.vmem [shape: f32[1,1,96], index: 2, kind: input, shape index: {}]   ;;  %s6219_s1 = inlined_call_operand.vmem [shape: bf16[1,32,96], index: 1, kind: input, shape index: {}]   ;;  %s6220_s4 = inlined_call_operand.vmem [shape: f32[1,1,32], index: 4, kind: input, shape index: {}]   ;;  %s6221_s3 = inlined_call_operand.vmem [shape: bf16[1,32,32], index: 3, kind: input, shape index: {}]   ;;  %s6222_s6 = inlined_call_operand.vmem [shape: f32[1,1,64], index: 6, kind: input, shape index: {}]   ;;  %s6223_s5 = inlined_call_operand.vmem [shape: bf16[1,32,64], index: 5, kind: input, shape index: {}]   ;;  %s6224_s8 = inlined_call_operand.vmem [shape: f32[1,1,32], index: 8, kind: input, shape index: {}]   ;;  %s6225_s7 = inlined_call_operand.vmem [shape: bf16[1,64,32], index: 7, kind: input, shape index: {}]   ;;  %s6226_s9 = inlined_call_operand.vmem [shape: f32[2,32,14], index: 9, kind: output, shape index: {0}]   ;;  %s6227_s10 = inlined_call_operand.vmem [shape: f32[14,1], index: 10, kind: output, shape index: {1}]  }
   0x1   :  { %v3359_v0 = vld [vmem:[%s6217_s0 + $0x20] sm:$0xff]  ;;  %v3361_v1 = vld [vmem:[%s6217_s0 + $0x30] sm:$0xff]  ;;  %v3360_v2 = vld [vmem:[%s6217_s0 + $0x28] sm:$0xff]  ;;  %vm1230_vm7 = vcmask 228352   ;;  %s3780_s13 = smov 114  }
   0x2   :  { %1131 = vrot.lane.b32.xlu0 %v3359_v0, %s3775_s17  ;;  %1135 = vrot.lane.b32.xlu1 %v3361_v1, %s3775_s17  ;;  %v3362_v3 = vld [vmem:[%s6217_s0 + $0x38] sm:$0xff]  ;;  %v1118_v4 = vld [vmem:[%s6217_s0] sm:$0xff]  ;;  %v3896_v25 = vshrl.u32 %v35_v24, 7  ;;  %v3935_v56 = vand.u32 127, %v35_v24 }
   0x3   :  { %v1119_v7 = vld [vmem:[%s6217_s0 + $0x8] sm:$0xff]  ;;  %v1120_v11 = vld [vmem:[%s6217_s0 + $0x10] sm:$0xff]  ;;  %v1121_v14 = vld [vmem:[%s6217_s0 + $0x18] sm:$0xff] }
   0x4   :  { %v3514_v16 = vld [vmem:[%s6219_s1 + $0x8] sm:$0xff]  ;;  %v3513_v17 = vld [vmem:[%s6219_s1] sm:$0xff]  ;;  %v37_v26 = vadd.s32 8, %v3896_v25  ;;  %v40_v27 = vadd.s32 32, %v3896_v25  ;;  %v41_v28 = vadd.s32 40, %v3896_v25  ;;  %v3902_v30 = vcvt.s32.f32 %v3896_v25  ;;  %6386 = vst [vmem:[#allocation12_spill] sm:$0xff] %v3935_v56 }
   0x5   :  { %1215 = vmatpush.bf16.msra.mxu0 %v3514_v16  ;;  %v3535_v34 = vld [vmem:[%s6218_s2] ss:$0 sm:$0xff]  ;;  %s3776_s2 = smov 96   ;;  %v38_v50 = vadd.s32 16, %v3896_v25  ;;  %v39_v51 = vadd.s32 24, %v3896_v25  ;;  %v3930_v53 = vadd.s32 48, %v3896_v25  ;;  %v3952_v1 = vcvt.s32.f32 %v3935_v56 }
   0x6   :  { %6384 = vst [vmem:[#allocation10_spill] sm:$0xff] %v3902_v30  ;;  %v3904_v31 = vcvt.s32.f32 %v37_v26  ;;  %v96_v32 = vcvt.s32.f32 %v40_v27  ;;  %v97_v33 = vcvt.s32.f32 %v41_v28  ;;  %v151_v35 = vmul.f32 0.035714287, %v3902_v30 }
   0x7   :  { %v3933_v54 = vadd.s32 56, %v3896_v25  ;;  %v3943_v60 = vcvt.s32.f32 %v38_v50  ;;  %v3945_v61 = vcvt.s32.f32 %v39_v51  ;;  %v98_v63 = vcvt.s32.f32 %v3930_v53 }
   0x8   :  { %6385 = vst [vmem:[#allocation11_spill] sm:$0xff] %v3904_v31  ;;  %v152_v36 = vmul.f32 0.035714287, %v3904_v31  ;;  %v155_v37 = vmul.f32 0.035714287, %v96_v32  ;;  %v6244_v28 = vmov 0.0  }
   0x9   :  { %1216 = vmatpush.bf16.msra.mxu0 %v3513_v17  ;;  %v156_v38 = vmul.f32 0.035714287, %v97_v33  ;;  %v3911_v42 = vadd.f32 0.017857144, %v151_v35  ;;  %6387 = vst [vmem:[#allocation13_spill] sm:$0xff] %v3943_v60  ;;  %v99_v0 = vcvt.s32.f32 %v3933_v54 }
   0xa   :  { %1133 = vrot.lane.b32.xlu0 %v3360_v2, %s3775_s17  ;;  %1137 = vrot.lane.b32.xlu1 %v3362_v3, %s3775_s17  ;;  %v3913_v43 = vadd.f32 0.017857144, %v152_v36  ;;  %v3915_v44 = vadd.f32 0.017857144, %v155_v37  ;;  %6388 = vst [vmem:[#allocation14_spill] sm:$0xff] %v3945_v61 }
   0xb   :  { %v3919_v46 = vadd.f32 0.017857144, %v156_v38  ;;  %v6243_v47 = vfloor.f32 %v3911_v42 }
   0xc   :  { %v6242_v48 = vfloor.f32 %v3913_v43  ;;  %v6234_v49 = vfloor.f32 %v3915_v44 }
   0xd   :  { %v6235_v52 = vfloor.f32 %v3919_v46  ;;  %v319_v57 = vmul.f32 28.0, %v6243_v47 }
   0xe   :  { %v320_v58 = vmul.f32 28.0, %v6242_v48  ;;  %v323_v59 = vmul.f32 28.0, %v6234_v49 }
   0xf   :  { %v324_v62 = vmul.f32 28.0, %v6235_v52  ;;  %v3955_v2 = vsub.f32 %v3902_v30, %v319_v57 }
  0x10   :  { %v3958_v3 = vsub.f32 %v3904_v31, %v320_v58 }
  0x11   :  { %6389 = vst [vmem:[#allocation15_spill] sm:$0xff] %v3955_v2  ;;  %vm431_vm3 = vcmp.eq.f32.partialorder %v3952_v1, %v3955_v2 }
  0x12   :  { %6390 = vst [vmem:[#allocation16_spill] sm:$0xff] %v3958_v3  ;;  %vm432_vm4 = vcmp.eq.f32.partialorder %v3952_v1, %v3958_v3 }
  0x74   :  { %v1132_v5 = vpop.permute.xlu0 %1131  ;;  %v1136_v10 = vpop.permute.xlu1 %1135 }
  0x75   :  { %v3852_v6 = vsel %vm1143_vm0, %v1118_v4, %v1132_v5  ;;  %v3866_v12 = vsel %vm1143_vm0, %v1120_v11, %v1136_v10  ;;  %v3960_v4 = vsub.f32 %v96_v32, %v323_v59  ;;  %v153_v5 = vmul.f32 0.035714287, %v3943_v60 }
  0x76   :  { %6376 = vst [vmem:[#allocation2_spill] sm:$0xff] %v3852_v6  ;;  %1148 = vxpose.xlu2.b32.start [1/4] (short) (narrow) %v3852_v6, 32  ;;  %v157_v10 = vmul.f32 0.035714287, %v98_v63  ;;  %v158_v11 = vmul.f32 0.035714287, %v99_v0 }
  0x77   :  { %6378 = vst [vmem:[#allocation4_spill] sm:$0xff] %v3866_v12  ;;  %vm435_vm5 = vcmp.eq.f32.partialorder %v3952_v1, %v3960_v4  ;;  %v3972_v17 = vadd.f32 0.017857144, %v153_v5  ;;  %v3230_v32 = vsel %vm432_vm4, 1.0, %v6244_v28 }
  0x78   :  { %v3980_v24 = vadd.f32 0.017857144, %v157_v10  ;;  %v3982_v26 = vadd.f32 0.017857144, %v158_v11 }
  0x79   :  { %v6241_v35 = vfloor.f32 %v3972_v17 }
  0x7a   :  { %v6240_v37 = vfloor.f32 %v3980_v24  ;;  %v6236_v38 = vfloor.f32 %v3982_v26 }
  0x7b   :  { %v321_v51 = vmul.f32 28.0, %v6241_v35 }
  0x7c   :  { %v1134_v8 = vpop.permute.xlu0 %1133  ;;  %v1138_v13 = vpop.permute.xlu1 %1137  ;;  %v325_v54 = vmul.f32 28.0, %v6240_v37 }
  0x7d   :  { %v3859_v9 = vsel %vm1143_vm0, %v1119_v7, %v1134_v8  ;;  %v3873_v15 = vsel %vm1143_vm0, %v1121_v14, %v1138_v13  ;;  %v154_v7 = vmul.f32 0.035714287, %v3945_v61  ;;  %v3964_v8 = vsub.f32 %v97_v33, %v324_v62 }
  0x7e   :  { %6377 = vst [vmem:[#allocation3_spill] sm:$0xff] %v3859_v9  ;;  %1149 = vxpose.xlu2.b32.cont [2/4] (short) (narrow) %v3859_v9, 32  ;;  %v3233_v33 = vsel %vm435_vm5, 1.0, %v6244_v28  ;;  %v4011_v59 = vsub.f32 %v3943_v60, %v321_v51  ;;  %v4016_v5 = vsub.f32 %v98_v63, %v325_v54  ;;  %v6407_v60 = vfloor.f32 %v3915_v44 }
  0x7f   :  { %6379 = vst [vmem:[#allocation5_spill] sm:$0xff] %v3873_v15  ;;  %vm436_vm6 = vcmp.eq.f32.partialorder %v3952_v1, %v3964_v8 }
  0x80   :  { %6391 = vst [vmem:[#allocation17_spill] sm:$0xff] %v4011_v59  ;;  %vm433_vm8 = vcmp.eq.f32.partialorder %v3952_v1, %v4011_v59  ;;  %vm437_vm10 = vcmp.eq.f32.partialorder %v3952_v1, %v4016_v5 }
  0x86   :  { %1150 = vxpose.xlu2.b32.cont [3/4] (short) (narrow) %v3866_v12, 32 }
  0x8e   :  { %1151 = vxpose.xlu2.b32.end [4/4] (short) (narrow) %v3873_v15, 32 }
 0x10f   :  { %v3882_v18 = vpop.trf.xlu2 }
 0x110   :  { %6380 = vst [vmem:[#allocation6_spill] sm:$0xff] %v3882_v18 }
 0x117   :  { %v3884_v19 = vpop.trf.xlu2 }
 0x118   :  { %6381 = vst [vmem:[#allocation7_spill] sm:$0xff] %v3884_v19  ;;  %v1180_v20 = vpack.c.bf16 %v3884_v19, %v3882_v18 }
 0x11a   :  { %3371 = vmatmul.msk.bf16.vlgmr.msra.gmra.mxu0 %vm1202_vm1, %v1180_v20  ;;  %v3974_v20 = vadd.f32 0.017857144, %v154_v7 }
 0x11c   :  { %v6237_v36 = vfloor.f32 %v3974_v20 }
 0x11e   :  { %v322_v53 = vmul.f32 28.0, %v6237_v36 }
 0x11f   :  { %v3889_v21 = vpop.trf.xlu2 }
 0x120   :  { %6382 = vst [vmem:[#allocation8_spill] sm:$0xff] %v3889_v21  ;;  %v4014_v62 = vsub.f32 %v3945_v61, %v322_v53 }
 0x122   :  { %6392 = vst [vmem:[#allocation18_spill] sm:$0xff] %v4014_v62  ;;  %vm434_vm9 = vcmp.eq.f32.partialorder %v3952_v1, %v4014_v62 }
 0x127   :  { %v3891_v22 = vpop.trf.xlu2 }
 0x128   :  { %6383 = vst [vmem:[#allocation9_spill] sm:$0xff] %v3891_v22  ;;  %v1181_v23 = vpack.c.bf16 %v3891_v22, %v3889_v21 }
 0x12a   :  { %3372 = vmatmul.msk.bf16.gmra.mxu0 %vm1202_vm1, %v1181_v23 }
 0x197   :  { %v1218_v29 = vpop.f32.mrf.mxu0 }
 0x198   :  { %v1219_v40 = vadd.f32 %v3535_v34, %v1218_v29  ;;  %v3229_v29 = vsel %vm431_vm3, 1.0, %v6244_v28 }
 0x19f   :  { %v1220_v39 = vpop.f32.mrf.mxu0 }
 0x1a0   :  { %v1221_v41 = vadd.f32 %v3535_v34, %v1220_v39  ;;  %v44_v39 = vadd.s32 64, %v3896_v25 }
 0x1a2   :  { %v3917_v45 = vpack.c.bf16 %v1221_v41, %v1219_v40  ;;  %v45_v40 = vadd.s32 72, %v3896_v25  ;;  %v599_v41 = vpack.c.bf16 %v3230_v32, %v3229_v29  ;;  %v100_v57 = vcvt.s32.f32 %v44_v39 }
 0x1a4   :  { %1554 = vrot.lane.b32.xlu1 %v3917_v45, %s3776_s2  ;;  %v101_v58 = vcvt.s32.f32 %v45_v40  ;;  %v159_v10 = vmul.f32 0.035714287, %v100_v57 }
 0x1a6   :  { %v160_v11 = vmul.f32 0.035714287, %v101_v58 }
 0x1a7   :  { %v1223_v55 = vpop.f32.mrf.mxu0 }
 0x1a8   :  { %v1224_v14 = vadd.f32 %v3535_v34, %v1223_v55  ;;  %v326_v55 = vmul.f32 28.0, %v6236_v38  ;;  %v4030_v63 = vadd.f32 0.017857144, %v160_v11 }
 0x1aa   :  { %v4018_v7 = vsub.f32 %v99_v0, %v326_v55  ;;  %v3231_v0 = vsel %vm433_vm8, 1.0, %v6244_v28  ;;  %v6230_v32 = vfloor.f32 %v4030_v63 }
 0x1ac   :  { %vm438_vm11 = vcmp.eq.f32.partialorder %v3952_v1, %v4018_v7 }
 0x1af   :  { %v1225_v13 = vpop.f32.mrf.mxu0 }
 0x1b0   :  { %v1226_v16 = vadd.f32 %v3535_v34, %v1225_v13  ;;  %v3234_v34 = vsel %vm436_vm6, 1.0, %v6244_v28  ;;  %v4028_v13 = vadd.f32 0.017857144, %v159_v10 }
 0x1b1   :  { %v601_v50 = vpack.c.bf16 %v3234_v34, %v3233_v33  ;;  %v46_v33 = vadd.s32 80, %v3896_v25  ;;  %v47_v34 = vadd.s32 88, %v3896_v25 }
 0x1b2   :  { %v3976_v23 = vpack.c.bf16 %v1226_v16, %v1224_v14  ;;  %v3232_v14 = vsel %vm434_vm9, 1.0, %v6244_v28  ;;  %v3235_v16 = vsel %vm437_vm10, 1.0, %v6244_v28  ;;  %v6232_v29 = vfloor.f32 %v4028_v13 }
 0x1b3   :  { %v600_v39 = vpack.c.bf16 %v3232_v14, %v3231_v0  ;;  %v102_v51 = vcvt.s32.f32 %v46_v33  ;;  %v103_v53 = vcvt.s32.f32 %v47_v34 }
 0x1b4   :  { %1556 = vrot.lane.b32.xlu0 %v3976_v23, %s3776_s2  ;;  %v1317_v27 = vsel %vm1315_vm2, %v3976_v23, 0 }
 0x1b5   :  { %1325 = vmatpush.bf16.msrb.mxu0 %v1317_v27  ;;  %3523 = vmatpush.bf16.msra.mxu1 %v1317_v27  ;;  %v3236_v27 = vsel %vm438_vm11, 1.0, %v6244_v28  ;;  %v161_v10 = vmul.f32 0.035714287, %v102_v51  ;;  %v162_v11 = vmul.f32 0.035714287, %v103_v53 }
 0x1b6   :  { %v602_v40 = vpack.c.bf16 %v3236_v27, %v3235_v16 }
 0x1b7   :  { %v4054_v0 = vadd.f32 0.017857144, %v161_v10  ;;  %v4056_v14 = vadd.f32 0.017857144, %v162_v11 }
 0x1b9   :  { %1326 = vmatpush.bf16.msrb.mxu0 %v3917_v45  ;;  %3524 = vmatpush.bf16.msra.mxu1 %v3917_v45 }
 0x1bc   :  { %3373 = vmatmul.msk.bf16.vlgmr.msrb.gmra.mxu0 %vm1230_vm7, %v599_v41  ;;  %3375 = vmatmul.msk.bf16.vlgmr.msra.gmra.mxu1 %vm1230_vm7, %v601_v50  ;;  %v327_v41 = vmul.f32 28.0, %v6232_v29  ;;  %v328_v50 = vmul.f32 28.0, %v6230_v32  ;;  %v51_v29 = vadd.s32 120, %v3896_v25 }
 0x1be   :  { %v4046_v54 = vsub.f32 %v100_v57, %v327_v41  ;;  %v4048_v55 = vsub.f32 %v101_v58, %v328_v50  ;;  %v6229_v57 = vfloor.f32 %v4054_v0  ;;  %v6228_v58 = vfloor.f32 %v4056_v14 }
 0x1c0   :  { %vm439_vm12 = vcmp.eq.f32.partialorder %v3952_v1, %v4046_v54  ;;  %vm440_vm13 = vcmp.eq.f32.partialorder %v3952_v1, %v4048_v55  ;;  %v329_v34 = vmul.f32 28.0, %v6229_v57 }
 0x1c1   :  { %v3237_v16 = vsel %vm439_vm12, 1.0, %v6244_v28  ;;  %v3238_v27 = vsel %vm440_vm13, 1.0, %v6244_v28 }
 0x1c2   :  { %v603_v33 = vpack.c.bf16 %v3238_v27, %v3237_v16  ;;  %v48_v16 = vadd.s32 96, %v3896_v25 }
 0x1c4   :  { %v104_v27 = vcvt.s32.f32 %v48_v16 }
 0x1cc   :  { %3374 = vmatmul.msk.bf16.gmra.mxu0 %vm1230_vm7, %v600_v39  ;;  %3376 = vmatmul.msk.bf16.gmra.mxu1 %vm1230_vm7, %v602_v40  ;;  %v330_v39 = vmul.f32 28.0, %v6228_v58  ;;  %v4067_v40 = vsub.f32 %v102_v51, %v329_v34  ;;  %v49_v51 = vadd.s32 104, %v3896_v25 }
 0x1ce   :  { %v4069_v41 = vsub.f32 %v103_v53, %v330_v39  ;;  %vm441_vm14 = vcmp.eq.f32.partialorder %v3952_v1, %v4067_v40  ;;  %v105_v53 = vcvt.s32.f32 %v49_v51 }
 0x1cf   :  { %v3239_v50 = vsel %vm441_vm14, 1.0, %v6244_v28 }
 0x1d0   :  { %vm442_vm15 = vcmp.eq.f32.partialorder %v3952_v1, %v4069_v41  ;;  %v164_v34 = vmul.f32 0.035714287, %v105_v53 }
 0x1d1   :  { %v3240_v10 = vsel %vm442_vm15, 1.0, %v6244_v28 }
 0x1d2   :  { %v604_v11 = vpack.c.bf16 %v3240_v10, %v3239_v50  ;;  %v4082_v58 = vadd.f32 0.017857144, %v164_v34 }
 0x1d4   :  { %v6233_v32 = vfloor.f32 %v4082_v58 }
 0x1d6   :  { %v332_v10 = vmul.f32 28.0, %v6233_v32 }
 0x1d8   :  { %v4092_v16 = vsub.f32 %v105_v53, %v332_v10  ;;  %v107_v53 = vcvt.s32.f32 %v51_v29 }
 0x1da   :  { %vm444_vm4 = vcmp.eq.f32.partialorder %v3952_v1, %v4092_v16  ;;  %v166_v10 = vmul.f32 0.035714287, %v107_v53 }
 0x1dc   :  { %3377 = vmatmul.msk.bf16.gmra.mxu1 %vm1230_vm7, %v603_v33  ;;  %v163_v33 = vmul.f32 0.035714287, %v104_v27  ;;  %v4105_v49 = vadd.f32 0.017857144, %v166_v10 }
 0x1de   :  { %v4080_v39 = vadd.f32 0.017857144, %v163_v33  ;;  %v3242_v33 = vsel %vm444_vm4, 1.0, %v6244_v28  ;;  %v6238_v38 = vfloor.f32 %v4105_v49 }
 0x1e0   :  { %v6231_v57 = vfloor.f32 %v4080_v39 }
 0x1e2   :  { %v331_v50 = vmul.f32 28.0, %v6231_v57  ;;  %v50_v57 = vadd.s32 112, %v3896_v25 }
 0x1ec   :  { %3378 = vmatmul.msk.bf16.gmra.mxu1 %vm1230_vm7, %v604_v11  ;;  %v4090_v11 = vsub.f32 %v104_v27, %v331_v50  ;;  %v106_v27 = vcvt.s32.f32 %v50_v57 }
 0x1ee   :  { %vm443_vm3 = vcmp.eq.f32.partialorder %v3952_v1, %v4090_v11  ;;  %v165_v50 = vmul.f32 0.035714287, %v106_v27 }
 0x1ef   :  { %v3241_v51 = vsel %vm443_vm3, 1.0, %v6244_v28 }
 0x1f0   :  { %v605_v34 = vpack.c.bf16 %v3242_v33, %v3241_v51  ;;  %v4103_v32 = vadd.f32 0.017857144, %v165_v50  ;;  %v334_v33 = vmul.f32 28.0, %v6238_v38  ;;  %v854_v38 = vmul.f32 0.0625, %v3952_v1 }
 0x1f2   :  { %v6239_v52 = vfloor.f32 %v4103_v32  ;;  %v4115_v29 = vsub.f32 %v107_v53, %v334_v33  ;;  %v52_v53 = vadd.s32 128, %v3896_v25 }
 0x1f4   :  { %v333_v51 = vmul.f32 28.0, %v6239_v52  ;;  %vm446_vm6 = vcmp.eq.f32.partialorder %v3952_v1, %v4115_v29  ;;  %v108_v33 = vcvt.s32.f32 %v52_v53  ;;  %v855_v52 = vadd.f32 0.03125, %v854_v38 }
 0x1f5   :  { %v3244_v10 = vsel %vm446_vm6, 1.0, %v6244_v28 }
 0x1f6   :  { %v167_v37 = vmul.f32 0.035714287, %v108_v33 }
 0x1f8   :  { %v4129_v47 = vadd.f32 0.017857144, %v167_v37 }
 0x1fc   :  { %3379 = vmatmul.msk.bf16.gmra.mxu1 %vm1230_vm7, %v605_v34  ;;  %v4113_v34 = vsub.f32 %v106_v27, %v333_v51  ;;  %v53_v51 = vadd.s32 136, %v3896_v25 }
 0x1fe   :  { %vm445_vm5 = vcmp.eq.f32.partialorder %v3952_v1, %v4113_v34 }
 0x1ff   :  { %v3243_v50 = vsel %vm445_vm5, 1.0, %v6244_v28 }
 0x200   :  { %v606_v27 = vpack.c.bf16 %v3244_v10, %v3243_v50  ;;  %v856_v50 = vfloor.f32 %v855_v52  ;;  %v6247_v10 = vfloor.f32 %v4129_v47 }
 0x202   :  { %v857_v53 = vmul.f32 16.0, %v856_v50  ;;  %v55_v50 = vadd.s32 152, %v3896_v25 }
 0x204   :  { %v111_v6 = vcvt.s32.f32 %v55_v50 }
 0x206   :  { %v170_v9 = vmul.f32 0.035714287, %v111_v6 }
 0x20c   :  { %3380 = vmatmul.msk.bf16.gmra.mxu1 %vm1230_vm7, %v606_v27  ;;  %v335_v27 = vmul.f32 28.0, %v6247_v10 }
 0x226   :  { %v1557_v36 = vpop.permute.xlu0 %1556 }
 0x227   :  { %v1646_v57 = vsel %vm1202_vm1, %v1557_v36, 0  ;;  %v1555_v36 = vpop.permute.xlu1 %1554 }
 0x228   :  { %1654 = vmatpush.bf16.xpose.msra.mxu0 %v1646_v57  ;;  %3525 = vmatpush.bf16.xpose.msra.mxu2 %v1646_v57  ;;  %v109_v57 = vcvt.s32.f32 %v53_v51  ;;  %v1643_v48 = vsel %vm1202_vm1, %v1555_v36, 0  ;;  %v4139_v51 = vsub.f32 %v108_v33, %v335_v27  ;;  %v6394_v27 = vfloor.f32 %v3911_v42 }
 0x22a   :  { %v168_v35 = vmul.f32 0.035714287, %v109_v57  ;;  %vm447_vm8 = vcmp.eq.f32.partialorder %v3952_v1, %v4139_v51 }
 0x22c   :  { %v4131_v28 = vadd.f32 0.017857144, %v168_v35  ;;  %v6393_v35 = vmov 0.0  }
 0x22d   :  { %v3245_v37 = vsel %vm447_vm8, 1.0, %v6393_v35 }
 0x22e   :  { %v6248_v15 = vfloor.f32 %v4131_v28 }
 0x230   :  { %1655 = vmatpush.bf16.xpose.msra.mxu0 %v1643_v48  ;;  %3526 = vmatpush.bf16.xpose.msra.mxu2 %v1643_v48  ;;  %v336_v38 = vmul.f32 28.0, %v6248_v15  ;;  %v4152_v15 = vsub.f32 %v3952_v1, %v857_v53 }
 0x232   :  { %v4141_v36 = vsub.f32 %v109_v57, %v336_v38  ;;  %v54_v57 = vadd.s32 144, %v3896_v25  ;;  %vm859_vm10 = vcmp.eq.f32.partialorder %v4152_v15, %v6394_v27  ;;  %v6395_v38 = vfloor.f32 %v3913_v43 }
 0x233   :  { %v4164_v53 = vsel %vm859_vm10, 1.0, %v6393_v35  ;;  %v4171_v27 = vadd.f32 0.017857144, %v170_v9  ;;  %vm863_vm6 = vcmp.eq.f32.partialorder %v4152_v15, %v6407_v60 }
 0x234   :  { %vm448_vm9 = vcmp.eq.f32.partialorder %v3952_v1, %v4141_v36  ;;  %vm860_vm11 = vcmp.eq.f32.partialorder %v4152_v15, %v6395_v38  ;;  %v110_v12 = vcvt.s32.f32 %v54_v57  ;;  %6396 = vst [vmem:[#allocation19_spill] sm:$0xff] %v4164_v53 }
 0x235   :  { %v3246_v10 = vsel %vm448_vm9, 1.0, %v6393_v35  ;;  %v6258_v50 = vfloor.f32 %v4171_v27 }
 0x236   :  { %v607_v33 = vpack.c.bf16 %v3246_v10, %v3245_v37  ;;  %v4167_v10 = vsel %vm860_vm11, 1.0, %v6393_v35  ;;  %v169_v37 = vmul.f32 0.035714287, %v110_v12 }
 0x237   :  { %6397 = vst [vmem:[#allocation20_spill] sm:$0xff] %v4167_v10  ;;  %v338_v18 = vmul.f32 28.0, %v6258_v50  ;;  %v6398_v50 = vfloor.f32 %v3972_v17 }
 0x238   :  { %3381 = vmatmul.msk.bf16.gmra.mxu1 %vm1230_vm7, %v607_v33  ;;  %v4169_v21 = vadd.f32 0.017857144, %v169_v37 }
 0x239   :  { %v1328_v48 = vpop.f32.mrf.mxu0  ;;  %v4147_v52 = vpop.f32.mrf.mxu1  ;;  %v4184_v9 = vsub.f32 %v111_v6, %v338_v18  ;;  %vm861_vm14 = vcmp.eq.f32.partialorder %v4152_v15, %v6398_v50  ;;  %v6399_v6 = vfloor.f32 %v3980_v24  ;;  %v6401_v18 = vfloor.f32 %v3982_v26 }
 0x23a   :  { %v1468_v43 = vmul.f32 %v4164_v53, %v1328_v48  ;;  %v6259_v57 = vfloor.f32 %v4169_v21  ;;  %v60_v53 = vadd.s32 192, %v3896_v25 }
 0x23b   :  { %vm450_vm13 = vcmp.eq.f32.partialorder %v3952_v1, %v4184_v9  ;;  %vm865_vm15 = vcmp.eq.f32.partialorder %v4152_v15, %v6399_v6  ;;  %vm866_vm4 = vcmp.eq.f32.partialorder %v4152_v15, %v6401_v18 }
 0x23c   :  { %v337_v19 = vmul.f32 28.0, %v6259_v57  ;;  %v4209_v17 = vsel %vm865_vm15, 1.0, %v6393_v35  ;;  %v4215_v50 = vsel %vm866_vm4, 1.0, %v6393_v35  ;;  %v6406_v57 = vfloor.f32 %v3919_v46 }
 0x23d   :  { %6403 = vst [vmem:[#allocation22_spill] sm:$0xff] %v4209_v17 }
 0x23e   :  { %v4182_v37 = vsub.f32 %v110_v12, %v337_v19  ;;  %v6400_v12 = vfloor.f32 %v3974_v20  ;;  %v4206_v19 = vsel %vm861_vm14, 1.0, %v6393_v35  ;;  %6405 = vst [vmem:[#allocation24_spill] sm:$0xff] %v4215_v50  ;;  %vm864_vm5 = vcmp.eq.f32.partialorder %v4152_v15, %v6406_v57 }
 0x23f   :  { %6402 = vst [vmem:[#allocation21_spill] sm:$0xff] %v4206_v19 }
 0x240   :  { %vm449_vm12 = vcmp.eq.f32.partialorder %v3952_v1, %v4182_v37  ;;  %vm862_vm3 = vcmp.eq.f32.partialorder %v4152_v15, %v6400_v12 }
 0x241   :  { %v1330_v22 = vpop.f32.mrf.mxu0  ;;  %v1340_v42 = vpop.f32.mrf.mxu1  ;;  %v4212_v24 = vsel %vm862_vm3, 1.0, %v6393_v35 }
 0x242   :  { %v1469_v33 = vmul.f32 %v4167_v10, %v1330_v22  ;;  %v3247_v22 = vsel %vm449_vm12, 1.0, %v6393_v35  ;;  %6404 = vst [vmem:[#allocation23_spill] sm:$0xff] %v4212_v24 }
 0x244   :  { %v1524_v38 = vpack.c.bf16 %v1469_v33, %v1468_v43  ;;  %v3248_v43 = vsel %vm450_vm13, 1.0, %v6393_v35 }
 0x245   :  { %v608_v33 = vpack.c.bf16 %v3248_v43, %v3247_v22 }
 0x246   :  { %3401 = vmatmul.msk.bf16.vlgmr.msra.gmra.mxu0 %vm1202_vm1, %v1524_v38 }
 0x248   :  { %3382 = vmatmul.msk.bf16.gmra.mxu1 %vm1230_vm7, %v608_v33 }
 0x249   :  { %v1333_v48 = vpop.f32.mrf.mxu0  ;;  %v1343_v61 = vpop.f32.mrf.mxu1 }
 0x24a   :  { %v1470_v26 = vmul.f32 %v4206_v19, %v1333_v48  ;;  %v1474_v22 = vmul.f32 %v4209_v17, %v1343_v61  ;;  %v6408_v61 = vfloor.f32 %v4028_v13  ;;  %v6409_v48 = vfloor.f32 %v4030_v63 }
 0x24c   :  { %vm867_vm8 = vcmp.eq.f32.partialorder %v4152_v15, %v6408_v61  ;;  %vm868_vm9 = vcmp.eq.f32.partialorder %v4152_v15, %v6409_v48 }
 0x24d   :  { %v4242_v46 = vsel %vm867_vm8, 1.0, %v6393_v35  ;;  %v4245_v44 = vsel %vm868_vm9, 1.0, %v6393_v35 }
 0x24e   :  { %6412 = vst [vmem:[#allocation27_spill] sm:$0xff] %v4242_v46 }
 0x24f   :  { %6413 = vst [vmem:[#allocation28_spill] sm:$0xff] %v4245_v44 }
 0x251   :  { %v1335_v20 = vpop.f32.mrf.mxu0  ;;  %v1345_v38 = vpop.f32.mrf.mxu1 }
 0x252   :  { %v1471_v43 = vmul.f32 %v4212_v24, %v1335_v20  ;;  %v1475_v33 = vmul.f32 %v4215_v50, %v1345_v38  ;;  %v4236_v20 = vsel %vm864_vm5, 1.0, %v6393_v35  ;;  %v4239_v38 = vsel %vm863_vm6, 1.0, %v6393_v35 }
 0x253   :  { %6410 = vst [vmem:[#allocation25_spill] sm:$0xff] %v4236_v20  ;;  %v1473_v60 = vmul.f32 %v4236_v20, %v1340_v42  ;;  %v1472_v63 = vmul.f32 %v4239_v38, %v4147_v52  ;;  %v6415_v42 = vfloor.f32 %v4056_v14  ;;  %v57_v14 = vadd.s32 168, %v3896_v25 }
 0x254   :  { %v1525_v6 = vpack.c.bf16 %v1471_v43, %v1470_v26  ;;  %v1527_v12 = vpack.c.bf16 %v1475_v33, %v1474_v22  ;;  %6411 = vst [vmem:[#allocation26_spill] sm:$0xff] %v4239_v38 }
 0x255   :  { %v1526_v22 = vpack.c.bf16 %v1473_v60, %v1472_v63  ;;  %vm870_vm11 = vcmp.eq.f32.partialorder %v4152_v15, %v6415_v42  ;;  %v113_v63 = vcvt.s32.f32 %v57_v14  ;;  %v6419_v42 = vfloor.f32 %v4082_v58 }
 0x256   :  { %3402 = vmatmul.msk.bf16.gmra.mxu0 %vm1202_vm1, %v1525_v6  ;;  %3404 = vmatmul.msk.bf16.vlgmr.msra.gmra.mxu2 %vm1202_vm1, %v1527_v12  ;;  %v6414_v6 = vfloor.f32 %v4054_v0  ;;  %v4264_v12 = vsel %vm870_vm11, 1.0, %v6393_v35  ;;  %v56_v0 = vadd.s32 160, %v3896_v25 }
 0x257   :  { %6417 = vst [vmem:[#allocation30_spill] sm:$0xff] %v4264_v12  ;;  %vm872_vm13 = vcmp.eq.f32.partialorder %v4152_v15, %v6419_v42 }
 0x258   :  { %vm869_vm10 = vcmp.eq.f32.partialorder %v4152_v15, %v6414_v6 }
 0x259   :  { %v1348_v18 = vpop.f32.mrf.mxu1  ;;  %v4261_v52 = vsel %vm869_vm10, 1.0, %v6393_v35 }
 0x25a   :  { %v1476_v57 = vmul.f32 %v4242_v46, %v1348_v18  ;;  %6416 = vst [vmem:[#allocation29_spill] sm:$0xff] %v4261_v52 }
 0x261   :  { %v1350_v13 = vpop.f32.mrf.mxu1 }
 0x262   :  { %v1477_v26 = vmul.f32 %v4245_v44, %v1350_v13  ;;  %v112_v13 = vcvt.s32.f32 %v56_v0 }
 0x264   :  { %v1528_v43 = vpack.c.bf16 %v1477_v26, %v1476_v57  ;;  %v171_v26 = vmul.f32 0.035714287, %v112_v13 }
 0x266   :  { %3403 = vmatmul.msk.bf16.gmra.mxu0 %vm1202_vm1, %v1526_v22  ;;  %3405 = vmatmul.msk.bf16.gmra.mxu2 %vm1202_vm1, %v1528_v43  ;;  %v172_v22 = vmul.f32 0.035714287, %v113_v63  ;;  %v6418_v43 = vfloor.f32 %v4080_v39 }
 0x268   :  { %vm871_vm12 = vcmp.eq.f32.partialorder %v4152_v15, %v6418_v43  ;;  %v4276_v6 = vadd.f32 0.017857144, %v172_v22 }
 0x269   :  { %v1353_v33 = vpop.f32.mrf.mxu1 }
 0x26a   :  { %v1478_v18 = vmul.f32 %v4261_v52, %v1353_v33  ;;  %v4274_v33 = vadd.f32 0.017857144, %v171_v26 }
 0x271   :  { %v1355_v61 = vpop.f32.mrf.mxu1 }
 0x272   :  { %v1479_v48 = vmul.f32 %v4264_v12, %v1355_v61  ;;  %v6262_v61 = vfloor.f32 %v4274_v33 }
 0x274   :  { %v1529_v60 = vpack.c.bf16 %v1479_v48, %v1478_v18  ;;  %v4282_v18 = vsel %vm871_vm12, 1.0, %v6393_v35  ;;  %v6263_v48 = vfloor.f32 %v4276_v6  ;;  %v339_v39 = vmul.f32 28.0, %v6262_v61 }
 0x275   :  { %6420 = vst [vmem:[#allocation31_spill] sm:$0xff] %v4282_v18 }
 0x276   :  { %3406 = vmatmul.msk.bf16.gmra.mxu2 %vm1202_vm1, %v1529_v60  ;;  %v4287_v60 = vsel %vm872_vm13, 1.0, %v6393_v35  ;;  %v340_v0 = vmul.f32 28.0, %v6263_v48  ;;  %v4294_v26 = vsub.f32 %v112_v13, %v339_v39 }
 0x277   :  { %6421 = vst [vmem:[#allocation32_spill] sm:$0xff] %v4287_v60 }
 0x278   :  { %v4296_v22 = vsub.f32 %v113_v63, %v340_v0  ;;  %vm451_vm14 = vcmp.eq.f32.partialorder %v3952_v1, %v4294_v26  ;;  %v6422_v63 = vfloor.f32 %v4103_v32 }
 0x279   :  { %v1358_v57 = vpop.f32.mrf.mxu1  ;;  %v3249_v61 = vsel %vm451_vm14, 1.0, %v6393_v35 }
 0x27a   :  { %v1480_v58 = vmul.f32 %v4282_v18, %v1358_v57  ;;  %vm452_vm15 = vcmp.eq.f32.partialorder %v3952_v1, %v4296_v22  ;;  %vm873_vm3 = vcmp.eq.f32.partialorder %v4152_v15, %v6422_v63  ;;  %v6423_v57 = vfloor.f32 %v4105_v49 }
 0x27b   :  { %v3250_v48 = vsel %vm452_vm15, 1.0, %v6393_v35  ;;  %v4314_v39 = vsel %vm873_vm3, 1.0, %v6393_v35  ;;  %v6427_v49 = vfloor.f32 %v4131_v28 }
 0x27c   :  { %v609_v56 = vpack.c.bf16 %v3250_v48, %v3249_v61  ;;  %vm874_vm4 = vcmp.eq.f32.partialorder %v4152_v15, %v6423_v57  ;;  %6424 = vst [vmem:[#allocation33_spill] sm:$0xff] %v4314_v39 }
 0x27d   :  { %v4317_v0 = vsel %vm874_vm4, 1.0, %v6393_v35  ;;  %vm876_vm6 = vcmp.eq.f32.partialorder %v4152_v15, %v6427_v49 }
 0x27e   :  { %3383 = vmatmul.msk.bf16.gmra.mxu1 %vm1230_vm7, %v609_v56  ;;  %6425 = vst [vmem:[#allocation34_spill] sm:$0xff] %v4317_v0 }
 0x281   :  { %v1360_v14 = vpop.f32.mrf.mxu1 }
 0x282   :  { %v1481_v43 = vmul.f32 %v4287_v60, %v1360_v14  ;;  %v6426_v14 = vfloor.f32 %v4129_v47 }
 0x284   :  { %v1530_v42 = vpack.c.bf16 %v1481_v43, %v1480_v58  ;;  %vm875_vm5 = vcmp.eq.f32.partialorder %v4152_v15, %v6426_v14  ;;  %v627_v14 = vmul.f32 0.071428575, %v3952_v1 }
 0x285   :  { %v4329_v43 = vsel %vm875_vm5, 1.0, %v6393_v35 }
 0x286   :  { %3407 = vmatmul.msk.bf16.gmra.mxu2 %vm1202_vm1, %v1530_v42  ;;  %6428 = vst [vmem:[#allocation35_spill] sm:$0xff] %v4329_v43  ;;  %v4332_v42 = vsel %vm876_vm6, 1.0, %v6393_v35 }
 0x287   :  { %6429 = vst [vmem:[#allocation36_spill] sm:$0xff] %v4332_v42 }
 0x289   :  { %v1363_v13 = vpop.f32.mrf.mxu1 }
 0x28a   :  { %v1482_v61 = vmul.f32 %v4314_v39, %v1363_v13 }
 0x291   :  { %v1365_v48 = vpop.f32.mrf.mxu1 }
 0x292   :  { %v1483_v56 = vmul.f32 %v4317_v0, %v1365_v48 }
 0x294   :  { %v1531_v58 = vpack.c.bf16 %v1483_v56, %v1482_v61  ;;  %v636_v56 = vmul.f32 0.071428575, %v4016_v5 }
 0x296   :  { %3408 = vmatmul.msk.bf16.gmra.mxu2 %vm1202_vm1, %v1531_v58  ;;  %v6432_v58 = vfloor.f32 %v4169_v21 }
 0x298   :  { %vm877_vm8 = vcmp.eq.f32.partialorder %v4152_v15, %v6432_v58 }
 0x299   :  { %v4350_v49 = vsel %vm877_vm8, 1.0, %v6393_v35 }
 0x29a   :  { %6434 = vst [vmem:[#allocation39_spill] sm:$0xff] %v4350_v49 }
 0x2b5   :  { %v1368_v32 = vpop.f32.mrf.mxu1 }
 0x2b6   :  { %v1484_v13 = vmul.f32 %v4329_v43, %v1368_v32  ;;  %v6433_v32 = vfloor.f32 %v4171_v27  ;;  %v637_v43 = vmul.f32 0.071428575, %v4018_v7 }
 0x2b8   :  { %vm878_vm9 = vcmp.eq.f32.partialorder %v4152_v15, %v6433_v32  ;;  %v693_v31 = vadd.f32 0.035714287, %v637_v43  ;;  %v635_v43 = vmul.f32 0.071428575, %v3964_v8 }
 0x2ba   :  { %v691_v8 = vadd.f32 0.035714287, %v635_v43  ;;  %v640_v43 = vmul.f32 0.071428575, %v4067_v40  ;;  %v4403_v40 = vadd.s32 208, %v3896_v25 }
 0x2bd   :  { %v1370_v63 = vpop.f32.mrf.mxu1 }
 0x2be   :  { %v1485_v57 = vmul.f32 %v4332_v42, %v1370_v63  ;;  %v4353_v63 = vsel %vm878_vm9, 1.0, %v6393_v35 }
 0x2bf   :  { %6435 = vst [vmem:[#allocation40_spill] sm:$0xff] %v4353_v63 }
 0x2c0   :  { %v1532_v47 = vpack.c.bf16 %v1485_v57, %v1484_v13  ;;  %v692_v13 = vadd.f32 0.035714287, %v636_v56  ;;  %v628_v57 = vadd.f32 0.035714287, %v627_v14  ;;  %v634_v56 = vmul.f32 0.071428575, %v3960_v4 }
 0x2c2   :  { %3409 = vmatmul.msk.bf16.gmra.mxu2 %vm1202_vm1, %v1532_v47  ;;  %v748_v58 = vfloor.f32 %v692_v13  ;;  %v4360_v42 = vfloor.f32 %v628_v57  ;;  %v690_v13 = vadd.f32 0.035714287, %v634_v56  ;;  %v638_v57 = vmul.f32 0.071428575, %v4046_v54 }
 0x2c3   :  { %v4336_v61 = vpop.f32.mrf.mxu0 }
 0x2c4   :  { %6430 = vst [vmem:[#allocation37_spill] sm:$0xff] %v4336_v61  ;;  %vm804_vm10 = vcmp.eq.f32.partialorder %v4360_v42, %v748_v58  ;;  %v694_v4 = vadd.f32 0.035714287, %v638_v57  ;;  %v58_v58 = vadd.s32 176, %v3896_v25 }
 0x2c5   :  { %v1373_v48 = vpop.f32.mrf.mxu1 }
 0x2c6   :  { %v1486_v5 = vmul.f32 %v4350_v49, %v1373_v48  ;;  %v114_v56 = vcvt.s32.f32 %v58_v58 }
 0x2cb   :  { %v4339_v28 = vpop.f32.mrf.mxu0 }
 0x2cc   :  { %6431 = vst [vmem:[#allocation38_spill] sm:$0xff] %v4339_v28 }
 0x2cd   :  { %v1375_v47 = vpop.f32.mrf.mxu1 }
 0x2ce   :  { %v1487_v27 = vmul.f32 %v4353_v63, %v1375_v47  ;;  %v749_v47 = vfloor.f32 %v693_v31 }
 0x2d0   :  { %v1533_v32 = vpack.c.bf16 %v1487_v27, %v1486_v5  ;;  %v746_v5 = vfloor.f32 %v690_v13  ;;  %vm805_vm11 = vcmp.eq.f32.partialorder %v4360_v42, %v749_v47  ;;  %v59_v27 = vadd.s32 184, %v3896_v25 }
 0x2d1   :  { %v750_v13 = vfloor.f32 %v694_v4  ;;  %v173_v47 = vmul.f32 0.035714287, %v114_v56  ;;  %v747_v4 = vfloor.f32 %v691_v8 }
 0x2d2   :  { %3410 = vmatmul.msk.bf16.gmra.mxu2 %vm1202_vm1, %v1533_v32  ;;  %v115_v31 = vcvt.s32.f32 %v59_v27  ;;  %vm802_vm12 = vcmp.eq.f32.partialorder %v4360_v42, %v746_v5  ;;  %v116_v5 = vcvt.s32.f32 %v60_v53 }
 0x2d3   :  { %v4356_v21 = vpop.f32.mrf.mxu0  ;;  %v4386_v58 = vadd.f32 0.017857144, %v173_v47  ;;  %vm806_vm13 = vcmp.eq.f32.partialorder %v4360_v42, %v750_v13  ;;  %vm803_vm14 = vcmp.eq.f32.partialorder %v4360_v42, %v747_v4 }
 0x2d4   :  { %6436 = vst [vmem:[#allocation41_spill] sm:$0xff] %v4356_v21  ;;  %v174_v57 = vmul.f32 0.035714287, %v115_v31  ;;  %v175_v47 = vmul.f32 0.035714287, %v116_v5 }
 0x2d6   :  { %v4388_v27 = vadd.f32 0.017857144, %v174_v57 }
 0x2d9   :  { %v1672_v14 = vpop.f32.mrf.mxu2 }
 0x2da   :  { %v4365_v48 = vsel %vm804_vm10, %v1672_v14, -1e+30  ;;  %v639_v14 = vmul.f32 0.071428575, %v4048_v55  ;;  %v61_v55 = vadd.s32 200, %v3896_v25 }
 0x2db   :  { %v4367_v49 = vpop.f32.mrf.mxu0  ;;  %v1871_v7 = vsel %vm1230_vm7, %v4365_v48, -inf }
 0x2dc   :  { %6437 = vst [vmem:[#allocation42_spill] sm:$0xff] %v4367_v49  ;;  %1872 = vmax.xlane.f32.xlu2 %v1871_v7  ;;  %v695_v30 = vadd.f32 0.035714287, %v639_v14  ;;  %v117_v10 = vcvt.s32.f32 %v61_v55  ;;  %v6280_v14 = vfloor.f32 %v4388_v27  ;;  %v4407_v55 = vadd.f32 0.017857144, %v175_v47 }
 0x2dd   :  { %v696_v47 = vadd.f32 0.035714287, %v640_v43 }
 0x2de   :  { %v751_v19 = vfloor.f32 %v695_v30  ;;  %v176_v49 = vmul.f32 0.035714287, %v117_v10  ;;  %v342_v13 = vmul.f32 28.0, %v6280_v14  ;;  %v63_v30 = vadd.s32 216, %v3896_v25 }
 0x2df   :  { %v6284_v14 = vfloor.f32 %v4407_v55 }
 0x2e0   :  { %v4409_v21 = vadd.f32 0.017857144, %v176_v49  ;;  %vm807_vm15 = vcmp.eq.f32.partialorder %v4360_v42, %v751_v19  ;;  %v119_v4 = vcvt.s32.f32 %v63_v30  ;;  %v641_v30 = vmul.f32 0.071428575, %v4069_v41 }
 0x2e1   :  { %v1674_v32 = vpop.f32.mrf.mxu2  ;;  %v343_v19 = vmul.f32 28.0, %v6284_v14 }
 0x2e2   :  { %v4377_v63 = vsel %vm805_vm11, %v1674_v32, -1e+30  ;;  %v6283_v62 = vfloor.f32 %v4409_v21 }
 0x2e3   :  { %v1667_v54 = vpop.f32.mrf.mxu0  ;;  %v1874_v7 = vsel %vm1230_vm7, %v4377_v63, -inf }
 0x2e4   :  { %1875 = vmax.xlane.f32.xlu0 %v1874_v7  ;;  %v4384_v32 = vsel %vm802_vm12, %v1667_v54, -1e+30  ;;  %v6278_v7 = vfloor.f32 %v4386_v58  ;;  %v344_v43 = vmul.f32 28.0, %v6283_v62 }
 0x2e5   :  { %v1865_v54 = vsel %vm1230_vm7, %v4384_v32, -inf }
 0x2e6   :  { %v341_v53 = vmul.f32 28.0, %v6278_v7  ;;  %v4414_v7 = vsub.f32 %v115_v31, %v342_v13  ;;  %v118_v31 = vcvt.s32.f32 %v4403_v40 }
 0x2e8   :  { %vm454_vm4 = vcmp.eq.f32.partialorder %v3952_v1, %v4414_v7  ;;  %v177_v62 = vmul.f32 0.035714287, %v118_v31 }
 0x2e9   :  { %v1677_v24 = vpop.f32.mrf.mxu2 }
 0x2ea   :  { %v4396_v57 = vsel %vm806_vm13, %v1677_v24, -1e+30  ;;  %v4412_v24 = vsub.f32 %v114_v56, %v341_v53  ;;  %v3252_v56 = vsel %vm454_vm4, 1.0, %v6393_v35 }
 0x2eb   :  { %v1877_v8 = vsel %vm1230_vm7, %v4396_v57, -inf  ;;  %v1669_v38 = vpop.f32.mrf.mxu0 }
 0x2ec   :  { %1878 = vmax.xlane.f32.xlu1 %v1877_v8  ;;  %1866 = vmax.xlane.f32.xlu0 %v1865_v54  ;;  %vm453_vm3 = vcmp.eq.f32.partialorder %v3952_v1, %v4412_v24  ;;  %v4427_v54 = vsel %vm803_vm14, %v1669_v38, -1e+30  ;;  %v752_v38 = vfloor.f32 %v696_v47  ;;  %v4450_v47 = vadd.f32 0.017857144, %v177_v62 }
 0x2ed   :  { %v3251_v49 = vsel %vm453_vm3, 1.0, %v6393_v35  ;;  %v1868_v40 = vsel %vm1230_vm7, %v4427_v54, -inf }
 0x2ee   :  { %v610_v53 = vpack.c.bf16 %v3252_v56, %v3251_v49  ;;  %v4441_v49 = vsub.f32 %v116_v5, %v343_v19  ;;  %v4443_v56 = vsub.f32 %v117_v10, %v344_v43  ;;  %vm808_vm5 = vcmp.eq.f32.partialorder %v4360_v42, %v752_v38 }
 0x2ef   :  { %v6285_v38 = vfloor.f32 %v4450_v47 }
 0x2f0   :  { %3384 = vmatmul.msk.bf16.gmra.mxu1 %vm1230_vm7, %v610_v53  ;;  %v697_v53 = vadd.f32 0.035714287, %v641_v30  ;;  %vm455_vm6 = vcmp.eq.f32.partialorder %v3952_v1, %v4441_v49  ;;  %vm456_vm8 = vcmp.eq.f32.partialorder %v3952_v1, %v4443_v56 }
 0x2f1   :  { %v1679_v13 = vpop.f32.mrf.mxu2  ;;  %v3253_v43 = vsel %vm455_vm6, 1.0, %v6393_v35 }
 0x2f2   :  { %v4433_v8 = vsel %vm807_vm15, %v1679_v13, -1e+30  ;;  %v178_v13 = vmul.f32 0.035714287, %v119_v4  ;;  %v753_v19 = vfloor.f32 %v697_v53 }
 0x2f3   :  { %v1880_v20 = vsel %vm1230_vm7, %v4433_v8, -inf }
 0x2f4   :  { %1881 = vmax.xlane.f32.xlu0 %v1880_v20  ;;  %1869 = vmax.xlane.f32.xlu1 %v1868_v40  ;;  %v4452_v41 = vadd.f32 0.017857144, %v178_v13  ;;  %v3254_v40 = vsel %vm456_vm8, 1.0, %v6393_v35  ;;  %vm809_vm9 = vcmp.eq.f32.partialorder %v4360_v42, %v753_v19  ;;  %v345_v13 = vmul.f32 28.0, %v6285_v38 }
 0x2f5   :  { %v611_v62 = vpack.c.bf16 %v3254_v40, %v3253_v43  ;;  %v64_v19 = vadd.s32 224, %v3896_v25  ;;  %v65_v40 = vadd.s32 232, %v3896_v25 }
 0x2f6   :  { %v6287_v30 = vfloor.f32 %v4452_v41  ;;  %v4472_v28 = vsub.f32 %v118_v31, %v345_v13 }
 0x2f7   :  { %v120_v38 = vcvt.s32.f32 %v64_v19  ;;  %v121_v17 = vcvt.s32.f32 %v65_v40 }
 0x2f8   :  { %vm457_vm10 = vcmp.eq.f32.partialorder %v3952_v1, %v4472_v28 }
 0x2f9   :  { %v1682_v20 = vpop.f32.mrf.mxu2 }
 0x2fa   :  { %v4454_v5 = vsel %vm808_vm5, %v1682_v20, -1e+30  ;;  %v346_v20 = vmul.f32 28.0, %v6287_v30 }
 0x2fb   :  { %v1883_v10 = vsel %vm1230_vm7, %v4454_v5, -inf }
 0x2fc   :  { %1884 = vmax.xlane.f32.xlu1 %v1883_v10  ;;  %v4474_v43 = vsub.f32 %v119_v4, %v346_v20 }
 0x2fe   :  { %vm458_vm11 = vcmp.eq.f32.partialorder %v3952_v1, %v4474_v43 }
 0x2ff   :  { %v3256_v31 = vsel %vm458_vm11, 1.0, %v6393_v35 }
 0x300   :  { %3385 = vmatmul.msk.bf16.gmra.mxu1 %vm1230_vm7, %v611_v62  ;;  %v180_v62 = vmul.f32 0.035714287, %v121_v17 }
 0x301   :  { %v1684_v14 = vpop.f32.mrf.mxu2 }
 0x302   :  { %v4467_v53 = vsel %vm809_vm9, %v1684_v14, -1e+30  ;;  %v179_v14 = vmul.f32 0.035714287, %v120_v38  ;;  %v4486_v13 = vadd.f32 0.017857144, %v180_v62 }
 0x303   :  { %v1886_v10 = vsel %vm1230_vm7, %v4467_v53, -inf }
 0x304   :  { %1887 = vmax.xlane.f32.xlu0 %v1886_v10  ;;  %v3255_v10 = vsel %vm457_vm10, 1.0, %v6393_v35  ;;  %v4484_v4 = vadd.f32 0.017857144, %v179_v14  ;;  %v6290_v19 = vfloor.f32 %v4486_v13 }
 0x305   :  { %v612_v40 = vpack.c.bf16 %v3256_v31, %v3255_v10  ;;  %v1378_v31 = vpop.f32.mrf.mxu1 }
 0x306   :  { %v6291_v20 = vfloor.f32 %v4484_v4  ;;  %v348_v50 = vmul.f32 28.0, %v6290_v19 }
 0x308   :  { %v347_v30 = vmul.f32 28.0, %v6291_v20  ;;  %v4497_v59 = vsub.f32 %v121_v17, %v348_v50  ;;  %v6439_v17 = vfloor.f32 %v4276_v6 }
 0x30a   :  { %v4495_v61 = vsub.f32 %v120_v38, %v347_v30  ;;  %vm460_vm13 = vcmp.eq.f32.partialorder %v3952_v1, %v4497_v59  ;;  %vm880_vm15 = vcmp.eq.f32.partialorder %v4152_v15, %v6439_v17  ;;  %v66_v38 = vadd.s32 240, %v3896_v25 }
 0x30b   :  { %v3258_v62 = vsel %vm460_vm13, 1.0, %v6393_v35  ;;  %v67_v30 = vadd.s32 248, %v3896_v25 }
 0x30c   :  { %vm459_vm12 = vcmp.eq.f32.partialorder %v3952_v1, %v4495_v61 }
 0x30d   :  { %v3257_v14 = vsel %vm459_vm12, 1.0, %v6393_v35  ;;  %v1380_v19 = vpop.f32.mrf.mxu1 }
 0x30e   :  { %v613_v10 = vpack.c.bf16 %v3258_v62, %v3257_v14  ;;  %v4518_v14 = vsel %vm880_vm15, 1.0, %v6393_v35  ;;  %v122_v62 = vcvt.s32.f32 %v66_v38 }
 0x30f   :  { %6441 = vst [vmem:[#allocation44_spill] sm:$0xff] %v4518_v14  ;;  %v1489_v6 = vmul.f32 %v4518_v14, %v1380_v19 }
 0x310   :  { %3386 = vmatmul.msk.bf16.gmra.mxu1 %vm1230_vm7, %v612_v40  ;;  %v6438_v40 = vfloor.f32 %v4274_v33 }
 0x312   :  { %vm879_vm14 = vcmp.eq.f32.partialorder %v4152_v15, %v6438_v40  ;;  %v181_v40 = vmul.f32 0.035714287, %v122_v62 }
 0x313   :  { %v4513_v50 = vsel %vm879_vm14, 1.0, %v6393_v35 }
 0x314   :  { %6440 = vst [vmem:[#allocation43_spill] sm:$0xff] %v4513_v50  ;;  %v1488_v33 = vmul.f32 %v4513_v50, %v1378_v31  ;;  %v4522_v17 = vadd.f32 0.017857144, %v181_v40  ;;  %v4537_v40 = vpop.f32.mrf.mxu2 }
 0x316   :  { %v1534_v44 = vpack.c.bf16 %v1489_v6, %v1488_v33  ;;  %v6297_v52 = vfloor.f32 %v4522_v17 }
 0x318   :  { %3411 = vmatmul.msk.bf16.gmra.mxu2 %vm1202_vm1, %v1534_v44  ;;  %v349_v38 = vmul.f32 28.0, %v6297_v52 }
 0x31c   :  { %v4546_v6 = vpop.f32.mrf.mxu2 }
 0x320   :  { %3387 = vmatmul.msk.bf16.gmra.mxu1 %vm1230_vm7, %v613_v10  ;;  %v123_v10 = vcvt.s32.f32 %v67_v30  ;;  %v4533_v30 = vsub.f32 %v122_v62, %v349_v38 }
 0x322   :  { %v182_v20 = vmul.f32 0.035714287, %v123_v10  ;;  %6442 = vst [vmem:[#allocation45_spill] sm:$0xff] %v4533_v30  ;;  %vm461_vm3 = vcmp.eq.f32.partialorder %v3952_v1, %v4533_v30 }
 0x323   :  { %v3259_v44 = vsel %vm461_vm3, 1.0, %v6393_v35 }
 0x324   :  { %v4524_v46 = vadd.f32 0.017857144, %v182_v20  ;;  %v4548_v62 = vpop.f32.mrf.mxu2 }
 0x326   :  { %v6296_v12 = vfloor.f32 %v4524_v46 }
 0x328   :  { %v350_v31 = vmul.f32 28.0, %v6296_v12 }
 0x32a   :  { %v4535_v19 = vsub.f32 %v123_v10, %v350_v31 }
 0x32c   :  { %6443 = vst [vmem:[#allocation46_spill] sm:$0xff] %v4535_v19  ;;  %vm462_vm4 = vcmp.eq.f32.partialorder %v3952_v1, %v4535_v19  ;;  %v4551_v12 = vpop.f32.mrf.mxu2 }
 0x32d   :  { %v3260_v20 = vsel %vm462_vm4, 1.0, %v6393_v35 }
 0x32e   :  { %v614_v33 = vpack.c.bf16 %v3260_v20, %v3259_v44 }
 0x330   :  { %3388 = vmatmul.msk.bf16.gmra.mxu1 %vm1230_vm7, %v614_v33  ;;  %v647_v33 = vmul.f32 0.071428575, %v4141_v36  ;;  %v648_v36 = vmul.f32 0.071428575, %v4182_v37 }
 0x345   :  { %v4558_v20 = vpop.f32.mrf.mxu2 }
 0x34f   :  { %v1873_v10 = vpop.xlane.xlu2 %1872 }
 0x350   :  { %v2027_v38 = vsub.f32 %v4365_v48, %v1873_v10 }
 0x352   :  { %v2089_v31 = vmul.f32 1.442695, %v2027_v38 }
 0x354   :  { %3539 = vpow2.f32 %v2089_v31 }
 0x357   :  { %v1876_v52 = vpop.xlane.xlu0 %1875 }
 0x358   :  { %v2028_v50 = vsub.f32 %v4377_v63, %v1876_v52 }
 0x35a   :  { %v4554_v14 = vpop.eup %3539  ;;  %v2091_v18 = vmul.f32 1.442695, %v2028_v50  ;;  %v703_v50 = vadd.f32 0.035714287, %v647_v33 }
 0x35b   :  { %v2207_v44 = vsel %vm1230_vm7, %v4554_v14, 0.0 }
 0x35c   :  { %3541 = vpow2.f32 %v2091_v18  ;;  %2208 = vadd.xlane.f32.xlu2 %v2207_v44  ;;  %v759_v18 = vfloor.f32 %v703_v50 }
 0x35e   :  { %vm815_vm5 = vcmp.eq.f32.partialorder %v4360_v42, %v759_v18 }
 0x35f   :  { %v1879_v48 = vpop.xlane.xlu1 %1878  ;;  %v1867_v10 = vpop.xlane.xlu0 %1866 }
 0x360   :  { %v2029_v38 = vsub.f32 %v4396_v57, %v1879_v48  ;;  %v2025_v31 = vsub.f32 %v4384_v32, %v1867_v10  ;;  %v1699_v57 = vpop.f32.mrf.mxu2  ;;  %v68_v32 = vadd.s32 256, %v3896_v25 }
 0x362   :  { %v4563_v60 = vpop.eup %3541  ;;  %v2093_v52 = vmul.f32 1.442695, %v2029_v38  ;;  %v2085_v63 = vmul.f32 1.442695, %v2025_v31  ;;  %v704_v38 = vadd.f32 0.035714287, %v648_v36  ;;  %v6444_v36 = vfloor.f32 %v4386_v58 }
 0x363   :  { %v2210_v3 = vsel %vm1230_vm7, %v4563_v60, 0.0  ;;  %v69_v31 = vadd.s32 264, %v3896_v25 }
 0x364   :  { %3543 = vpow2.f32 %v2093_v52  ;;  %2211 = vadd.xlane.f32.xlu2 %v2210_v3  ;;  %v124_v52 = vcvt.s32.f32 %v68_v32  ;;  %v760_v50 = vfloor.f32 %v704_v38  ;;  %vm881_vm6 = vcmp.eq.f32.partialorder %v4152_v15, %v6444_v36 }
 0x365   :  { %3545 = vpow2.f32 %v2085_v63  ;;  %v4599_v58 = vsel %vm881_vm6, 1.0, %v6393_v35 }
 0x366   :  { %v183_v63 = vmul.f32 0.035714287, %v124_v52  ;;  %vm816_vm9 = vcmp.eq.f32.partialorder %v4360_v42, %v760_v50  ;;  %6446 = vst [vmem:[#allocation47_spill] sm:$0xff] %v4599_v58 }
 0x367   :  { %v1870_v44 = vpop.xlane.xlu1 %1869 }
 0x368   :  { %v2026_v0 = vsub.f32 %v4427_v54, %v1870_v44  ;;  %v125_v54 = vcvt.s32.f32 %v69_v31  ;;  %v4582_v39 = vadd.f32 0.017857144, %v183_v63  ;;  %v6445_v31 = vfloor.f32 %v4388_v27  ;;  %v1702_v38 = vpop.f32.mrf.mxu2 }
 0x36a   :  { %v4570_v48 = vpop.eup %3543  ;;  %v2087_v10 = vmul.f32 1.442695, %v2026_v0  ;;  %v4580_v0 = vsel %vm815_vm5, %v1699_v57, -1e+30  ;;  %v184_v44 = vmul.f32 0.035714287, %v125_v54  ;;  %vm882_vm8 = vcmp.eq.f32.partialorder %v4152_v15, %v6445_v31 }
 0x36b   :  { %v4573_v33 = vpop.eup %3545  ;;  %v2213_v3 = vsel %vm1230_vm7, %v4570_v48, 0.0  ;;  %v1904_v32 = vsel %vm1230_vm7, %v4580_v0, -inf  ;;  %v4607_v27 = vsel %vm882_vm8, 1.0, %v6393_v35  ;;  %v4613_v31 = vsel %vm816_vm9, %v1702_v38, -1e+30 }
 0x36c   :  { %2214 = vadd.xlane.f32.xlu2 %v2213_v3  ;;  %v2201_v37 = vsel %vm1230_vm7, %v4573_v33, 0.0  ;;  %3547 = vpow2.f32 %v2087_v10  ;;  %v4589_v3 = vadd.f32 0.017857144, %v184_v44  ;;  %v6308_v10 = vfloor.f32 %v4582_v39  ;;  %6447 = vst [vmem:[#allocation48_spill] sm:$0xff] %v4607_v27 }
 0x36d   :  { %2202 = vadd.xlane.f32.xlu1 %v2201_v37  ;;  %v1383_v18 = vpop.f32.mrf.mxu1 }
 0x36e   :  { %v6309_v37 = vfloor.f32 %v4589_v3  ;;  %v351_v63 = vmul.f32 28.0, %v6308_v10  ;;  %v1490_v2 = vmul.f32 %v4599_v58, %v1383_v18  ;;  %v1907_v10 = vsel %vm1230_vm7, %v4613_v31, -inf }
 0x370   :  { %v352_v50 = vmul.f32 28.0, %v6309_v37  ;;  %v4611_v36 = vsub.f32 %v124_v52, %v351_v63  ;;  %v70_v63 = vadd.s32 272, %v3896_v25  ;;  %v6449_v37 = vfloor.f32 %v4409_v21 }
 0x372   :  { %v4595_v57 = vpop.eup %3547  ;;  %v4616_v30 = vsub.f32 %v125_v54, %v352_v50  ;;  %vm463_vm10 = vcmp.eq.f32.partialorder %v3952_v1, %v4611_v36  ;;  %v71_v50 = vadd.s32 280, %v3896_v25  ;;  %vm884_vm13 = vcmp.eq.f32.partialorder %v4152_v15, %v6449_v37 }
 0x373   :  { %v2204_v44 = vsel %vm1230_vm7, %v4595_v57, 0.0 }
 0x374   :  { %1905 = vmax.xlane.f32.xlu2 %v1904_v32  ;;  %2205 = vadd.xlane.f32.xlu0 %v2204_v44  ;;  %v3261_v44 = vsel %vm463_vm10, 1.0, %v6393_v35  ;;  %vm464_vm11 = vcmp.eq.f32.partialorder %v3952_v1, %v4616_v30 }
 0x375   :  { %v1385_v19 = vpop.f32.mrf.mxu1  ;;  %v3262_v38 = vsel %vm464_vm11, 1.0, %v6393_v35 }
 0x376   :  { %v1491_v32 = vmul.f32 %v4607_v27, %v1385_v19  ;;  %v615_v18 = vpack.c.bf16 %v3262_v38, %v3261_v44  ;;  %v6448_v19 = vfloor.f32 %v4407_v55  ;;  %v4641_v44 = vsel %vm884_vm13, 1.0, %v6393_v35 }
 0x377   :  { %6451 = vst [vmem:[#allocation50_spill] sm:$0xff] %v4641_v44 }
 0x378   :  { %v1535_v52 = vpack.c.bf16 %v1491_v32, %v1490_v2  ;;  %3389 = vmatmul.msk.bf16.gmra.mxu1 %vm1230_vm7, %v615_v18  ;;  %vm883_vm12 = vcmp.eq.f32.partialorder %v4152_v15, %v6448_v19  ;;  %v127_v32 = vcvt.s32.f32 %v71_v50 }
 0x379   :  { %v4638_v2 = vsel %vm883_vm12, 1.0, %v6393_v35 }
 0x37a   :  { %3412 = vmatmul.msk.bf16.gmra.mxu2 %vm1202_vm1, %v1535_v52  ;;  %6450 = vst [vmem:[#allocation49_spill] sm:$0xff] %v4638_v2  ;;  %v186_v55 = vmul.f32 0.035714287, %v127_v32 }
 0x37c   :  { %1908 = vmax.xlane.f32.xlu2 %v1907_v10  ;;  %v126_v10 = vcvt.s32.f32 %v70_v63  ;;  %v4647_v21 = vadd.f32 0.017857144, %v186_v55 }
 0x37d   :  { %v1388_v54 = vpop.f32.mrf.mxu1 }
 0x37e   :  { %v185_v52 = vmul.f32 0.035714287, %v126_v10  ;;  %v1492_v38 = vmul.f32 %v4638_v2, %v1388_v54  ;;  %v6312_v50 = vfloor.f32 %v4647_v21 }
 0x380   :  { %v4645_v19 = vadd.f32 0.017857144, %v185_v52 }
 0x382   :  { %v6313_v63 = vfloor.f32 %v4645_v19 }
 0x384   :  { %v353_v27 = vmul.f32 28.0, %v6313_v63 }
 0x385   :  { %v1390_v18 = vpop.f32.mrf.mxu1 }
 0x386   :  { %2499 = vrot.lane.b32.xlu1 %v3976_v23, %s3778_s14  ;;  %v1493_v37 = vmul.f32 %v4641_v44, %v1390_v18  ;;  %v354_v23 = vmul.f32 28.0, %v6312_v50  ;;  %v4658_v54 = vsub.f32 %v126_v10, %v353_v27  ;;  %v6453_v18 = vfloor.f32 %v4450_v47 }
 0x387   :  { %v72_v27 = vadd.s32 288, %v3896_v25  ;;  %v73_v10 = vadd.s32 296, %v3896_v25  ;;  %v6455_v47 = vfloor.f32 %v4452_v41 }
 0x388   :  { %2497 = vrot.lane.b32.xlu0 %v3917_v45, %s3778_s14  ;;  %v1536_v58 = vpack.c.bf16 %v1493_v37, %v1492_v38  ;;  %v4660_v52 = vsub.f32 %v127_v32, %v354_v23  ;;  %vm465_vm14 = vcmp.eq.f32.partialorder %v3952_v1, %v4658_v54  ;;  %vm885_vm3 = vcmp.eq.f32.partialorder %v4152_v15, %v6453_v18 }
 0x389   :  { %v3263_v55 = vsel %vm465_vm14, 1.0, %v6393_v35  ;;  %v128_v32 = vcvt.s32.f32 %v72_v27  ;;  %v129_v37 = vcvt.s32.f32 %v73_v10  ;;  %v4675_v23 = vsel %vm885_vm3, 1.0, %v6393_v35 }
 0x38a   :  { %3413 = vmatmul.msk.bf16.gmra.mxu2 %vm1202_vm1, %v1536_v58  ;;  %6452 = vst [vmem:[#allocation51_spill] sm:$0xff] %v4660_v52  ;;  %vm466_vm15 = vcmp.eq.f32.partialorder %v3952_v1, %v4660_v52  ;;  %vm886_vm4 = vcmp.eq.f32.partialorder %v4152_v15, %v6455_v47 }
 0x38b   :  { %v3264_v38 = vsel %vm466_vm15, 1.0, %v6393_v35  ;;  %6454 = vst [vmem:[#allocation52_spill] sm:$0xff] %v4675_v23  ;;  %v187_v50 = vmul.f32 0.035714287, %v128_v32  ;;  %v188_v63 = vmul.f32 0.035714287, %v129_v37 }
 0x38c   :  { %v616_v58 = vpack.c.bf16 %v3264_v38, %v3263_v55  ;;  %v4686_v18 = vsel %vm886_vm4, 1.0, %v6393_v35 }
 0x38d   :  { %v1393_v45 = vpop.f32.mrf.mxu1  ;;  %v4681_v55 = vadd.f32 0.017857144, %v187_v50  ;;  %v4683_v38 = vadd.f32 0.017857144, %v188_v63  ;;  %6456 = vst [vmem:[#allocation53_spill] sm:$0xff] %v4686_v18 }
 0x38e   :  { %3390 = vmatmul.msk.bf16.gmra.mxu1 %vm1230_vm7, %v616_v58  ;;  %v1494_v2 = vmul.f32 %v4675_v23, %v1393_v45  ;;  %v642_v63 = vmul.f32 0.071428575, %v4090_v11 }
 0x38f   :  { %v6318_v10 = vfloor.f32 %v4681_v55  ;;  %v6317_v44 = vfloor.f32 %v4683_v38 }
 0x391   :  { %v355_v41 = vmul.f32 28.0, %v6318_v10  ;;  %v356_v50 = vmul.f32 28.0, %v6317_v44  ;;  %v6459_v10 = vfloor.f32 %v4486_v13 }
 0x393   :  { %v4697_v45 = vsub.f32 %v128_v32, %v355_v41  ;;  %v4699_v47 = vsub.f32 %v129_v37, %v356_v50  ;;  %vm888_vm9 = vcmp.eq.f32.partialorder %v4152_v15, %v6459_v10 }
 0x395   :  { %v1395_v58 = vpop.f32.mrf.mxu1  ;;  %vm467_vm5 = vcmp.eq.f32.partialorder %v3952_v1, %v4697_v45  ;;  %vm468_vm6 = vcmp.eq.f32.partialorder %v3952_v1, %v4699_v47 }
 0x396   :  { %v1495_v27 = vmul.f32 %v4686_v18, %v1395_v58  ;;  %v643_v58 = vmul.f32 0.071428575, %v4092_v16  ;;  %v3265_v44 = vsel %vm467_vm5, 1.0, %v6393_v35  ;;  %v3266_v11 = vsel %vm468_vm6, 1.0, %v6393_v35 }
 0x397   :  { %v617_v32 = vpack.c.bf16 %v3266_v11, %v3265_v44  ;;  %v645_v44 = vmul.f32 0.071428575, %v4115_v29  ;;  %v4723_v11 = vsel %vm888_vm9, 1.0, %v6393_v35 }
 0x398   :  { %v1537_v52 = vpack.c.bf16 %v1495_v27, %v1494_v2  ;;  %v698_v2 = vadd.f32 0.035714287, %v642_v63  ;;  %v699_v41 = vadd.f32 0.035714287, %v643_v58  ;;  %v644_v63 = vmul.f32 0.071428575, %v4113_v34 }
 0x399   :  { %6460 = vst [vmem:[#allocation55_spill] sm:$0xff] %v4723_v11  ;;  %v74_v34 = vadd.s32 304, %v3896_v25  ;;  %v701_v29 = vadd.f32 0.035714287, %v645_v44 }
 0x39a   :  { %3414 = vmatmul.msk.bf16.gmra.mxu2 %vm1202_vm1, %v1537_v52  ;;  %v6457_v52 = vfloor.f32 %v4484_v4  ;;  %v754_v37 = vfloor.f32 %v698_v2  ;;  %v755_v4 = vfloor.f32 %v699_v41  ;;  %v700_v58 = vadd.f32 0.035714287, %v644_v63 }
 0x39c   :  { %vm887_vm8 = vcmp.eq.f32.partialorder %v4152_v15, %v6457_v52  ;;  %vm810_vm10 = vcmp.eq.f32.partialorder %v4360_v42, %v754_v37  ;;  %v130_v37 = vcvt.s32.f32 %v74_v34  ;;  %vm811_vm11 = vcmp.eq.f32.partialorder %v4360_v42, %v755_v4 }
 0x39d   :  { %v1398_v27 = vpop.f32.mrf.mxu1  ;;  %v4713_v50 = vsel %vm887_vm8, 1.0, %v6393_v35  ;;  %v4729_v13 = vsel %vm810_vm10, %v4537_v40, -1e+30  ;;  %v756_v23 = vfloor.f32 %v700_v58  ;;  %v4738_v40 = vsel %vm811_vm11, %v4546_v6, -1e+30 }
 0x39e   :  { %3391 = vmatmul.msk.bf16.gmra.mxu1 %vm1230_vm7, %v617_v32  ;;  %6458 = vst [vmem:[#allocation54_spill] sm:$0xff] %v4713_v50  ;;  %v1496_v16 = vmul.f32 %v4713_v50, %v1398_v27  ;;  %v75_v27 = vadd.s32 312, %v3896_v25  ;;  %v1882_v32 = vpop.xlane.xlu0 %1881  ;;  %v189_v63 = vmul.f32 0.035714287, %v130_v37  ;;  %v646_v50 = vmul.f32 0.071428575, %v4139_v51 }
 0x39f   :  { %v2030_v18 = vsub.f32 %v4433_v8, %v1882_v32  ;;  %v757_v4 = vfloor.f32 %v701_v29  ;;  %vm812_vm12 = vcmp.eq.f32.partialorder %v4360_v42, %v756_v23  ;;  %v1892_v34 = vsel %vm1230_vm7, %v4738_v40, -inf }
 0x3a0   :  { %v131_v41 = vcvt.s32.f32 %v75_v27  ;;  %v702_v51 = vadd.f32 0.035714287, %v646_v50  ;;  %v1885_v27 = vpop.xlane.xlu1 %1884  ;;  %v4754_v32 = vsel %vm812_vm12, %v4548_v62, -1e+30 }
 0x3a1   :  { %v2095_v8 = vmul.f32 1.442695, %v2030_v18  ;;  %vm813_vm13 = vcmp.eq.f32.partialorder %v4360_v42, %v757_v4  ;;  %v2031_v29 = vsub.f32 %v4454_v5, %v1885_v27  ;;  %v6461_v4 = vfloor.f32 %v4522_v17 }
 0x3a3   :  { %3549 = vpow2.f32 %v2095_v8  ;;  %vm889_vm3 = vcmp.eq.f32.partialorder %v4152_v15, %v6461_v4  ;;  %v76_v8 = vadd.s32 320, %v3896_v25 }
 0x3a5   :  { %v1400_v2 = vpop.f32.mrf.mxu1 }
 0x3a6   :  { %v1497_v52 = vmul.f32 %v4723_v11, %v1400_v2  ;;  %v190_v2 = vmul.f32 0.035714287, %v131_v41  ;;  %v1889_v11 = vsel %vm1230_vm7, %v4729_v13, -inf  ;;  %v1888_v23 = vpop.xlane.xlu0 %1887 }
 0x3a7   :  { %v2032_v62 = vsub.f32 %v4467_v53, %v1888_v23  ;;  %v4786_v23 = vsel %vm889_vm3, 1.0, %v6393_v35 }
 0x3a8   :  { %v1538_v10 = vpack.c.bf16 %v1497_v52, %v1496_v16  ;;  %v4740_v16 = vadd.f32 0.017857144, %v189_v63  ;;  %v4742_v52 = vadd.f32 0.017857144, %v190_v2  ;;  %v1895_v63 = vsel %vm1230_vm7, %v4754_v32, -inf  ;;  %6462 = vst [vmem:[#allocation56_spill] sm:$0xff] %v4786_v23 }
 0x3a9   :  { %v4765_v2 = vsel %vm813_vm13, %v4551_v12, -1e+30  ;;  %v4781_v53 = vpop.eup %3549 }
 0x3aa   :  { %3415 = vmatmul.msk.bf16.gmra.mxu2 %vm1202_vm1, %v1538_v10  ;;  %v6324_v44 = vfloor.f32 %v4740_v16  ;;  %v6323_v58 = vfloor.f32 %v4742_v52  ;;  %v758_v10 = vfloor.f32 %v702_v51  ;;  %v77_v51 = vadd.s32 328, %v3896_v25 }
 0x3ab   :  { %v1898_v27 = vsel %vm1230_vm7, %v4765_v2, -inf }
 0x3ac   :  { %v357_v6 = vmul.f32 28.0, %v6324_v44  ;;  %vm814_vm4 = vcmp.eq.f32.partialorder %v4360_v42, %v758_v10  ;;  %v133_v17 = vcvt.s32.f32 %v77_v51  ;;  %v2216_v10 = vsel %vm1230_vm7, %v4781_v53, 0.0 }
 0x3ae   :  { %v4757_v18 = vsub.f32 %v130_v37, %v357_v6  ;;  %v1403_v37 = vpop.f32.mrf.mxu1  ;;  %v132_v6 = vcvt.s32.f32 %v76_v8 }
 0x3af   :  { %v1498_v4 = vmul.f32 %v4786_v23, %v1403_v37 }
 0x3b0   :  { %1890 = vmax.xlane.f32.xlu1 %v1889_v11  ;;  %v358_v11 = vmul.f32 28.0, %v6323_v58  ;;  %vm469_vm14 = vcmp.eq.f32.partialorder %v3952_v1, %v4757_v18 }
 0x3b2   :  { %1893 = vmax.xlane.f32.xlu0 %v1892_v34  ;;  %v4759_v50 = vsub.f32 %v131_v41, %v358_v11  ;;  %v3267_v41 = vsel %vm469_vm14, 1.0, %v6393_v35  ;;  %v2097_v34 = vmul.f32 1.442695, %v2031_v29  ;;  %v2099_v11 = vmul.f32 1.442695, %v2032_v62 }
 0x3b3   :  { %v192_v29 = vmul.f32 0.035714287, %v133_v17 }
 0x3b4   :  { %vm470_vm15 = vcmp.eq.f32.partialorder %v3952_v1, %v4759_v50  ;;  %3551 = vpow2.f32 %v2097_v34 }
 0x3b5   :  { %v3268_v5 = vsel %vm470_vm15, 1.0, %v6393_v35  ;;  %v4800_v8 = vadd.f32 0.017857144, %v192_v29  ;;  %3553 = vpow2.f32 %v2099_v11 }
 0x3b6   :  { %v618_v12 = vpack.c.bf16 %v3268_v5, %v3267_v41  ;;  %v191_v41 = vmul.f32 0.035714287, %v132_v6  ;;  %v4790_v5 = vsel %vm814_vm4, %v4558_v20, -1e+30  ;;  %v1405_v20 = vpop.f32.mrf.mxu1 }
 0x3b7   :  { %v6325_v37 = vfloor.f32 %v4800_v8 }
 0x3b8   :  { %1896 = vmax.xlane.f32.xlu1 %v1895_v63  ;;  %3392 = vmatmul.msk.bf16.gmra.mxu1 %vm1230_vm7, %v618_v12  ;;  %v649_v63 = vmul.f32 0.071428575, %v4184_v9  ;;  %v6463_v12 = vfloor.f32 %v4524_v46  ;;  %v4798_v62 = vadd.f32 0.017857144, %v191_v41  ;;  %v1901_v46 = vsel %vm1230_vm7, %v4790_v5, -inf }
 0x3b9   :  { %v650_v41 = vmul.f32 0.071428575, %v4294_v26 }
 0x3ba   :  { %1899 = vmax.xlane.f32.xlu0 %v1898_v27  ;;  %vm890_vm5 = vcmp.eq.f32.partialorder %v4152_v15, %v6463_v12  ;;  %v705_v51 = vadd.f32 0.035714287, %v649_v63  ;;  %v6326_v27 = vfloor.f32 %v4798_v62  ;;  %v4815_v63 = vpop.eup %3551 }
 0x3bb   :  { %v4803_v9 = vsel %vm890_vm5, 1.0, %v6393_v35  ;;  %v4822_v44 = vpop.eup %3553  ;;  %v2219_v26 = vsel %vm1230_vm7, %v4815_v63, 0.0 }
 0x3bc   :  { %6464 = vst [vmem:[#allocation57_spill] sm:$0xff] %v4803_v9  ;;  %v1499_v34 = vmul.f32 %v4803_v9, %v1405_v20  ;;  %v359_v11 = vmul.f32 28.0, %v6326_v27  ;;  %v761_v12 = vfloor.f32 %v705_v51 }
 0x3be   :  { %v1539_v29 = vpack.c.bf16 %v1499_v34, %v1498_v4  ;;  %v4818_v20 = vsub.f32 %v132_v6, %v359_v11  ;;  %v1704_v4 = vpop.f32.mrf.mxu2  ;;  %v706_v34 = vadd.f32 0.035714287, %v650_v41  ;;  %vm817_vm9 = vcmp.eq.f32.partialorder %v4360_v42, %v761_v12 }
 0x3bf   :  { %v4836_v41 = vsel %vm817_vm9, %v1704_v4, -1e+30 }
 0x3c0   :  { %2217 = vadd.xlane.f32.xlu1 %v2216_v10  ;;  %v360_v10 = vmul.f32 28.0, %v6325_v37  ;;  %3416 = vmatmul.msk.bf16.gmra.mxu2 %vm1202_vm1, %v1539_v29  ;;  %vm471_vm6 = vcmp.eq.f32.partialorder %v3952_v1, %v4818_v20  ;;  %v762_v29 = vfloor.f32 %v706_v34  ;;  %v1910_v11 = vsel %vm1230_vm7, %v4836_v41, -inf }
 0x3c1   :  { %v3269_v51 = vsel %vm471_vm6, 1.0, %v6393_v35 }
 0x3c2   :  { %1902 = vmax.xlane.f32.xlu0 %v1901_v46  ;;  %v4820_v58 = vsub.f32 %v133_v17, %v360_v10  ;;  %v2222_v46 = vsel %vm1230_vm7, %v4822_v44, 0.0  ;;  %vm818_vm10 = vcmp.eq.f32.partialorder %v4360_v42, %v762_v29 }
 0x3c4   :  { %6465 = vst [vmem:[#allocation58_spill] sm:$0xff] %v4820_v58  ;;  %vm472_vm8 = vcmp.eq.f32.partialorder %v3952_v1, %v4820_v58 }
 0x3c5   :  { %v3270_v6 = vsel %vm472_vm8, 1.0, %v6393_v35 }
 0x3c6   :  { %v619_v17 = vpack.c.bf16 %v3270_v6, %v3269_v51  ;;  %v1707_v10 = vpop.f32.mrf.mxu2 }
 0x3c8   :  { %2220 = vadd.xlane.f32.xlu1 %v2219_v26  ;;  %3393 = vmatmul.msk.bf16.gmra.mxu1 %vm1230_vm7, %v619_v17  ;;  %v4841_v26 = vsel %vm818_vm10, %v1707_v10, -1e+30 }
 0x3c9   :  { %v1913_v12 = vsel %vm1230_vm7, %v4841_v26, -inf }
 0x3ca   :  { %2223 = vadd.xlane.f32.xlu0 %v2222_v46 }
 0x3cf   :  { %v2209_v34 = vpop.xlane.xlu2 %2208 }
 0x3d0   :  { %1911 = vmax.xlane.f32.xlu1 %v1910_v11 }
 0x3d7   :  { %v2212_v27 = vpop.xlane.xlu2 %2211 }
 0x3d8   :  { %1914 = vmax.xlane.f32.xlu1 %v1913_v12 }
 0x3e0   :  { %v2203_v6 = vpop.xlane.xlu1 %2202 }
 0x3e7   :  { %v2206_v51 = vpop.xlane.xlu0 %2205 }
 0x3e8   :  { %3555 = vrcp.f32 %v2206_v51  ;;  %v6466_v51 = vfloor.f32 %v4582_v39 }
 0x3e9   :  { %3557 = vrcp.f32 %v2203_v6 }
 0x3ea   :  { %vm891_vm11 = vcmp.eq.f32.partialorder %v4152_v15, %v6466_v51  ;;  %3559 = vrcp.f32 %v2212_v27  ;;  %v6470_v51 = vfloor.f32 %v4645_v19 }
 0x3eb   :  { %3561 = vrcp.f32 %v2209_v34  ;;  %v4853_v6 = vsel %vm891_vm11, 1.0, %v6393_v35 }
 0x3ec   :  { %6467 = vst [vmem:[#allocation59_spill] sm:$0xff] %v4853_v6  ;;  %vm893_vm12 = vcmp.eq.f32.partialorder %v4152_v15, %v6470_v51 }
 0x3ee   :  { %v3556_v4 = vpop.eup %3555 }
 0x3ef   :  { %v3558_v37 = vpop.eup %3557  ;;  %v2418_v29 = vmul.f32 %v3556_v4, %v4595_v57 }
 0x3f0   :  { %v2417_v10 = vmul.f32 %v3558_v37, %v4573_v33  ;;  %v6468_v33 = vfloor.f32 %v4589_v3  ;;  %v3560_v37 = vpop.eup %3559 }
 0x3f1   :  { %v2420_v27 = vmul.f32 %v3560_v37, %v4563_v60 }
 0x3f2   :  { %v2471_v23 = vpack.c.bf16 %v2418_v29, %v2417_v10  ;;  %v78_v10 = vadd.s32 336, %v3896_v25 }
 0x3f5   :  { %v1408_v12 = vpop.f32.mrf.mxu1 }
 0x3f6   :  { %v1500_v57 = vmul.f32 %v4853_v6, %v1408_v12  ;;  %v79_v12 = vadd.s32 344, %v3896_v25 }
 0x3f8   :  { %v2500_v17 = vpop.permute.xlu1 %2499 }
 0x3f9   :  { %v2587_v46 = vsel %vm1315_vm2, %v2500_v17, 0  ;;  %vm892_vm2 = vcmp.eq.f32.partialorder %v4152_v15, %v6468_v33  ;;  %v3562_v17 = vpop.eup %3561  ;;  %v134_v33 = vcvt.s32.f32 %v78_v10 }
 0x3fa   :  { %2595 = vmatpush.bf16.msrb.mxu0 %v2587_v46  ;;  %3527 = vmatpush.bf16.msra.mxu3 %v2587_v46  ;;  %v2498_v11 = vpop.permute.xlu0 %2497  ;;  %v4860_v4 = vsel %vm892_vm2, 1.0, %v6393_v35  ;;  %v4863_v46 = vpop.f32.mrf.mxu2  ;;  %v2419_v29 = vmul.f32 %v3562_v17, %v4554_v14  ;;  %v4877_v14 = vsel %vm893_vm12, 1.0, %v6393_v35  ;;  %v6472_v17 = vfloor.f32 %v4647_v21 }
 0x3fb   :  { %6469 = vst [vmem:[#allocation60_spill] sm:$0xff] %v4860_v4 }
 0x3fc   :  { %v2472_v3 = vpack.c.bf16 %v2420_v27, %v2419_v29  ;;  %6471 = vst [vmem:[#allocation61_spill] sm:$0xff] %v4877_v14  ;;  %vm894_vm13 = vcmp.eq.f32.partialorder %v4152_v15, %v6472_v17 }
 0x3fe   :  { %2596 = vmatpush.bf16.msrb.mxu0 %v2498_v11  ;;  %3528 = vmatpush.bf16.msra.mxu3 %v2498_v11 }
 0x401   :  { %3431 = vmatmul.msk.bf16.vlgmr.msra.gmra.mxu3 %vm1230_vm7, %v2471_v23  ;;  %v1410_v23 = vpop.f32.mrf.mxu1 }
 0x402   :  { %v1501_v39 = vmul.f32 %v4860_v4, %v1410_v23  ;;  %v135_v23 = vcvt.s32.f32 %v79_v12  ;;  %v4874_v60 = vpop.f32.mrf.mxu2 }
 0x404   :  { %v1540_v34 = vpack.c.bf16 %v1501_v39, %v1500_v57  ;;  %v193_v57 = vmul.f32 0.035714287, %v134_v33  ;;  %v194_v37 = vmul.f32 0.035714287, %v135_v23 }
 0x406   :  { %3417 = vmatmul.msk.bf16.gmra.mxu2 %vm1202_vm1, %v1540_v34  ;;  %v4883_v27 = vadd.f32 0.017857144, %v193_v57  ;;  %v4885_v19 = vadd.f32 0.017857144, %v194_v37  ;;  %v4888_v34 = vsel %vm894_vm13, 1.0, %v6393_v35 }
 0x407   :  { %6473 = vst [vmem:[#allocation62_spill] sm:$0xff] %v4888_v34 }
 0x408   :  { %v6329_v10 = vfloor.f32 %v4883_v27  ;;  %v6328_v12 = vfloor.f32 %v4885_v19 }
 0x40a   :  { %v361_v21 = vmul.f32 28.0, %v6329_v10  ;;  %v4902_v17 = vpop.f32.mrf.mxu2 }
 0x40b   :  { %v1413_v11 = vpop.f32.mrf.mxu1 }
 0x40c   :  { %v1502_v39 = vmul.f32 %v4877_v14, %v1413_v11  ;;  %v362_v11 = vmul.f32 28.0, %v6328_v12  ;;  %v4898_v57 = vsub.f32 %v134_v33, %v361_v21  ;;  %v2215_v12 = vpop.xlane.xlu2 %2214  ;;  %v81_v21 = vadd.s32 360, %v3896_v25 }
 0x40e   :  { %6474 = vst [vmem:[#allocation63_spill] sm:$0xff] %v4898_v57  ;;  %v4900_v37 = vsub.f32 %v135_v23, %v362_v11  ;;  %vm473_vm14 = vcmp.eq.f32.partialorder %v3952_v1, %v4898_v57  ;;  %v80_v23 = vadd.s32 352, %v3896_v25  ;;  %v651_v11 = vmul.f32 0.071428575, %v4296_v22 }
 0x410   :  { %6475 = vst [vmem:[#allocation64_spill] sm:$0xff] %v4900_v37  ;;  %vm474_vm15 = vcmp.eq.f32.partialorder %v3952_v1, %v4900_v37  ;;  %v136_v9 = vcvt.s32.f32 %v80_v23  ;;  %v707_v37 = vadd.f32 0.035714287, %v651_v11 }
 0x411   :  { %3432 = vmatmul.msk.bf16.gmra.mxu3 %vm1230_vm7, %v2472_v3 }
 0x413   :  { %v1415_v29 = vpop.f32.mrf.mxu1 }
 0x414   :  { %v1503_v3 = vmul.f32 %v4888_v34, %v1415_v29  ;;  %v3271_v29 = vsel %vm473_vm14, 1.0, %v6393_v35  ;;  %v137_v34 = vcvt.s32.f32 %v81_v21 }
 0x416   :  { %v1541_v51 = vpack.c.bf16 %v1503_v3, %v1502_v39  ;;  %v3272_v3 = vsel %vm474_vm15, 1.0, %v6393_v35  ;;  %v196_v6 = vmul.f32 0.035714287, %v137_v34 }
 0x417   :  { %v620_v33 = vpack.c.bf16 %v3272_v3, %v3271_v29  ;;  %v652_v29 = vmul.f32 0.071428575, %v4412_v24 }
 0x418   :  { %3418 = vmatmul.msk.bf16.gmra.mxu2 %vm1202_vm1, %v1541_v51  ;;  %v6476_v51 = vfloor.f32 %v4681_v55  ;;  %v195_v55 = vmul.f32 0.035714287, %v136_v9 }
 0x419   :  { %3394 = vmatmul.msk.bf16.gmra.mxu1 %vm1230_vm7, %v620_v33  ;;  %v6478_v33 = vfloor.f32 %v4683_v38  ;;  %v708_v11 = vadd.f32 0.035714287, %v652_v29 }
 0x41a   :  { %vm895_vm3 = vcmp.eq.f32.partialorder %v4152_v15, %v6476_v51  ;;  %v4927_v23 = vadd.f32 0.017857144, %v195_v55 }
 0x41b   :  { %v1418_v39 = vpop.f32.mrf.mxu1  ;;  %v4919_v4 = vsel %vm895_vm3, 1.0, %v6393_v35  ;;  %vm896_vm4 = vcmp.eq.f32.partialorder %v4152_v15, %v6478_v33 }
 0x41c   :  { %6477 = vst [vmem:[#allocation65_spill] sm:$0xff] %v4919_v4  ;;  %v1504_v22 = vmul.f32 %v4919_v4, %v1418_v39  ;;  %v6339_v39 = vfloor.f32 %v4927_v23 }
 0x41e   :  { %v363_v4 = vmul.f32 28.0, %v6339_v39 }
 0x420   :  { %v4946_v29 = vsub.f32 %v136_v9, %v363_v4 }
 0x422   :  { %vm475_vm6 = vcmp.eq.f32.partialorder %v3952_v1, %v4946_v29 }
 0x423   :  { %v1891_v10 = vpop.xlane.xlu1 %1890  ;;  %v1420_v24 = vpop.f32.mrf.mxu1 }
 0x424   :  { %v2033_v14 = vsub.f32 %v4729_v13, %v1891_v10  ;;  %v4929_v13 = vpop.f32.mrf.mxu2  ;;  %v4932_v10 = vsel %vm896_vm4, 1.0, %v6393_v35 }
 0x425   :  { %v1894_v51 = vpop.xlane.xlu0 %1893  ;;  %6479 = vst [vmem:[#allocation66_spill] sm:$0xff] %v4932_v10 }
 0x426   :  { %v2101_v3 = vmul.f32 1.442695, %v2033_v14  ;;  %v2034_v57 = vsub.f32 %v4738_v40, %v1894_v51  ;;  %v4934_v14 = vadd.f32 0.017857144, %v196_v6  ;;  %v1505_v40 = vmul.f32 %v4932_v10, %v1420_v24  ;;  %v1906_v51 = vpop.xlane.xlu2 %1905 }
 0x427   :  { %v653_v6 = vmul.f32 0.071428575, %v4414_v7 }
 0x428   :  { %3563 = vpow2.f32 %v2101_v3  ;;  %v2103_v21 = vmul.f32 1.442695, %v2034_v57  ;;  %v6340_v38 = vfloor.f32 %v4934_v14  ;;  %v763_v3 = vfloor.f32 %v707_v37 }
 0x429   :  { %v1542_v33 = vpack.c.bf16 %v1505_v40, %v1504_v22  ;;  %v709_v9 = vadd.f32 0.035714287, %v653_v6 }
 0x42a   :  { %3565 = vpow2.f32 %v2103_v21  ;;  %v364_v57 = vmul.f32 28.0, %v6340_v38  ;;  %v764_v21 = vfloor.f32 %v708_v11  ;;  %vm4956_vm5 = vcmp.eq.f32.partialorder %v4360_v42, %v763_v3 }
 0x42b   :  { %v1897_v55 = vpop.xlane.xlu1 %1896  ;;  %3567 = vrcp.f32 %v2215_v12  ;;  %3419 = vmatmul.msk.bf16.gmra.mxu2 %vm1202_vm1, %v1542_v33  ;;  %v82_v12 = vadd.s32 368, %v3896_v25  ;;  %v4970_v11 = vadd.s32 376, %v3896_v25 }
 0x42c   :  { %v2035_v58 = vsub.f32 %v4754_v32, %v1897_v55  ;;  %v4950_v40 = vsub.f32 %v137_v34, %v364_v57  ;;  %v4974_v3 = vpop.f32.mrf.mxu2  ;;  %v2038_v57 = vsub.f32 %v4580_v0, %v1906_v51  ;;  %vm820_vm9 = vcmp.eq.f32.partialorder %v4360_v42, %v764_v21 }
 0x42d   :  { %v1900_v22 = vpop.xlane.xlu0 %1899 }
 0x42e   :  { %v4948_v24 = vpop.eup %3563  ;;  %v2105_v37 = vmul.f32 1.442695, %v2035_v58  ;;  %6480 = vst [vmem:[#allocation67_spill] sm:$0xff] %v4950_v40  ;;  %v2036_v39 = vsub.f32 %v4765_v2, %v1900_v22  ;;  %vm476_vm8 = vcmp.eq.f32.partialorder %v3952_v1, %v4950_v40  ;;  %v3273_v58 = vsel %vm475_vm6, 1.0, %v6393_v35  ;;  %v1909_v38 = vpop.xlane.xlu2 %1908 }
 0x42f   :  { %v2225_v7 = vsel %vm1230_vm7, %v4948_v24, 0.0  ;;  %v3274_v34 = vsel %vm476_vm8, 1.0, %v6393_v35  ;;  %v139_v22 = vcvt.s32.f32 %v4970_v11  ;;  %v2039_v21 = vsub.f32 %v4613_v31, %v1909_v38 }
 0x430   :  { %3569 = vpow2.f32 %v2105_v37  ;;  %2226 = vadd.xlane.f32.xlu0 %v2225_v7  ;;  %v4965_v2 = vpop.eup %3565  ;;  %v2107_v4 = vmul.f32 1.442695, %v2036_v39  ;;  %v621_v33 = vpack.c.bf16 %v3274_v34, %v3273_v58  ;;  %v138_v39 = vcvt.s32.f32 %v82_v12 }
 0x431   :  { %v2228_v55 = vsel %vm1230_vm7, %v4965_v2, 0.0  ;;  %v3568_v6 = vpop.eup %3567  ;;  %v4981_v7 = vsel %vm4956_vm5, %v4863_v46, -1e+30  ;;  %v765_v58 = vfloor.f32 %v709_v9  ;;  %v198_v0 = vmul.f32 0.035714287, %v139_v22 }
 0x432   :  { %3571 = vpow2.f32 %v2107_v4  ;;  %2229 = vadd.xlane.f32.xlu2 %v2228_v55  ;;  %3395 = vmatmul.msk.bf16.gmra.mxu1 %vm1230_vm7, %v621_v33  ;;  %v197_v34 = vmul.f32 0.035714287, %v138_v39  ;;  %v654_v4 = vmul.f32 0.071428575, %v4441_v49  ;;  %v2421_v11 = vmul.f32 %v3568_v6, %v4570_v48 }
 0x433   :  { %v2218_v37 = vpop.xlane.xlu1 %2217  ;;  %v2111_v55 = vmul.f32 1.442695, %v2038_v57  ;;  %v1916_v46 = vsel %vm1230_vm7, %v4981_v7, -inf  ;;  %v4996_v9 = vsel %vm820_vm9, %v4874_v60, -1e+30  ;;  %vm5004_vm10 = vcmp.eq.f32.partialorder %v4360_v42, %v765_v58 }
 0x434   :  { %3573 = vrcp.f32 %v2218_v37  ;;  %v4992_v33 = vadd.f32 0.017857144, %v197_v34  ;;  %v655_v37 = vmul.f32 0.071428575, %v4443_v56  ;;  %v4999_v10 = vadd.f32 0.017857144, %v198_v0 }
 0x435   :  { %v1903_v12 = vpop.xlane.xlu0 %1902  ;;  %v1423_v49 = vpop.f32.mrf.mxu1  ;;  %v6485_v57 = vfloor.f32 %v4740_v16  ;;  %v710_v38 = vadd.f32 0.035714287, %v654_v4 }
 0x436   :  { %v4985_v51 = vpop.eup %3569  ;;  %v2037_v32 = vsub.f32 %v4790_v5, %v1903_v12  ;;  %v6342_v56 = vfloor.f32 %v4992_v33 }
 0x437   :  { %vm5011_vm11 = vcmp.eq.f32.partialorder %v4152_v15, %v6485_v57  ;;  %v2231_v58 = vsel %vm1230_vm7, %v4985_v51, 0.0  ;;  %v711_v57 = vadd.f32 0.035714287, %v655_v37  ;;  %v5043_v37 = vsel %vm5004_vm10, %v4902_v17, -1e+30 }
 0x438   :  { %1917 = vmax.xlane.f32.xlu0 %v1916_v46  ;;  %v5001_v48 = vpop.eup %3571  ;;  %v2109_v6 = vmul.f32 1.442695, %v2037_v32  ;;  %v6488_v32 = vfloor.f32 %v4742_v52  ;;  %v365_v4 = vmul.f32 28.0, %v6342_v56  ;;  %v5027_v46 = vpop.f32.mrf.mxu2  ;;  %v5032_v0 = vsel %vm5011_vm11, 1.0, %v6393_v35 }
 0x439   :  { %v2234_v34 = vsel %vm1230_vm7, %v5001_v48, 0.0  ;;  %6489 = vst [vmem:[#allocation68_spill] sm:$0xff] %v5032_v0 }
 0x43a   :  { %v3574_v60 = vpop.eup %3573  ;;  %3575 = vpow2.f32 %v2109_v6  ;;  %2235 = vadd.xlane.f32.xlu1 %v2234_v34  ;;  %2232 = vadd.xlane.f32.xlu2 %v2231_v58  ;;  %vm898_vm2 = vcmp.eq.f32.partialorder %v4152_v15, %v6488_v32  ;;  %v6490_v6 = vfloor.f32 %v4999_v10  ;;  %v5036_v52 = vsub.f32 %v138_v39, %v365_v4 }
 0x43b   :  { %v2221_v16 = vpop.xlane.xlu1 %2220  ;;  %v2422_v12 = vmul.f32 %v3574_v60, %v4781_v53  ;;  %3577 = vpow2.f32 %v2111_v55  ;;  %v2113_v53 = vmul.f32 1.442695, %v2039_v21  ;;  %v1919_v32 = vsel %vm1230_vm7, %v4996_v9, -inf }
 0x43c   :  { %v366_v34 = vmul.f32 28.0, %v6490_v6  ;;  %6491 = vst [vmem:[#allocation69_spill] sm:$0xff] %v5036_v52  ;;  %v5046_v31 = vsel %vm898_vm2, 1.0, %v6393_v35  ;;  %v766_v6 = vfloor.f32 %v710_v38  ;;  %v656_v39 = vmul.f32 0.071428575, %v4472_v28 }
 0x43d   :  { %v2473_v60 = vpack.c.bf16 %v2422_v12, %v2421_v11  ;;  %v2224_v58 = vpop.xlane.xlu0 %2223  ;;  %6492 = vst [vmem:[#allocation70_spill] sm:$0xff] %v5046_v31  ;;  %v1506_v11 = vmul.f32 %v5032_v0, %v1423_v49  ;;  %vm477_vm12 = vcmp.eq.f32.partialorder %v3952_v1, %v5036_v52  ;;  %v767_v55 = vfloor.f32 %v711_v57  ;;  %v1425_v17 = vpop.f32.mrf.mxu1 }
 0x43e   :  { %v5048_v56 = vsub.f32 %v139_v22, %v366_v34  ;;  %3579 = vrcp.f32 %v2224_v58  ;;  %v3275_v22 = vsel %vm477_vm12, 1.0, %v6393_v35  ;;  %v1507_v5 = vmul.f32 %v5046_v31, %v1425_v17 }
 0x43f   :  { %3433 = vmatmul.msk.bf16.gmra.mxu3 %vm1230_vm7, %v2473_v60  ;;  %v84_v49 = vadd.s32 384, %v3896_v25  ;;  %v85_v38 = vadd.s32 392, %v3896_v25  ;;  %3581 = vrcp.f32 %v2221_v16  ;;  %v1922_v4 = vsel %vm1230_vm7, %v5043_v37, -inf }
 0x440   :  { %6493 = vst [vmem:[#allocation71_spill] sm:$0xff] %v5048_v56  ;;  %1920 = vmax.xlane.f32.xlu0 %v1919_v32  ;;  %vm478_vm13 = vcmp.eq.f32.partialorder %v3952_v1, %v5048_v56  ;;  %v5058_v21 = vpop.eup %3575  ;;  %vm5071_vm14 = vcmp.eq.f32.partialorder %v4360_v42, %v766_v6  ;;  %v712_v58 = vadd.f32 0.035714287, %v656_v39  ;;  %v1543_v17 = vpack.c.bf16 %v1507_v5, %v1506_v11  ;;  %v1724_v11 = vpop.f32.mrf.mxu2 }
 0x441   :  { %v3276_v28 = vsel %vm478_vm13, 1.0, %v6393_v35  ;;  %v2237_v12 = vsel %vm1230_vm7, %v5058_v21, 0.0  ;;  %v5068_v34 = vpop.eup %3577  ;;  %v140_v16 = vcvt.s32.f32 %v84_v49  ;;  %vm823_vm15 = vcmp.eq.f32.partialorder %v4360_v42, %v767_v55 }
 0x442   :  { %v622_v57 = vpack.c.bf16 %v3276_v28, %v3275_v22  ;;  %2238 = vadd.xlane.f32.xlu1 %v2237_v12  ;;  %1923 = vmax.xlane.f32.xlu2 %v1922_v4  ;;  %v657_v31 = vmul.f32 0.071428575, %v4474_v43  ;;  %v141_v22 = vcvt.s32.f32 %v85_v38  ;;  %3583 = vpow2.f32 %v2113_v53 }
 0x443   :  { %v1912_v32 = vpop.xlane.xlu1 %1911  ;;  %3420 = vmatmul.msk.bf16.gmra.mxu2 %vm1202_vm1, %v1543_v17  ;;  %v199_v6 = vmul.f32 0.035714287, %v140_v16  ;;  %v2240_v12 = vsel %vm1230_vm7, %v5068_v34, 0.0  ;;  %v768_v43 = vfloor.f32 %v712_v58  ;;  %v5088_v55 = vsel %vm823_vm15, %v4974_v3, -1e+30 }
 0x444   :  { %v2040_v0 = vsub.f32 %v4836_v41, %v1912_v32  ;;  %3396 = vmatmul.msk.bf16.gmra.mxu1 %vm1230_vm7, %v622_v57  ;;  %v3580_v28 = vpop.eup %3579  ;;  %v200_v5 = vmul.f32 0.035714287, %v141_v22  ;;  %v5085_v41 = vsel %vm5071_vm14, %v4929_v13, -1e+30  ;;  %v713_v53 = vadd.f32 0.035714287, %v657_v31 }
 0x445   :  { %v5090_v49 = vadd.f32 0.017857144, %v199_v6  ;;  %v3582_v38 = vpop.eup %3581  ;;  %v2424_v57 = vmul.f32 %v3580_v28, %v4822_v44  ;;  %v6496_v32 = vfloor.f32 %v4798_v62  ;;  %v1928_v3 = vsel %vm1230_vm7, %v5088_v55, -inf }
 0x446   :  { %v2115_v39 = vmul.f32 1.442695, %v2040_v0  ;;  %v1428_v0 = vpop.f32.mrf.mxu1  ;;  %v5092_v4 = vadd.f32 0.017857144, %v200_v5  ;;  %v1925_v60 = vsel %vm1230_vm7, %v5085_v41, -inf  ;;  %vm5105_vm4 = vcmp.eq.f32.partialorder %v4360_v42, %v768_v43 }
 0x447   :  { %vm899_vm3 = vcmp.eq.f32.partialorder %v4152_v15, %v6496_v32  ;;  %v6347_v13 = vfloor.f32 %v5090_v49  ;;  %v2423_v62 = vmul.f32 %v3582_v38, %v4815_v63  ;;  %v6499_v17 = vfloor.f32 %v4800_v8 }
 0x448   :  { %2241 = vadd.xlane.f32.xlu0 %v2240_v12  ;;  %3585 = vpow2.f32 %v2115_v39  ;;  %v6345_v31 = vfloor.f32 %v5092_v4  ;;  %v5115_v28 = vpop.eup %3583  ;;  %v769_v12 = vfloor.f32 %v713_v53  ;;  %v5119_v5 = vsel %vm899_vm3, 1.0, %v6393_v35 }
 0x449   :  { %vm900_vm5 = vcmp.eq.f32.partialorder %v4152_v15, %v6499_v17  ;;  %v367_v6 = vmul.f32 28.0, %v6347_v13  ;;  %6500 = vst [vmem:[#allocation72_spill] sm:$0xff] %v5119_v5  ;;  %v2474_v32 = vpack.c.bf16 %v2424_v57, %v2423_v62  ;;  %v658_v63 = vmul.f32 0.071428575, %v4495_v61 }
 0x44a   :  { %1929 = vmax.xlane.f32.xlu1 %v1928_v3  ;;  %1926 = vmax.xlane.f32.xlu2 %v1925_v60  ;;  %v368_v43 = vmul.f32 28.0, %v6345_v31  ;;  %v5127_v3 = vsel %vm900_vm5, 1.0, %v6393_v35  ;;  %v2243_v61 = vsel %vm1230_vm7, %v5115_v28, 0.0  ;;  %vm825_vm8 = vcmp.eq.f32.partialorder %v4360_v42, %v769_v12 }
 0x44b   :  { %v1915_v44 = vpop.xlane.xlu1 %1914  ;;  %v5124_v8 = vsub.f32 %v140_v16, %v367_v6  ;;  %6502 = vst [vmem:[#allocation74_spill] sm:$0xff] %v5127_v3  ;;  %v1508_v16 = vmul.f32 %v5119_v5, %v1428_v0  ;;  %v659_v53 = vmul.f32 0.071428575, %v4497_v59  ;;  %v714_v58 = vadd.f32 0.035714287, %v658_v63  ;;  %v6504_v63 = vld [vmem:[#allocation45_spill] sm:$0xff] }
 0x44c   :  { %v2041_v39 = vsub.f32 %v4841_v26, %v1915_v44  ;;  %v5129_v60 = vsub.f32 %v141_v22, %v368_v43  ;;  %v5136_v26 = vsel %vm5105_vm4, %v5027_v46, -1e+30  ;;  %v1727_v22 = vpop.f32.mrf.mxu2  ;;  %v5155_v12 = vsel %vm825_vm8, %v1724_v11, -1e+30 }
 0x44d   :  { %6501 = vst [vmem:[#allocation73_spill] sm:$0xff] %v5124_v8  ;;  %vm479_vm6 = vcmp.eq.f32.partialorder %v3952_v1, %v5124_v8  ;;  %v1931_v62 = vsel %vm1230_vm7, %v5136_v26, -inf  ;;  %v715_v43 = vadd.f32 0.035714287, %v659_v53 }
 0x44e   :  { %v2117_v38 = vmul.f32 1.442695, %v2041_v39  ;;  %6503 = vst [vmem:[#allocation75_spill] sm:$0xff] %v5129_v60  ;;  %v5131_v17 = vpop.eup %3585  ;;  %v1430_v57 = vpop.f32.mrf.mxu1  ;;  %vm480_vm9 = vcmp.eq.f32.partialorder %v3952_v1, %v5129_v60  ;;  %v3277_v46 = vsel %vm479_vm6, 1.0, %v6393_v35 }
 0x44f   :  { %3434 = vmatmul.msk.bf16.gmra.mxu3 %vm1230_vm7, %v2474_v32  ;;  %v1509_v44 = vmul.f32 %v5127_v3, %v1430_v57  ;;  %v3278_v0 = vsel %vm480_vm9, 1.0, %v6393_v35  ;;  %v2246_v6 = vsel %vm1230_vm7, %v5131_v17, 0.0  ;;  %v770_v32 = vfloor.f32 %v714_v58 }
 0x450   :  { %2244 = vadd.xlane.f32.xlu0 %v2243_v61  ;;  %3587 = vpow2.f32 %v2117_v38  ;;  %v623_v39 = vpack.c.bf16 %v3278_v0, %v3277_v46  ;;  %v660_v38 = vmul.f32 0.071428575, %v6504_v63  ;;  %v1934_v57 = vsel %vm1230_vm7, %v5155_v12, -inf }
 0x451   :  { %v1544_v59 = vpack.c.bf16 %v1509_v44, %v1508_v16  ;;  %v771_v46 = vfloor.f32 %v715_v43  ;;  %vm826_vm10 = vcmp.eq.f32.partialorder %v4360_v42, %v770_v32  ;;  %v86_v43 = vadd.s32 400, %v3896_v25 }
 0x452   :  { %1932 = vmax.xlane.f32.xlu1 %v1931_v62  ;;  %2247 = vadd.xlane.f32.xlu2 %v2246_v6  ;;  %v716_v53 = vadd.f32 0.035714287, %v660_v38  ;;  %v5167_v58 = vsel %vm826_vm10, %v1727_v22, -1e+30  ;;  %v87_v32 = vadd.s32 408, %v3896_v25 }
 0x453   :  { %3421 = vmatmul.msk.bf16.gmra.mxu2 %vm1202_vm1, %v1544_v59  ;;  %vm827_vm11 = vcmp.eq.f32.partialorder %v4360_v42, %v771_v46  ;;  %v1937_v0 = vsel %vm1230_vm7, %v5167_v58, -inf  ;;  %v142_v63 = vcvt.s32.f32 %v86_v43 }
 0x454   :  { %3397 = vmatmul.msk.bf16.gmra.mxu1 %vm1230_vm7, %v623_v39  ;;  %v1729_v16 = vpop.f32.mrf.mxu2  ;;  %v772_v44 = vfloor.f32 %v716_v53  ;;  %v143_v38 = vcvt.s32.f32 %v87_v32 }
 0x455   :  { %v5172_v62 = vsel %vm827_vm11, %v1729_v16, -1e+30 }
 0x456   :  { %v5160_v61 = vpop.eup %3587  ;;  %v1940_v6 = vsel %vm1230_vm7, %v5172_v62, -inf  ;;  %vm828_vm2 = vcmp.eq.f32.partialorder %v4360_v42, %v772_v44  ;;  %v202_v46 = vmul.f32 0.035714287, %v143_v38 }
 0x457   :  { %v2249_v11 = vsel %vm1230_vm7, %v5160_v61, 0.0 }
 0x458   :  { %1935 = vmax.xlane.f32.xlu0 %v1934_v57  ;;  %v201_v57 = vmul.f32 0.035714287, %v142_v63  ;;  %v5187_v53 = vadd.f32 0.017857144, %v202_v46 }
 0x45a   :  { %2250 = vadd.xlane.f32.xlu2 %v2249_v11  ;;  %v5185_v11 = vadd.f32 0.017857144, %v201_v57 }
 0x45c   :  { %v1732_v39 = vpop.f32.mrf.mxu2  ;;  %v6346_v44 = vfloor.f32 %v5185_v11 }
 0x45d   :  { %v5177_v59 = vsel %vm828_vm2, %v1732_v39, -1e+30 }
 0x45e   :  { %v1943_v22 = vsel %vm1230_vm7, %v5177_v59, -inf }
 0x460   :  { %1938 = vmax.xlane.f32.xlu0 %v1937_v0  ;;  %v6348_v0 = vfloor.f32 %v5187_v53 }
 0x462   :  { %1941 = vmax.xlane.f32.xlu2 %v1940_v6  ;;  %v369_v6 = vmul.f32 28.0, %v6346_v44  ;;  %v370_v39 = vmul.f32 28.0, %v6348_v0 }
 0x464   :  { %v5183_v16 = vpop.f32.mrf.mxu2  ;;  %v5197_v43 = vsub.f32 %v143_v38, %v370_v39  ;;  %v89_v38 = vadd.s32 424, %v3896_v25 }
 0x466   :  { %6506 = vst [vmem:[#allocation76_spill] sm:$0xff] %v5197_v43  ;;  %vm482_vm13 = vcmp.eq.f32.partialorder %v3952_v1, %v5197_v43  ;;  %v145_v0 = vcvt.s32.f32 %v89_v38 }
 0x467   :  { %v3280_v46 = vsel %vm482_vm13, 1.0, %v6393_v35 }
 0x46a   :  { %1944 = vmax.xlane.f32.xlu2 %v1943_v22  ;;  %v5195_v22 = vsub.f32 %v142_v63, %v369_v6  ;;  %v88_v63 = vadd.s32 416, %v3896_v25  ;;  %v6507_v6 = vfloor.f32 %v4883_v27 }
 0x46c   :  { %6505 = vst [vmem:[#allocation45_spill] sm:$0xff] %v5195_v22  ;;  %vm481_vm12 = vcmp.eq.f32.partialorder %v3952_v1, %v5195_v22  ;;  %vm901_vm14 = vcmp.eq.f32.partialorder %v4152_v15, %v6507_v6  ;;  %v144_v39 = vcvt.s32.f32 %v88_v63  ;;  %v6509_v22 = vfloor.f32 %v4885_v19 }
 0x46d   :  { %v3279_v57 = vsel %vm481_vm12, 1.0, %v6393_v35  ;;  %v5214_v3 = vsel %vm901_vm14, 1.0, %v6393_v35 }
 0x46e   :  { %v624_v13 = vpack.c.bf16 %v3280_v46, %v3279_v57  ;;  %6508 = vst [vmem:[#allocation77_spill] sm:$0xff] %v5214_v3  ;;  %v203_v43 = vmul.f32 0.035714287, %v144_v39  ;;  %v204_v57 = vmul.f32 0.035714287, %v145_v0  ;;  %vm902_vm15 = vcmp.eq.f32.partialorder %v4152_v15, %v6509_v22 }
 0x46f   :  { %v5225_v63 = vsel %vm902_vm15, 1.0, %v6393_v35 }
 0x470   :  { %3398 = vmatmul.msk.bf16.gmra.mxu1 %vm1230_vm7, %v624_v13  ;;  %v5220_v27 = vadd.f32 0.017857144, %v203_v43  ;;  %6510 = vst [vmem:[#allocation78_spill] sm:$0xff] %v5225_v63 }
 0x489   :  { %v5205_v44 = vpop.f32.mrf.mxu2 }
 0x491   :  { %v5232_v43 = vpop.f32.mrf.mxu2 }
 0x496   :  { %v1433_v32 = vpop.f32.mrf.mxu1 }
 0x497   :  { %v1510_v46 = vmul.f32 %v5214_v3, %v1433_v32  ;;  %v6361_v32 = vfloor.f32 %v5220_v27 }
 0x49e   :  { %v1435_v38 = vpop.f32.mrf.mxu1 }
 0x4a3   :  { %v2227_v31 = vpop.xlane.xlu0 %2226 }
 0x4a4   :  { %3589 = vrcp.f32 %v2227_v31  ;;  %v5222_v31 = vadd.f32 0.017857144, %v204_v57 }
 0x4a5   :  { %v2230_v5 = vpop.xlane.xlu2 %2229 }
 0x4a6   :  { %3591 = vrcp.f32 %v2230_v5  ;;  %v1511_v5 = vmul.f32 %v5225_v63, %v1435_v38  ;;  %v6360_v19 = vfloor.f32 %v5222_v31  ;;  %v371_v38 = vmul.f32 28.0, %v6361_v32 }
 0x4a8   :  { %v1545_v57 = vpack.c.bf16 %v1511_v5, %v1510_v46  ;;  %v5240_v63 = vsub.f32 %v144_v39, %v371_v38  ;;  %v91_v5 = vadd.s32 440, %v3896_v25 }
 0x4aa   :  { %v3590_v13 = vpop.eup %3589  ;;  %3422 = vmatmul.msk.bf16.gmra.mxu2 %vm1202_vm1, %v1545_v57  ;;  %6511 = vst [vmem:[#allocation79_spill] sm:$0xff] %v5240_v63  ;;  %vm483_vm4 = vcmp.eq.f32.partialorder %v3952_v1, %v5240_v63 }
 0x4ab   :  { %v1918_v6 = vpop.xlane.xlu0 %1917  ;;  %v2425_v22 = vmul.f32 %v3590_v13, %v4948_v24 }
 0x4ac   :  { %v2042_v60 = vsub.f32 %v4981_v7, %v1918_v6  ;;  %v3592_v3 = vpop.eup %3591  ;;  %v372_v7 = vmul.f32 28.0, %v6360_v19 }
 0x4ad   :  { %v2233_v56 = vpop.xlane.xlu2 %2232  ;;  %v2236_v52 = vpop.xlane.xlu1 %2235  ;;  %v2426_v40 = vmul.f32 %v3592_v3, %v4965_v2  ;;  %v6514_v2 = vfloor.f32 %v4927_v23  ;;  %v3281_v23 = vsel %vm483_vm4, 1.0, %v6393_v35  ;;  %v6518_v3 = vfloor.f32 %v4934_v14 }
 0x4ae   :  { %v2119_v8 = vmul.f32 1.442695, %v2042_v60  ;;  %v5242_v24 = vsub.f32 %v145_v0, %v372_v7  ;;  %v6513_v60 = vld [vmem:[#allocation46_spill] sm:$0xff] }
 0x4af   :  { %v2475_v6 = vpack.c.bf16 %v2426_v40, %v2425_v22  ;;  %v661_v46 = vmul.f32 0.071428575, %v6513_v60  ;;  %vm5249_vm3 = vcmp.eq.f32.partialorder %v4152_v15, %v6514_v2  ;;  %v1438_v13 = vpop.f32.mrf.mxu1  ;;  %v90_v40 = vadd.s32 432, %v3896_v25 }
 0x4b0   :  { %3593 = vpow2.f32 %v2119_v8  ;;  %6512 = vst [vmem:[#allocation80_spill] sm:$0xff] %v5242_v24  ;;  %vm484_vm5 = vcmp.eq.f32.partialorder %v3952_v1, %v5242_v24  ;;  %v5269_v60 = vsel %vm5249_vm3, 1.0, %v6393_v35  ;;  %vm904_vm6 = vcmp.eq.f32.partialorder %v4152_v15, %v6518_v3 }
 0x4b1   :  { %3595 = vrcp.f32 %v2233_v56  ;;  %3435 = vmatmul.msk.bf16.gmra.mxu3 %vm1230_vm7, %v2475_v6  ;;  %v3282_v0 = vsel %vm484_vm5, 1.0, %v6393_v35  ;;  %v146_v22 = vcvt.s32.f32 %v90_v40  ;;  %v717_v6 = vadd.f32 0.035714287, %v661_v46  ;;  %6517 = vst [vmem:[#allocation46_spill] sm:$0xff] %v5269_v60 }
 0x4b2   :  { %3597 = vrcp.f32 %v2236_v52  ;;  %v625_v39 = vpack.c.bf16 %v3282_v0, %v3281_v23  ;;  %v147_v40 = vcvt.s32.f32 %v91_v5  ;;  %v1512_v23 = vmul.f32 %v5269_v60, %v1438_v13 }
 0x4b3   :  { %v1921_v8 = vpop.xlane.xlu0 %1920  ;;  %v662_v0 = vmul.f32 0.071428575, %v4611_v36  ;;  %v663_v24 = vmul.f32 0.071428575, %v4616_v30 }
 0x4b4   :  { %v2043_v56 = vsub.f32 %v4996_v9, %v1921_v8  ;;  %3399 = vmatmul.msk.bf16.gmra.mxu1 %vm1230_vm7, %v625_v39  ;;  %v5275_v8 = vpop.f32.mrf.mxu2  ;;  %v5283_v39 = vsel %vm904_vm6, 1.0, %v6393_v35 }
 0x4b5   :  { %v1924_v38 = vpop.xlane.xlu2 %1923  ;;  %v5264_v7 = vpop.xlane.xlu1 %2238  ;;  %v718_v60 = vadd.f32 0.035714287, %v662_v0 }
 0x4b6   :  { %v5262_v52 = vpop.eup %3593  ;;  %v2121_v57 = vmul.f32 1.442695, %v2043_v56  ;;  %v2044_v9 = vsub.f32 %v5043_v37, %v1924_v38  ;;  %v205_v37 = vmul.f32 0.035714287, %v146_v22  ;;  %v773_v38 = vfloor.f32 %v717_v6 }
 0x4b7   :  { %v2252_v2 = vsel %vm1230_vm7, %v5262_v52, 0.0  ;;  %v3596_v25 = vpop.eup %3595 }
 0x4b8   :  { %3599 = vpow2.f32 %v2121_v57  ;;  %2253 = vadd.xlane.f32.xlu1 %v2252_v2  ;;  %v3598_v56 = vpop.eup %3597  ;;  %v2123_v46 = vmul.f32 1.442695, %v2044_v9  ;;  %v1440_v57 = vpop.f32.mrf.mxu1  ;;  %v206_v2 = vmul.f32 0.035714287, %v147_v40  ;;  %v5286_v9 = vadd.f32 0.017857144, %v205_v37 }
 0x4b9   :  { %v1513_v5 = vmul.f32 %v5283_v39, %v1440_v57  ;;  %v2427_v13 = vmul.f32 %v3596_v25, %v4985_v51  ;;  %v2428_v14 = vmul.f32 %v3598_v56, %v5001_v48  ;;  %vm5297_vm8 = vcmp.eq.f32.partialorder %v4360_v42, %v773_v38 }
 0x4ba   :  { %3601 = vpow2.f32 %v2123_v46  ;;  %v5290_v3 = vadd.f32 0.017857144, %v206_v2  ;;  %v6366_v36 = vfloor.f32 %v5286_v9 }
 0x4bb   :  { %v2242_v19 = vpop.xlane.xlu0 %2241  ;;  %v1546_v32 = vpack.c.bf16 %v1513_v5, %v1512_v23  ;;  %v2476_v23 = vpack.c.bf16 %v2428_v14, %v2427_v13  ;;  %v774_v14 = vfloor.f32 %v718_v60 }
 0x4bc   :  { %v6365_v51 = vfloor.f32 %v5290_v3  ;;  %v373_v30 = vmul.f32 28.0, %v6366_v36  ;;  %3603 = vrcp.f32 %v2242_v19  ;;  %v6521_v19 = vfloor.f32 %v4992_v33 }
 0x4bd   :  { %v1927_v46 = vpop.xlane.xlu2 %1926  ;;  %v1930_v63 = vpop.xlane.xlu1 %1929  ;;  %3423 = vmatmul.msk.bf16.gmra.mxu2 %vm1202_vm1, %v1546_v32  ;;  %vm830_vm12 = vcmp.eq.f32.partialorder %v4360_v42, %v774_v14 }
 0x4be   :  { %v5293_v6 = vpop.eup %3599  ;;  %v2045_v48 = vsub.f32 %v5085_v41, %v1927_v46  ;;  %v2046_v25 = vsub.f32 %v5088_v55, %v1930_v63  ;;  %v374_v0 = vmul.f32 28.0, %v6365_v51  ;;  %v5313_v41 = vsub.f32 %v146_v22, %v373_v30  ;;  %v5323_v32 = vpop.f32.mrf.mxu2 }
 0x4bf   :  { %v2255_v56 = vsel %vm1230_vm7, %v5293_v6, 0.0  ;;  %v5321_v63 = vsel %vm5297_vm8, %v5183_v16, -1e+30  ;;  %v719_v46 = vadd.f32 0.035714287, %v663_v24  ;;  %vm905_vm9 = vcmp.eq.f32.partialorder %v4152_v15, %v6521_v19 }
 0x4c0   :  { %2256 = vadd.xlane.f32.xlu1 %v2255_v56  ;;  %v5311_v38 = vpop.eup %3601  ;;  %v2125_v57 = vmul.f32 1.442695, %v2045_v48  ;;  %v2127_v2 = vmul.f32 1.442695, %v2046_v25  ;;  %v5325_v13 = vsub.f32 %v147_v40, %v374_v0  ;;  %vm485_vm10 = vcmp.eq.f32.partialorder %v3952_v1, %v5313_v41  ;;  %v6523_v0 = vld [vmem:[#allocation51_spill] sm:$0xff] }
 0x4c1   :  { %3436 = vmatmul.msk.bf16.gmra.mxu3 %vm1230_vm7, %v2476_v23  ;;  %v2258_v55 = vsel %vm1230_vm7, %v5311_v38, 0.0  ;;  %v1443_v5 = vpop.f32.mrf.mxu1  ;;  %v3283_v16 = vsel %vm485_vm10, 1.0, %v6393_v35  ;;  %v1946_v40 = vsel %vm1230_vm7, %v5321_v63, -inf  ;;  %v5341_v33 = vsel %vm905_vm9, 1.0, %v6393_v35 }
 0x4c2   :  { %3605 = vpow2.f32 %v2125_v57  ;;  %2259 = vadd.xlane.f32.xlu0 %v2258_v55  ;;  %vm486_vm11 = vcmp.eq.f32.partialorder %v3952_v1, %v5325_v13  ;;  %v6522_v48 = vfloor.f32 %v4999_v10  ;;  %v775_v25 = vfloor.f32 %v719_v46  ;;  %v3604_v30 = vpop.eup %3603 }
 0x4c3   :  { %v5327_v22 = vpop.xlane.xlu0 %2244  ;;  %3607 = vpow2.f32 %v2127_v2  ;;  %v3284_v37 = vsel %vm486_vm11, 1.0, %v6393_v35  ;;  %v664_v23 = vmul.f32 0.071428575, %v4658_v54  ;;  %v665_v57 = vmul.f32 0.071428575, %v6523_v0 }
 0x4c4   :  { %3609 = vrcp.f32 %v5264_v7  ;;  %vm906_vm2 = vcmp.eq.f32.partialorder %v4152_v15, %v6522_v48  ;;  %v626_v56 = vpack.c.bf16 %v3284_v37, %v3283_v16  ;;  %v1514_v19 = vmul.f32 %v5341_v33, %v1443_v5 }
 0x4c5   :  { %v2248_v24 = vpop.xlane.xlu2 %2247  ;;  %v1933_v60 = vpop.xlane.xlu1 %1932  ;;  %v5352_v2 = vsel %vm906_vm2, 1.0, %v6393_v35  ;;  %vm5366_vm13 = vcmp.eq.f32.partialorder %v4360_v42, %v775_v25  ;;  %v721_v48 = vadd.f32 0.035714287, %v665_v57  ;;  %v2430_v25 = vmul.f32 %v3604_v30, %v5068_v34 }
 0x4c6   :  { %v2047_v7 = vsub.f32 %v5136_v26, %v1933_v60  ;;  %3400 = vmatmul.msk.bf16.gmra.mxu1 %vm1230_vm7, %v626_v56  ;;  %v5361_v26 = vsel %vm830_vm12, %v5205_v44, -1e+30  ;;  %v720_v44 = vadd.f32 0.035714287, %v664_v23  ;;  %v5374_v56 = vpop.f32.mrf.mxu2 }
 0x4c7   :  { %v1949_v23 = vsel %vm1230_vm7, %v5361_v26, -inf  ;;  %v777_v57 = vfloor.f32 %v721_v48 }
 0x4c8   :  { %1947 = vmax.xlane.f32.xlu1 %v1946_v40  ;;  %v5354_v55 = vpop.eup %3605  ;;  %v2129_v10 = vmul.f32 1.442695, %v2047_v7 }
 0x4c9   :  { %v5358_v14 = vpop.eup %3607  ;;  %v2261_v54 = vsel %vm1230_vm7, %v5354_v55, 0.0  ;;  %v1445_v46 = vpop.f32.mrf.mxu1  ;;  %vm833_vm3 = vcmp.eq.f32.partialorder %v4360_v42, %v777_v57 }
 0x4ca   :  { %v3610_v16 = vpop.eup %3609  ;;  %3611 = vpow2.f32 %v2129_v10  ;;  %2262 = vadd.xlane.f32.xlu0 %v2261_v54  ;;  %v2264_v5 = vsel %vm1230_vm7, %v5358_v14, 0.0  ;;  %v1515_v37 = vmul.f32 %v5352_v2, %v1445_v46  ;;  %v5383_v54 = vsel %vm5366_vm13, %v5232_v43, -1e+30 }
 0x4cb   :  { %v1936_v40 = vpop.xlane.xlu0 %1935  ;;  %2265 = vadd.xlane.f32.xlu2 %v2264_v5  ;;  %v2429_v10 = vmul.f32 %v3610_v16, %v5058_v21  ;;  %v1952_v21 = vsel %vm1230_vm7, %v5383_v54, -inf }
 0x4cc   :  { %v2048_v7 = vsub.f32 %v5155_v12, %v1936_v40  ;;  %v1547_v0 = vpack.c.bf16 %v1515_v37, %v1514_v19  ;;  %v776_v12 = vfloor.f32 %v720_v44  ;;  %v666_v19 = vmul.f32 0.071428575, %v4697_v45 }
 0x4cd   :  { %v5377_v36 = vpop.xlane.xlu2 %2250  ;;  %v2477_v34 = vpack.c.bf16 %v2430_v25, %v2429_v10  ;;  %v667_v40 = vmul.f32 0.071428575, %v4699_v47 }
 0x4ce   :  { %v2131_v51 = vmul.f32 1.442695, %v2048_v7  ;;  %3424 = vmatmul.msk.bf16.gmra.mxu2 %vm1202_vm1, %v1547_v0  ;;  %vm832_vm15 = vcmp.eq.f32.partialorder %v4360_v42, %v776_v12  ;;  %v722_v60 = vadd.f32 0.035714287, %v666_v19  ;;  %v1749_v44 = vpop.f32.mrf.mxu2 }
 0x4d0   :  { %3613 = vpow2.f32 %v2131_v51  ;;  %1950 = vmax.xlane.f32.xlu1 %v1949_v23  ;;  %v5388_v30 = vpop.eup %3611  ;;  %v6526_v51 = vfloor.f32 %v5090_v49  ;;  %v778_v0 = vfloor.f32 %v722_v60  ;;  %v723_v23 = vadd.f32 0.035714287, %v667_v40 }
 0x4d1   :  { %3437 = vmatmul.msk.bf16.gmra.mxu3 %vm1230_vm7, %v2477_v34  ;;  %v2267_v43 = vsel %vm1230_vm7, %v5388_v30, 0.0  ;;  %v1448_v46 = vpop.f32.mrf.mxu1  ;;  %3615 = vrcp.f32 %v2248_v24  ;;  %v6527_v24 = vfloor.f32 %v5092_v4  ;;  %v5419_v4 = vsel %vm833_vm3, %v5323_v32, -1e+30 }
 0x4d2   :  { %1953 = vmax.xlane.f32.xlu0 %v1952_v21  ;;  %vm907_vm14 = vcmp.eq.f32.partialorder %v4152_v15, %v6526_v51  ;;  %3617 = vrcp.f32 %v5327_v22  ;;  %v1958_v32 = vsel %vm1230_vm7, %v5419_v4, -inf  ;;  %v668_v34 = vmul.f32 0.071428575, %v4757_v18 }
 0x4d3   :  { %v1939_v16 = vpop.xlane.xlu0 %1938  ;;  %2268 = vadd.xlane.f32.xlu2 %v2267_v43  ;;  %vm908_vm4 = vcmp.eq.f32.partialorder %v4152_v15, %v6527_v24  ;;  %v5410_v48 = vsel %vm907_vm14, 1.0, %v6393_v35  ;;  %vm834_vm5 = vcmp.eq.f32.partialorder %v4360_v42, %v778_v0  ;;  %v779_v43 = vfloor.f32 %v723_v23 }
 0x4d4   :  { %v2049_v45 = vsub.f32 %v5167_v58, %v1939_v16  ;;  %6528 = vst [vmem:[#allocation51_spill] sm:$0xff] %v5410_v48  ;;  %v5413_v58 = vsel %vm832_vm15, %v5275_v8, -1e+30  ;;  %v5422_v7 = vsel %vm908_vm4, 1.0, %v6393_v35  ;;  %v1516_v8 = vmul.f32 %v5410_v48, %v1448_v46 }
 0x4d5   :  { %v1942_v37 = vpop.xlane.xlu2 %1941  ;;  %6529 = vst [vmem:[#allocation81_spill] sm:$0xff] %v5422_v7  ;;  %v669_v40 = vmul.f32 0.071428575, %v4759_v50  ;;  %vm835_vm6 = vcmp.eq.f32.partialorder %v4360_v42, %v779_v43 }
 0x4d6   :  { %v5407_v5 = vpop.eup %3613  ;;  %v2133_v49 = vmul.f32 1.442695, %v2049_v45  ;;  %v2050_v22 = vsub.f32 %v5172_v62, %v1942_v37  ;;  %v1955_v62 = vsel %vm1230_vm7, %v5413_v58, -inf  ;;  %v1752_v60 = vpop.f32.mrf.mxu2 }
 0x4d7   :  { %v2270_v47 = vsel %vm1230_vm7, %v5407_v5, 0.0  ;;  %v3616_v25 = vpop.eup %3615 }
 0x4d8   :  { %3619 = vpow2.f32 %v2133_v49  ;;  %2271 = vadd.xlane.f32.xlu1 %v2270_v47  ;;  %v2135_v10 = vmul.f32 1.442695, %v2050_v22  ;;  %v3618_v57 = vpop.eup %3617  ;;  %v2432_v21 = vmul.f32 %v3616_v25, %v5131_v17  ;;  %v724_v49 = vadd.f32 0.035714287, %v668_v34 }
 0x4d9   :  { %v1450_v12 = vpop.f32.mrf.mxu1  ;;  %v2431_v45 = vmul.f32 %v3618_v57, %v5115_v28  ;;  %v5442_v17 = vsel %vm834_vm5, %v5374_v56, -1e+30  ;;  %v5452_v25 = vsel %vm835_vm6, %v1749_v44, -1e+30 }
 0x4da   :  { %3621 = vpow2.f32 %v2135_v10  ;;  %1956 = vmax.xlane.f32.xlu0 %v1955_v62  ;;  %v1517_v19 = vmul.f32 %v5422_v7, %v1450_v12  ;;  %v1961_v47 = vsel %vm1230_vm7, %v5442_v17, -inf  ;;  %v780_v56 = vfloor.f32 %v724_v49  ;;  %v5460_v12 = vpop.f32.mrf.mxu3 }
 0x4db   :  { %1959 = vmax.xlane.f32.xlu2 %v1958_v32  ;;  %v2478_v37 = vpack.c.bf16 %v2432_v21, %v2431_v45  ;;  %v670_v10 = vmul.f32 0.071428575, %v4818_v20  ;;  %v1964_v23 = vsel %vm1230_vm7, %v5452_v25, -inf }
 0x4dc   :  { %v1548_v46 = vpack.c.bf16 %v1517_v19, %v1516_v8  ;;  %vm836_vm8 = vcmp.eq.f32.partialorder %v4360_v42, %v780_v56 }
 0x4dd   :  { %v1945_v51 = vpop.xlane.xlu2 %1944  ;;  %v5462_v57 = vsel %vm836_vm8, %v1752_v60, -1e+30  ;;  %v726_v32 = vadd.f32 0.035714287, %v670_v10 }
 0x4de   :  { %v5433_v16 = vpop.eup %3619  ;;  %v2051_v24 = vsub.f32 %v5177_v59, %v1945_v51  ;;  %3425 = vmatmul.msk.bf16.gmra.mxu2 %vm1202_vm1, %v1548_v46  ;;  %v725_v59 = vadd.f32 0.035714287, %v669_v40  ;;  %v1754_v8 = vpop.f32.mrf.mxu2  ;;  %v1967_v34 = vsel %vm1230_vm7, %v5462_v57, -inf }
 0x4df   :  { %v2273_v18 = vsel %vm1230_vm7, %v5433_v16, 0.0  ;;  %v782_v19 = vfloor.f32 %v726_v32 }
 0x4e0   :  { %2274 = vadd.xlane.f32.xlu1 %v2273_v18  ;;  %v5444_v22 = vpop.eup %3621  ;;  %v2137_v28 = vmul.f32 1.442695, %v2051_v24  ;;  %v781_v0 = vfloor.f32 %v725_v59 }
 0x4e1   :  { %3438 = vmatmul.msk.bf16.gmra.mxu3 %vm1230_vm7, %v2478_v37  ;;  %v2276_v50 = vsel %vm1230_vm7, %v5444_v22, 0.0  ;;  %vm838_vm10 = vcmp.eq.f32.partialorder %v4360_v42, %v782_v19 }
 0x4e2   :  { %3623 = vpow2.f32 %v2137_v28  ;;  %2277 = vadd.xlane.f32.xlu0 %v2276_v50  ;;  %vm837_vm9 = vcmp.eq.f32.partialorder %v4360_v42, %v781_v0  ;;  %v5474_v46 = vpop.f32.mrf.mxu3  ;;  %v6530_v28 = vfloor.f32 %v5185_v11 }
 0x4e3   :  { %1962 = vmax.xlane.f32.xlu2 %v1961_v47  ;;  %v5467_v20 = vsel %vm837_vm9, %v1754_v8, -1e+30  ;;  %v6532_v47 = vfloor.f32 %v5187_v53  ;;  %3625 = vrcp.f32 %v5377_v36 }
 0x4e4   :  { %v1970_v21 = vsel %vm1230_vm7, %v5467_v20, -inf  ;;  %vm909_vm11 = vcmp.eq.f32.partialorder %v4152_v15, %v6530_v28 }
 0x4e5   :  { %v5494_v50 = vsel %vm909_vm11, 1.0, %v6393_v35  ;;  %vm910_vm2 = vcmp.eq.f32.partialorder %v4152_v15, %v6532_v47 }
 0x4e6   :  { %v1757_v43 = vpop.f32.mrf.mxu2  ;;  %6531 = vst [vmem:[#allocation82_spill] sm:$0xff] %v5494_v50  ;;  %v5502_v56 = vsel %vm910_vm2, 1.0, %v6393_v35 }
 0x4e7   :  { %v5476_v51 = vsel %vm838_vm10, %v1757_v43, -1e+30  ;;  %6533 = vst [vmem:[#allocation83_spill] sm:$0xff] %v5502_v56 }
 0x4e8   :  { %1965 = vmax.xlane.f32.xlu1 %v1964_v23  ;;  %v5458_v62 = vpop.eup %3623  ;;  %v1973_v45 = vsel %vm1230_vm7, %v5476_v51, -inf }
 0x4e9   :  { %v2279_v44 = vsel %vm1230_vm7, %v5458_v62, 0.0 }
 0x4ea   :  { %2280 = vadd.xlane.f32.xlu0 %v2279_v44  ;;  %v5480_v60 = vpop.f32.mrf.mxu3  ;;  %v3626_v44 = vpop.eup %3625 }
 0x4ed   :  { %v1453_v49 = vpop.f32.mrf.mxu1 }
 0x4ee   :  { %v1518_v59 = vmul.f32 %v5494_v50, %v1453_v49  ;;  %v5510_v19 = vpop.f32.mrf.mxu2  ;;  %v6534_v49 = vfloor.f32 %v5220_v27 }
 0x4f0   :  { %1968 = vmax.xlane.f32.xlu1 %v1967_v34  ;;  %v2433_v34 = vmul.f32 %v3626_v44, %v5160_v61  ;;  %vm911_vm12 = vcmp.eq.f32.partialorder %v4152_v15, %v6534_v49  ;;  %v6536_v61 = vfloor.f32 %v5222_v31 }
 0x4f2   :  { %1971 = vmax.xlane.f32.xlu0 %v1970_v21  ;;  %v5482_v40 = vpop.f32.mrf.mxu3  ;;  %vm912_vm13 = vcmp.eq.f32.partialorder %v4152_v15, %v6536_v61 }
 0x4f5   :  { %v1455_v0 = vpop.f32.mrf.mxu1 }
 0x4f6   :  { %v1519_v11 = vmul.f32 %v5502_v56, %v1455_v0 }
 0x4f8   :  { %v1549_v8 = vpack.c.bf16 %v1519_v11, %v1518_v59  ;;  %v5519_v59 = vsel %vm911_vm12, 1.0, %v6393_v35 }
 0x4f9   :  { %6535 = vst [vmem:[#allocation84_spill] sm:$0xff] %v5519_v59 }
 0x4fa   :  { %1974 = vmax.xlane.f32.xlu0 %v1973_v45  ;;  %v5484_v24 = vpop.f32.mrf.mxu3  ;;  %3426 = vmatmul.msk.bf16.gmra.mxu2 %vm1202_vm1, %v1549_v8 }
 0x502   :  { %v5486_v18 = vpop.f32.mrf.mxu3 }
 0x50a   :  { %v5488_v37 = vpop.f32.mrf.mxu3 }
 0x512   :  { %v5505_v23 = vpop.f32.mrf.mxu3 }
 0x52b   :  { %v2254_v10 = vpop.xlane.xlu1 %2253 }
 0x52c   :  { %3627 = vrcp.f32 %v2254_v10 }
 0x52d   :  { %v5529_v8 = vpop.f32.mrf.mxu2 }
 0x531   :  { %v1458_v21 = vpop.f32.mrf.mxu1 }
 0x532   :  { %v3628_v32 = vpop.eup %3627  ;;  %v1520_v27 = vmul.f32 %v5519_v59, %v1458_v21  ;;  %v6538_v21 = vld [vmem:[#allocation58_spill] sm:$0xff] }
 0x533   :  { %v2257_v53 = vpop.xlane.xlu1 %2256  ;;  %v2434_v36 = vmul.f32 %v3628_v32, %v5262_v52  ;;  %v5525_v52 = vsel %vm912_vm13, 1.0, %v6393_v35 }
 0x534   :  { %v5512_v43 = vpop.f32.mrf.mxu3  ;;  %6537 = vst [vmem:[#allocation85_spill] sm:$0xff] %v5525_v52 }
 0x535   :  { %v2479_v45 = vpack.c.bf16 %v2434_v36, %v2433_v34  ;;  %v2260_v28 = vpop.xlane.xlu0 %2259 }
 0x536   :  { %3629 = vrcp.f32 %v2260_v28  ;;  %v671_v28 = vmul.f32 0.071428575, %v6538_v21 }
 0x537   :  { %3439 = vmatmul.msk.bf16.gmra.mxu3 %vm1230_vm7, %v2479_v45  ;;  %3631 = vrcp.f32 %v2257_v53 }
 0x539   :  { %v1460_v10 = vpop.f32.mrf.mxu1 }
 0x53a   :  { %v1521_v44 = vmul.f32 %v5525_v52, %v1460_v10 }
 0x53b   :  { %v1948_v47 = vpop.xlane.xlu1 %1947 }
 0x53c   :  { %v2052_v0 = vsub.f32 %v5321_v63, %v1948_v47  ;;  %v2630_v11 = vpop.f32.mrf.mxu3  ;;  %v3630_v32 = vpop.eup %3629  ;;  %v1550_v45 = vpack.c.bf16 %v1521_v44, %v1520_v27  ;;  %v727_v44 = vadd.f32 0.035714287, %v671_v28 }
 0x53d   :  { %v2263_v31 = vpop.xlane.xlu0 %2262  ;;  %v3632_v53 = vpop.eup %3631  ;;  %v2436_v49 = vmul.f32 %v3630_v32, %v5311_v38 }
 0x53e   :  { %v2139_v34 = vmul.f32 1.442695, %v2052_v0  ;;  %v2266_v36 = vpop.xlane.xlu2 %2265  ;;  %3427 = vmatmul.msk.bf16.gmra.mxu2 %vm1202_vm1, %v1550_v45  ;;  %v2435_v61 = vmul.f32 %v3632_v53, %v5293_v6  ;;  %v6539_v45 = vfloor.f32 %v5286_v9  ;;  %v6540_v53 = vld [vmem:[#allocation15_spill] sm:$0xff]  ;;  %v783_v21 = vfloor.f32 %v727_v44 }
 0x540   :  { %3633 = vpow2.f32 %v2139_v34  ;;  %v2480_v10 = vpack.c.bf16 %v2436_v49, %v2435_v61  ;;  %vm913_vm14 = vcmp.eq.f32.partialorder %v4152_v15, %v6539_v45  ;;  %v6542_v49 = vfloor.f32 %v5290_v3  ;;  %v6545_v45 = vld [vmem:[#allocation34_spill] sm:$0xff] }
 0x541   :  { %3635 = vrcp.f32 %v2263_v31  ;;  %vm5567_vm3 = vcmp.eq.f32.partialorder %v4360_v42, %v783_v21 }
 0x542   :  { %3637 = vrcp.f32 %v2266_v36  ;;  %v630_v36 = vmul.f32 0.071428575, %v6540_v53  ;;  %vm914_vm15 = vcmp.eq.f32.partialorder %v4152_v15, %v6542_v49  ;;  %v6546_v15 = vld [vmem:[#allocation16_spill] sm:$0xff] }
 0x543   :  { %v1951_v63 = vpop.xlane.xlu1 %1950  ;;  %v1463_v34 = vpop.f32.mrf.mxu1  ;;  %v5558_v9 = vsel %vm914_vm15, 1.0, %v6393_v35 }
 0x544   :  { %v2053_v47 = vsub.f32 %v5361_v26, %v1951_v63  ;;  %v2633_v48 = vpop.f32.mrf.mxu3  ;;  %v5545_v26 = vpop.f32.mrf.mxu2  ;;  %6543 = vst [vmem:[#allocation15_spill] sm:$0xff] %v5558_v9 }
 0x545   :  { %v1954_v27 = vpop.xlane.xlu0 %1953 }
 0x546   :  { %v5537_v7 = vpop.eup %3633  ;;  %v2141_v0 = vmul.f32 1.442695, %v2053_v47  ;;  %v2054_v38 = vsub.f32 %v5383_v54, %v1954_v27  ;;  %v5540_v32 = vpop.xlane.xlu2 %2268  ;;  %v5552_v54 = vsel %vm913_vm14, 1.0, %v6393_v35  ;;  %v686_v27 = vadd.f32 0.035714287, %v630_v36 }
 0x547   :  { %3440 = vmatmul.msk.bf16.gmra.mxu3 %vm1230_vm7, %v2480_v10  ;;  %v2282_v6 = vsel %vm1230_vm7, %v5537_v7, 0.0  ;;  %6541 = vst [vmem:[#allocation58_spill] sm:$0xff] %v5552_v54  ;;  %v3636_v63 = vpop.eup %3635  ;;  %v1522_v10 = vmul.f32 %v5552_v54, %v1463_v34 }
 0x548   :  { %3639 = vpow2.f32 %v2141_v0  ;;  %2283 = vadd.xlane.f32.xlu2 %v2282_v6  ;;  %v2143_v31 = vmul.f32 1.442695, %v2054_v38  ;;  %v3638_v61 = vpop.eup %3637  ;;  %v6544_v38 = vld [vmem:[#allocation33_spill] sm:$0xff]  ;;  %v2437_v52 = vmul.f32 %v3636_v63, %v5354_v55  ;;  %v6552_v55 = vld [vmem:[#allocation30_spill] sm:$0xff] }
 0x549   :  { %v2752_v6 = vmul.f32 %v6544_v38, %v2633_v48  ;;  %v6549_v48 = vld [vmem:[#allocation32_spill] sm:$0xff] }
 0x54a   :  { %3641 = vpow2.f32 %v2143_v31  ;;  %v631_v31 = vmul.f32 0.071428575, %v6546_v15  ;;  %v2751_v38 = vmul.f32 %v6549_v48, %v2630_v11  ;;  %v6550_v15 = vld [vmem:[#allocation63_spill] sm:$0xff] }
 0x54b   :  { %v2272_v28 = vpop.xlane.xlu1 %2271  ;;  %v1465_v44 = vpop.f32.mrf.mxu1  ;;  %v672_v56 = vmul.f32 0.071428575, %v6550_v15 }
 0x54c   :  { %v2635_v47 = vpop.f32.mrf.mxu3  ;;  %v1523_v36 = vmul.f32 %v5558_v9, %v1465_v44  ;;  %v6551_v44 = vld [vmem:[#allocation31_spill] sm:$0xff] }
 0x54d   :  { %v2753_v3 = vmul.f32 %v6545_v45, %v2635_v47  ;;  %v1957_v53 = vpop.xlane.xlu0 %1956  ;;  %v2750_v9 = vmul.f32 %v6551_v44, %v5512_v43  ;;  %v5596_v43 = vsel %vm5567_vm3, %v5510_v19, -1e+30 }
 0x54e   :  { %v5561_v0 = vpop.eup %3639  ;;  %v2055_v35 = vsub.f32 %v5413_v58, %v1957_v53  ;;  %v1960_v50 = vpop.xlane.xlu2 %1959  ;;  %v2438_v58 = vmul.f32 %v3638_v61, %v5358_v14  ;;  %v1551_v54 = vpack.c.bf16 %v1523_v36, %v1522_v10  ;;  %v2749_v14 = vmul.f32 %v6552_v55, %v5505_v23 }
 0x54f   :  { %v2285_v34 = vsel %vm1230_vm7, %v5561_v0, 0.0  ;;  %v2801_v47 = vpack.c.bf16 %v2753_v3, %v2752_v6  ;;  %v2056_v45 = vsub.f32 %v5419_v4, %v1960_v50  ;;  %v5582_v53 = vpop.f32.mrf.mxu2  ;;  %v2800_v63 = vpack.c.bf16 %v2751_v38, %v2750_v9  ;;  %v6555_v9 = vld [vmem:[#allocation28_spill] sm:$0xff] }
 0x550   :  { %2286 = vadd.xlane.f32.xlu2 %v2285_v34  ;;  %v5578_v21 = vpop.eup %3641  ;;  %v2145_v59 = vmul.f32 1.442695, %v2055_v35  ;;  %v687_v35 = vadd.f32 0.035714287, %v631_v31  ;;  %3428 = vmatmul.msk.bf16.gmra.mxu2 %vm1202_vm1, %v1551_v54  ;;  %v742_v61 = vfloor.f32 %v686_v27  ;;  %v728_v10 = vadd.f32 0.035714287, %v672_v56 }
 0x551   :  { %v2147_v11 = vmul.f32 1.442695, %v2056_v45  ;;  %2829 = vmatpush.bf16.msra.mxu0 %v2801_v47  ;;  %v2288_v4 = vsel %vm1230_vm7, %v5578_v21, 0.0  ;;  %v2481_v6 = vpack.c.bf16 %v2438_v58, %v2437_v52  ;;  %v6554_v34 = vld [vmem:[#allocation29_spill] sm:$0xff]  ;;  %v1976_v23 = vsel %vm1230_vm7, %v5596_v43, -inf  ;;  %v6556_v47 = vld [vmem:[#allocation27_spill] sm:$0xff] }
 0x552   :  { %3643 = vpow2.f32 %v2145_v59  ;;  %2289 = vadd.xlane.f32.xlu1 %v2288_v4  ;;  %v6553_v59 = vld [vmem:[#allocation64_spill] sm:$0xff]  ;;  %v2748_v31 = vmul.f32 %v6554_v34, %v5488_v37  ;;  %v743_v19 = vfloor.f32 %v687_v35  ;;  %v2747_v27 = vmul.f32 %v6555_v9, %v5486_v18 }
 0x553   :  { %v5588_v50 = vpop.xlane.xlu1 %2274  ;;  %3645 = vpow2.f32 %v2147_v11  ;;  %v673_v3 = vmul.f32 0.071428575, %v6553_v59  ;;  %vm798_vm4 = vcmp.eq.f32.partialorder %v4360_v42, %v742_v61  ;;  %v784_v37 = vfloor.f32 %v728_v10  ;;  %v6561_v4 = vld [vmem:[#allocation24_spill] sm:$0xff] }
 0x554   :  { %v2799_v56 = vpack.c.bf16 %v2749_v14, %v2748_v31  ;;  %3647 = vrcp.f32 %v2272_v28  ;;  %v2746_v45 = vmul.f32 %v6556_v47, %v5484_v24  ;;  %v6557_v28 = vld [vmem:[#allocation17_spill] sm:$0xff]  ;;  %vm5623_vm5 = vcmp.eq.f32.partialorder %v4360_v42, %v743_v19  ;;  %v6566_v47 = vld [vmem:[#allocation26_spill] sm:$0xff] }
 0x555   :  { %v5601_v36 = vpop.xlane.xlu0 %2277  ;;  %2830 = vmatpush.bf16.msra.mxu0 %v2800_v63  ;;  %v729_v48 = vadd.f32 0.035714287, %v673_v3  ;;  %3649 = vrcp.f32 %v5540_v32  ;;  %v632_v15 = vmul.f32 0.071428575, %v6557_v28  ;;  %v6560_v24 = vld [vmem:[#allocation37_spill] sm:$0xff]  ;;  %v2745_v35 = vmul.f32 %v6561_v4, %v5482_v40 }
 0x556   :  { %v1963_v54 = vpop.xlane.xlu2 %1962  ;;  %v5630_v32 = vsel %vm798_vm4, %v6560_v24, -1e+30  ;;  %v2798_v55 = vpack.c.bf16 %v2747_v27, %v2746_v45  ;;  %vm840_vm6 = vcmp.eq.f32.partialorder %v4360_v42, %v784_v37  ;;  %v6564_v19 = vld [vmem:[#allocation25_spill] sm:$0xff]  ;;  %v2742_v45 = vmul.f32 %v6566_v47, %v5460_v12  ;;  %v6571_v47 = vld [vmem:[#allocation71_spill] sm:$0xff] }
 0x557   :  { %3441 = vmatmul.msk.bf16.gmra.mxu3 %vm1230_vm7, %v2481_v6  ;;  %v2057_v49 = vsub.f32 %v5442_v17, %v1963_v54  ;;  %v5627_v11 = vpop.f32.mrf.mxu2  ;;  %v785_v61 = vfloor.f32 %v729_v48  ;;  %v6562_v6 = vld [vmem:[#allocation22_spill] sm:$0xff]  ;;  %v688_v31 = vadd.f32 0.035714287, %v632_v15  ;;  %v1853_v40 = vsel %vm1230_vm7, %v5630_v32, -inf }
 0x558   :  { %1977 = vmax.xlane.f32.xlu2 %v1976_v23  ;;  %v5608_v52 = vpop.eup %3643  ;;  %v2744_v59 = vmul.f32 %v6562_v6, %v5480_v60  ;;  %v6563_v54 = vld [vmem:[#allocation38_spill] sm:$0xff]  ;;  %v2743_v9 = vmul.f32 %v6564_v19, %v5474_v46  ;;  %v5650_v60 = vsel %vm840_vm6, %v5529_v8, -1e+30 }
 0x559   :  { %v5612_v38 = vpop.eup %3645  ;;  %2831 = vmatpush.bf16.msra.mxu0 %v2799_v56  ;;  %v2291_v18 = vsel %vm1230_vm7, %v5608_v52, 0.0  ;;  %v2149_v63 = vmul.f32 1.442695, %v2057_v49  ;;  %v6565_v56 = vld [vmem:[#allocation18_spill] sm:$0xff]  ;;  %vm841_vm8 = vcmp.eq.f32.partialorder %v4360_v42, %v785_v61  ;;  %v674_v49 = vmul.f32 0.071428575, %v4946_v29 }
 0x55a   :  { %2292 = vadd.xlane.f32.xlu1 %v2291_v18  ;;  %v2294_v58 = vsel %vm1230_vm7, %v5612_v38, 0.0  ;;  %v3648_v10 = vpop.eup %3647  ;;  %v2797_v27 = vpack.c.bf16 %v2745_v35, %v2744_v59  ;;  %v633_v37 = vmul.f32 0.071428575, %v6565_v56  ;;  %v1979_v8 = vsel %vm1230_vm7, %v5650_v60, -inf }
 0x55b   :  { %v1966_v44 = vpop.xlane.xlu1 %1965  ;;  %2295 = vadd.xlane.f32.xlu0 %v2294_v58  ;;  %v3650_v23 = vpop.eup %3649  ;;  %3651 = vpow2.f32 %v2149_v63  ;;  %v2440_v48 = vmul.f32 %v3648_v10, %v5407_v5  ;;  %v2796_v28 = vpack.c.bf16 %v2743_v9, %v2742_v45  ;;  %v5664_v15 = vsel %vm841_vm8, %v5545_v26, -1e+30 }
 0x55c   :  { %v2058_v14 = vsub.f32 %v5452_v25, %v1966_v44  ;;  %v5645_v25 = vsel %vm5623_vm5, %v6563_v54, -1e+30  ;;  %v2439_v18 = vmul.f32 %v3650_v23, %v5388_v30  ;;  %v689_v29 = vadd.f32 0.035714287, %v633_v37  ;;  %v6567_v44 = vld [vmem:[#allocation67_spill] sm:$0xff] }
 0x55d   :  { %v5638_v34 = vpop.xlane.xlu0 %2280  ;;  %2832 = vmatpush.bf16.msra.mxu0 %v2798_v55  ;;  %v1856_v46 = vsel %vm1230_vm7, %v5645_v25, -inf  ;;  %v744_v5 = vfloor.f32 %v688_v31  ;;  %v730_v58 = vadd.f32 0.035714287, %v674_v49  ;;  %v675_v17 = vmul.f32 0.071428575, %v6567_v44 }
 0x55e   :  { %v2151_v3 = vmul.f32 1.442695, %v2058_v14  ;;  %v2482_v12 = vpack.c.bf16 %v2440_v48, %v2439_v18  ;;  %v1982_v30 = vsel %vm1230_vm7, %v5664_v15, -inf  ;;  %v745_v14 = vfloor.f32 %v689_v29 }
 0x55f   :  { %v5667_v24 = vpop.f32.mrf.mxu2  ;;  %vm800_vm9 = vcmp.eq.f32.partialorder %v4360_v42, %v744_v5  ;;  %v786_v63 = vfloor.f32 %v730_v58  ;;  %v731_v10 = vadd.f32 0.035714287, %v675_v17  ;;  %v677_v45 = vmul.f32 0.071428575, %v6571_v47  ;;  %v6572_v17 = vld [vmem:[#allocation73_spill] sm:$0xff] }
 0x560   :  { %1854 = vmax.xlane.f32.xlu2 %v1853_v40  ;;  %3653 = vpow2.f32 %v2151_v3  ;;  %vm801_vm10 = vcmp.eq.f32.partialorder %v4360_v42, %v745_v14 }
 0x561   :  { %2833 = vmatpush.bf16.msra.mxu0 %v2797_v27  ;;  %v5669_v55 = vpop.eup %3651  ;;  %3655 = vrcp.f32 %v5601_v36  ;;  %v6568_v36 = vld [vmem:[#allocation41_spill] sm:$0xff]  ;;  %vm842_vm11 = vcmp.eq.f32.partialorder %v4360_v42, %v786_v63  ;;  %v787_v40 = vfloor.f32 %v731_v10  ;;  %v6570_v27 = vld [vmem:[#allocation42_spill] sm:$0xff] }
 0x562   :  { %1857 = vmax.xlane.f32.xlu1 %v1856_v46  ;;  %3657 = vrcp.f32 %v5588_v50  ;;  %v2297_v59 = vsel %vm1230_vm7, %v5669_v55, 0.0  ;;  %v5686_v31 = vsel %vm800_vm9, %v6568_v36, -1e+30  ;;  %v6569_v50 = vld [vmem:[#allocation69_spill] sm:$0xff]  ;;  %v5694_v56 = vsel %vm801_vm10, %v6570_v27, -1e+30 }
 0x563   :  { %1980 = vmax.xlane.f32.xlu0 %v1979_v8  ;;  %v1969_v4 = vpop.xlane.xlu1 %1968  ;;  %v676_v54 = vmul.f32 0.071428575, %v6569_v50  ;;  %v1859_v9 = vsel %vm1230_vm7, %v5686_v31, -inf  ;;  %v5697_v48 = vsel %vm842_vm11, %v5582_v53, -1e+30  ;;  %vm843_vm2 = vcmp.eq.f32.partialorder %v4360_v42, %v787_v40 }
 0x564   :  { %v2059_v61 = vsub.f32 %v5462_v57, %v1969_v4  ;;  %v1985_v53 = vsel %vm1230_vm7, %v5697_v48, -inf  ;;  %v5709_v5 = vsel %vm843_vm2, %v5627_v11, -1e+30  ;;  %v678_v4 = vmul.f32 0.071428575, %v6572_v17 }
 0x565   :  { %v1972_v35 = vpop.xlane.xlu0 %1971  ;;  %2834 = vmatpush.bf16.msra.mxu0 %v2796_v28  ;;  %v732_v8 = vadd.f32 0.035714287, %v676_v54  ;;  %v1862_v28 = vsel %vm1230_vm7, %v5694_v56, -inf }
 0x566   :  { %v5674_v26 = vpop.eup %3653  ;;  %v2060_v6 = vsub.f32 %v5467_v20, %v1972_v35  ;;  %v2153_v57 = vmul.f32 1.442695, %v2059_v61  ;;  %v6573_v35 = vld [vmem:[#allocation75_spill] sm:$0xff]  ;;  %v734_v10 = vadd.f32 0.035714287, %v678_v4 }
 0x567   :  { %3442 = vmatmul.msk.bf16.gmra.mxu3 %vm1230_vm7, %v2482_v12  ;;  %v2300_v3 = vsel %vm1230_vm7, %v5674_v26, 0.0  ;;  %v3656_v20 = vpop.eup %3655  ;;  %v1774_v37 = vpop.f32.mrf.mxu2  ;;  %v788_v58 = vfloor.f32 %v732_v8 }
 0x568   :  { %1983 = vmax.xlane.f32.xlu2 %v1982_v30  ;;  %v2155_v23 = vmul.f32 1.442695, %v2060_v6  ;;  %v3658_v49 = vpop.eup %3657  ;;  %v2442_v46 = vmul.f32 %v3656_v20, %v5444_v22  ;;  %3659 = vpow2.f32 %v2153_v57  ;;  %v733_v22 = vadd.f32 0.035714287, %v677_v45 }
 0x569   :  { %v2441_v29 = vmul.f32 %v3658_v49, %v5433_v16  ;;  %v1988_v16 = vsel %vm1230_vm7, %v5709_v5, -inf  ;;  %v679_v30 = vmul.f32 0.071428575, %v6573_v35  ;;  %vm844_vm12 = vcmp.eq.f32.partialorder %v4360_v42, %v788_v58 }
 0x56a   :  { %2298 = vadd.xlane.f32.xlu1 %v2297_v59  ;;  %3661 = vpow2.f32 %v2155_v23  ;;  %v789_v11 = vfloor.f32 %v733_v22  ;;  %v790_v36 = vfloor.f32 %v734_v10 }
 0x56b   :  { %2301 = vadd.xlane.f32.xlu0 %v2300_v3  ;;  %v2483_v12 = vpack.c.bf16 %v2442_v46, %v2441_v29  ;;  %v735_v59 = vadd.f32 0.035714287, %v679_v30  ;;  %v5726_v3 = vsel %vm844_vm12, %v5667_v24, -1e+30  ;;  %v5750_v46 = vpop.f32.mrf.mxu3 }
 0x56c   :  { %vm845_vm13 = vcmp.eq.f32.partialorder %v4360_v42, %v789_v11  ;;  %v1991_v40 = vsel %vm1230_vm7, %v5726_v3, -inf  ;;  %vm846_vm14 = vcmp.eq.f32.partialorder %v4360_v42, %v790_v36 }
 0x56d   :  { %v1975_v19 = vpop.xlane.xlu0 %1974  ;;  %v5729_v57 = vsel %vm845_vm13, %v1774_v37, -1e+30  ;;  %v791_v50 = vfloor.f32 %v735_v59 }
 0x56e   :  { %v2061_v18 = vsub.f32 %v5476_v51, %v1975_v19  ;;  %v5712_v51 = vpop.eup %3659  ;;  %v1994_v20 = vsel %vm1230_vm7, %v5729_v57, -inf }
 0x56f   :  { %v1777_v63 = vpop.f32.mrf.mxu2  ;;  %v2303_v61 = vsel %vm1230_vm7, %v5712_v51, 0.0  ;;  %vm847_vm15 = vcmp.eq.f32.partialorder %v4360_v42, %v791_v50 }
 0x570   :  { %1860 = vmax.xlane.f32.xlu2 %v1859_v9  ;;  %v2157_v44 = vmul.f32 1.442695, %v2061_v18  ;;  %v5718_v14 = vpop.eup %3661  ;;  %v5741_v19 = vsel %vm846_vm14, %v1777_v63, -1e+30 }
 0x571   :  { %v2306_v6 = vsel %vm1230_vm7, %v5718_v14, 0.0  ;;  %v1997_v27 = vsel %vm1230_vm7, %v5741_v19, -inf }
 0x572   :  { %1863 = vmax.xlane.f32.xlu1 %v1862_v28  ;;  %3663 = vpow2.f32 %v2157_v44 }
 0x573   :  { %1986 = vmax.xlane.f32.xlu0 %v1985_v53  ;;  %3665 = vrcp.f32 %v5638_v34  ;;  %v5755_v58 = vpop.f32.mrf.mxu3 }
 0x577   :  { %3443 = vmatmul.msk.bf16.gmra.mxu3 %vm1230_vm7, %v2483_v12  ;;  %v1779_v23 = vpop.f32.mrf.mxu2 }
 0x578   :  { %1989 = vmax.xlane.f32.xlu2 %v1988_v16  ;;  %v5733_v54 = vpop.eup %3663  ;;  %v5743_v9 = vsel %vm847_vm15, %v1779_v23, -1e+30 }
 0x579   :  { %v2309_v24 = vsel %vm1230_vm7, %v5733_v54, 0.0  ;;  %v2000_v37 = vsel %vm1230_vm7, %v5743_v9, -inf  ;;  %v3666_v47 = vpop.eup %3665 }
 0x57a   :  { %2304 = vadd.xlane.f32.xlu1 %v2303_v61  ;;  %v2443_v8 = vmul.f32 %v3666_v47, %v5458_v62 }
 0x57b   :  { %2307 = vadd.xlane.f32.xlu0 %v2306_v6  ;;  %v5763_v10 = vpop.f32.mrf.mxu3 }
 0x57f   :  { %v1782_v16 = vpop.f32.mrf.mxu2 }
 0x580   :  { %1992 = vmax.xlane.f32.xlu2 %v1991_v40 }
 0x582   :  { %1995 = vmax.xlane.f32.xlu1 %v1994_v20  ;;  %v6575_v20 = vld [vmem:[#allocation76_spill] sm:$0xff] }
 0x583   :  { %2310 = vadd.xlane.f32.xlu0 %v2309_v24  ;;  %v681_v24 = vmul.f32 0.071428575, %v6575_v20  ;;  %v6577_v20 = vld [vmem:[#allocation80_spill] sm:$0xff] }
 0x587   :  { %v1784_v23 = vpop.f32.mrf.mxu2 }
 0x58a   :  { %1998 = vmax.xlane.f32.xlu1 %v1997_v27 }
 0x58b   :  { %2001 = vmax.xlane.f32.xlu0 %v2000_v37 }
 0x5bb   :  { %v2284_v49 = vpop.xlane.xlu2 %2283 }
 0x5bc   :  { %3667 = vrcp.f32 %v2284_v49 }
 0x5c2   :  { %v3668_v45 = vpop.eup %3667 }
 0x5c3   :  { %v2444_v18 = vmul.f32 %v3668_v45, %v5537_v7  ;;  %v2287_v28 = vpop.xlane.xlu2 %2286 }
 0x5c5   :  { %v2484_v29 = vpack.c.bf16 %v2444_v18, %v2443_v8  ;;  %v2290_v53 = vpop.xlane.xlu1 %2289  ;;  %v737_v8 = vadd.f32 0.035714287, %v681_v24  ;;  %v683_v24 = vmul.f32 0.071428575, %v6577_v20 }
 0x5c6   :  { %3669 = vrcp.f32 %v2290_v53 }
 0x5c7   :  { %3444 = vmatmul.msk.bf16.gmra.mxu3 %vm1230_vm7, %v2484_v29  ;;  %3671 = vrcp.f32 %v2287_v28 }
 0x5cb   :  { %v1978_v22 = vpop.xlane.xlu2 %1977 }
 0x5cc   :  { %v2062_v34 = vsub.f32 %v5596_v43, %v1978_v22  ;;  %v3670_v12 = vpop.eup %3669  ;;  %v5777_v22 = vpop.f32.mrf.mxu3 }
 0x5cd   :  { %v2293_v17 = vpop.xlane.xlu1 %2292  ;;  %v3672_v62 = vpop.eup %3671  ;;  %v2446_v7 = vmul.f32 %v3670_v12, %v5578_v21  ;;  %v6574_v21 = vld [vmem:[#allocation45_spill] sm:$0xff] }
 0x5ce   :  { %v2159_v44 = vmul.f32 1.442695, %v2062_v34  ;;  %v2296_v4 = vpop.xlane.xlu0 %2295  ;;  %v2445_v35 = vmul.f32 %v3672_v62, %v5561_v0  ;;  %v680_v40 = vmul.f32 0.071428575, %v6574_v21 }
 0x5d0   :  { %3673 = vpow2.f32 %v2159_v44  ;;  %v2485_v63 = vpack.c.bf16 %v2446_v7, %v2445_v35  ;;  %v5787_v7 = vpop.f32.mrf.mxu2 }
 0x5d1   :  { %3675 = vrcp.f32 %v2293_v17  ;;  %v793_v17 = vfloor.f32 %v737_v8 }
 0x5d2   :  { %3677 = vrcp.f32 %v2296_v4 }
 0x5d3   :  { %v1855_v30 = vpop.xlane.xlu2 %1854  ;;  %vm849_vm4 = vcmp.eq.f32.partialorder %v4360_v42, %v793_v17 }
 0x5d4   :  { %v2021_v11 = vsub.f32 %v5630_v32, %v1855_v30  ;;  %v5804_v21 = vsel %vm849_vm4, %v1784_v23, -1e+30 }
 0x5d5   :  { %v1858_v6 = vpop.xlane.xlu1 %1857 }
 0x5d6   :  { %v5761_v61 = vpop.eup %3673  ;;  %v2077_v43 = vmul.f32 1.442695, %v2021_v11  ;;  %v1981_v59 = vpop.xlane.xlu0 %1980  ;;  %v2022_v36 = vsub.f32 %v5645_v25, %v1858_v6  ;;  %v736_v25 = vadd.f32 0.035714287, %v680_v40  ;;  %v6576_v40 = vld [vmem:[#allocation79_spill] sm:$0xff] }
 0x5d7   :  { %3445 = vmatmul.msk.bf16.gmra.mxu3 %vm1230_vm7, %v2485_v63  ;;  %v2312_v0 = vsel %vm1230_vm7, %v5761_v61, 0.0  ;;  %v2063_v32 = vsub.f32 %v5650_v60, %v1981_v59  ;;  %v3676_v49 = vpop.eup %3675 }
 0x5d8   :  { %3679 = vpow2.f32 %v2077_v43  ;;  %2313 = vadd.xlane.f32.xlu2 %v2312_v0  ;;  %v2079_v50 = vmul.f32 1.442695, %v2022_v36  ;;  %v3678_v45 = vpop.eup %3677  ;;  %v792_v34 = vfloor.f32 %v736_v25  ;;  %v5802_v0 = vpop.f32.mrf.mxu3 }
 0x5d9   :  { %v2161_v27 = vmul.f32 1.442695, %v2063_v32  ;;  %v2448_v44 = vmul.f32 %v3678_v45, %v5612_v38  ;;  %v682_v32 = vmul.f32 0.071428575, %v6576_v40  ;;  %v739_v45 = vadd.f32 0.035714287, %v683_v24  ;;  %v1789_v8 = vpop.f32.mrf.mxu2 }
 0x5da   :  { %3681 = vpow2.f32 %v2079_v50  ;;  %vm848_vm3 = vcmp.eq.f32.partialorder %v4360_v42, %v792_v34 }
 0x5db   :  { %v1984_v37 = vpop.xlane.xlu2 %1983  ;;  %3683 = vpow2.f32 %v2161_v27  ;;  %v5796_v6 = vsel %vm848_vm3, %v1782_v16, -1e+30  ;;  %v738_v25 = vadd.f32 0.035714287, %v682_v32 }
 0x5dc   :  { %v2064_v47 = vsub.f32 %v5664_v15, %v1984_v37  ;;  %v2447_v15 = vmul.f32 %v3676_v49, %v5608_v52  ;;  %v2006_v49 = vsel %vm1230_vm7, %v5804_v21, -inf }
 0x5dd   :  { %v2299_v29 = vpop.xlane.xlu1 %2298 }
 0x5de   :  { %v5773_v18 = vpop.eup %3679  ;;  %v2163_v28 = vmul.f32 1.442695, %v2064_v47  ;;  %v2302_v60 = vpop.xlane.xlu0 %2301  ;;  %v2486_v52 = vpack.c.bf16 %v2448_v44, %v2447_v15  ;;  %v794_v44 = vfloor.f32 %v738_v25 }
 0x5df   :  { %v2189_v53 = vsel %vm1230_vm7, %v5773_v18, 0.0 }
 0x5e0   :  { %3685 = vpow2.f32 %v2163_v28  ;;  %2190 = vadd.xlane.f32.xlu2 %v2189_v53  ;;  %v5779_v12 = vpop.eup %3681  ;;  %vm850_vm5 = vcmp.eq.f32.partialorder %v4360_v42, %v794_v44 }
 0x5e1   :  { %v5783_v4 = vpop.eup %3683  ;;  %v2192_v62 = vsel %vm1230_vm7, %v5779_v12, 0.0  ;;  %3687 = vrcp.f32 %v2299_v29  ;;  %v5838_v32 = vsel %vm850_vm5, %v5787_v7, -1e+30 }
 0x5e2   :  { %v2315_v30 = vsel %vm1230_vm7, %v5783_v4, 0.0  ;;  %2193 = vadd.xlane.f32.xlu1 %v2192_v62  ;;  %3689 = vrcp.f32 %v2302_v60  ;;  %v795_v62 = vfloor.f32 %v739_v45  ;;  %v2009_v7 = vsel %vm1230_vm7, %v5838_v32, -inf }
 0x5e3   :  { %v1861_v35 = vpop.xlane.xlu2 %1860  ;;  %2316 = vadd.xlane.f32.xlu0 %v2315_v30 }
 0x5e4   :  { %v2023_v11 = vsub.f32 %v5686_v31, %v1861_v35  ;;  %v684_v35 = vmul.f32 0.071428575, %v5313_v41  ;;  %vm851_vm6 = vcmp.eq.f32.partialorder %v4360_v42, %v795_v62 }
 0x5e5   :  { %v1864_v43 = vpop.xlane.xlu1 %1863  ;;  %v5844_v24 = vsel %vm851_vm6, %v1789_v8, -1e+30 }
 0x5e6   :  { %v5794_v38 = vpop.eup %3685  ;;  %v2081_v63 = vmul.f32 1.442695, %v2023_v11  ;;  %v1987_v59 = vpop.xlane.xlu0 %1986  ;;  %v2024_v36 = vsub.f32 %v5694_v56, %v1864_v43  ;;  %v2003_v56 = vsel %vm1230_vm7, %v5796_v6, -inf  ;;  %v740_v41 = vadd.f32 0.035714287, %v684_v35 }
 0x5e7   :  { %3446 = vmatmul.msk.bf16.gmra.mxu3 %vm1230_vm7, %v2486_v52  ;;  %v2318_v31 = vsel %vm1230_vm7, %v5794_v38, 0.0  ;;  %v2065_v50 = vsub.f32 %v5697_v48, %v1987_v59  ;;  %v3688_v23 = vpop.eup %3687  ;;  %v5825_v11 = vpop.f32.mrf.mxu3  ;;  %v685_v59 = vmul.f32 0.071428575, %v5325_v13 }
 0x5e8   :  { %3691 = vpow2.f32 %v2081_v63  ;;  %2319 = vadd.xlane.f32.xlu2 %v2318_v31  ;;  %v2083_v16 = vmul.f32 1.442695, %v2024_v36  ;;  %v3690_v48 = vpop.eup %3689  ;;  %v796_v13 = vfloor.f32 %v740_v41 }
 0x5e9   :  { %v2165_v27 = vmul.f32 1.442695, %v2065_v50  ;;  %v2450_v17 = vmul.f32 %v3690_v48, %v5674_v26  ;;  %v1792_v50 = vpop.f32.mrf.mxu2 }
 0x5ea   :  { %3693 = vpow2.f32 %v2083_v16  ;;  %2004 = vmax.xlane.f32.xlu1 %v2003_v56  ;;  %v741_v56 = vadd.f32 0.035714287, %v685_v59  ;;  %vm852_vm8 = vcmp.eq.f32.partialorder %v4360_v42, %v796_v13 }
 0x5eb   :  { %v1990_v37 = vpop.xlane.xlu2 %1989  ;;  %3695 = vpow2.f32 %v2165_v27  ;;  %2007 = vmax.xlane.f32.xlu0 %v2006_v49 }
 0x5ec   :  { %v2066_v47 = vsub.f32 %v5709_v5, %v1990_v37  ;;  %v2449_v5 = vmul.f32 %v3688_v23, %v5669_v55  ;;  %v2012_v37 = vsel %vm1230_vm7, %v5844_v24, -inf  ;;  %v797_v25 = vfloor.f32 %v741_v56 }
 0x5ed   :  { %v2305_v60 = vpop.xlane.xlu1 %2304 }
 0x5ee   :  { %v5814_v28 = vpop.eup %3691  ;;  %v2167_v29 = vmul.f32 1.442695, %v2066_v47  ;;  %v2308_v53 = vpop.xlane.xlu0 %2307  ;;  %v2487_v55 = vpack.c.bf16 %v2450_v17, %v2449_v5  ;;  %vm853_vm9 = vcmp.eq.f32.partialorder %v4360_v42, %v797_v25 }
 0x5ef   :  { %v2195_v34 = vsel %vm1230_vm7, %v5814_v28, 0.0  ;;  %v5850_v49 = vpop.f32.mrf.mxu3 }
 0x5f0   :  { %3697 = vpow2.f32 %v2167_v29  ;;  %2196 = vadd.xlane.f32.xlu2 %v2195_v34  ;;  %v5818_v15 = vpop.eup %3693 }
 0x5f1   :  { %v5823_v30 = vpop.eup %3695  ;;  %v2198_v52 = vsel %vm1230_vm7, %v5818_v15, 0.0  ;;  %3699 = vrcp.f32 %v2305_v60  ;;  %v5858_v60 = vsel %vm852_vm8, %v1792_v50, -1e+30  ;;  %v1794_v5 = vpop.f32.mrf.mxu2 }
 0x5f2   :  { %v2321_v43 = vsel %vm1230_vm7, %v5823_v30, 0.0  ;;  %2199 = vadd.xlane.f32.xlu1 %v2198_v52  ;;  %3701 = vrcp.f32 %v2308_v53  ;;  %v2015_v52 = vsel %vm1230_vm7, %v5858_v60, -inf }
 0x5f3   :  { %v1993_v63 = vpop.xlane.xlu2 %1992  ;;  %2322 = vadd.xlane.f32.xlu0 %v2321_v43 }
 0x5f4   :  { %v2067_v26 = vsub.f32 %v5726_v3, %v1993_v63 }
 0x5f5   :  { %v1996_v40 = vpop.xlane.xlu1 %1995 }
 0x5f6   :  { %v5835_v36 = vpop.eup %3697  ;;  %v2169_v31 = vmul.f32 1.442695, %v2067_v26  ;;  %v2311_v16 = vpop.xlane.xlu0 %2310  ;;  %v2068_v3 = vsub.f32 %v5729_v57, %v1996_v40 }
 0x5f7   :  { %3447 = vmatmul.msk.bf16.gmra.mxu3 %vm1230_vm7, %v2487_v55  ;;  %v2324_v20 = vsel %vm1230_vm7, %v5835_v36, 0.0  ;;  %v3700_v57 = vpop.eup %3699  ;;  %v5872_v63 = vpop.f32.mrf.mxu3 }
 0x5f8   :  { %3703 = vpow2.f32 %v2169_v31  ;;  %2325 = vadd.xlane.f32.xlu2 %v2324_v20  ;;  %v2171_v27 = vmul.f32 1.442695, %v2068_v3  ;;  %v3702_v23 = vpop.eup %3701  ;;  %v2451_v17 = vmul.f32 %v3700_v57, %v5712_v51 }
 0x5f9   :  { %v2452_v44 = vmul.f32 %v3702_v23, %v5718_v14 }
 0x5fa   :  { %3705 = vpow2.f32 %v2171_v27  ;;  %2010 = vmax.xlane.f32.xlu1 %v2009_v7 }
 0x5fb   :  { %2013 = vmax.xlane.f32.xlu0 %v2012_v37  ;;  %v2488_v14 = vpack.c.bf16 %v2452_v44, %v2451_v17 }
 0x5fd   :  { %v1999_v48 = vpop.xlane.xlu1 %1998 }
 0x5fe   :  { %v5853_v47 = vpop.eup %3703  ;;  %v2002_v45 = vpop.xlane.xlu0 %2001  ;;  %v2069_v8 = vsub.f32 %v5741_v19, %v1999_v48 }
 0x5ff   :  { %v2327_v29 = vsel %vm1230_vm7, %v5853_v47, 0.0  ;;  %v2070_v53 = vsub.f32 %v5743_v9, %v2002_v45  ;;  %v5870_v9 = vsel %vm853_vm9, %v1794_v5, -1e+30  ;;  %v5885_v55 = vpop.f32.mrf.mxu3 }
 0x600   :  { %2328 = vadd.xlane.f32.xlu2 %v2327_v29  ;;  %v5861_v34 = vpop.eup %3705  ;;  %v2173_v62 = vmul.f32 1.442695, %v2069_v8  ;;  %v2018_v42 = vsel %vm1230_vm7, %v5870_v9, -inf }
 0x601   :  { %v2175_v35 = vmul.f32 1.442695, %v2070_v53  ;;  %v2330_v19 = vsel %vm1230_vm7, %v5861_v34, 0.0 }
 0x602   :  { %3707 = vpow2.f32 %v2173_v62  ;;  %2331 = vadd.xlane.f32.xlu1 %v2330_v19 }
 0x603   :  { %3709 = vpow2.f32 %v2175_v35  ;;  %2016 = vmax.xlane.f32.xlu0 %v2015_v52 }
 0x604   :  { %3711 = vrcp.f32 %v2311_v16 }
 0x607   :  { %3448 = vmatmul.msk.bf16.gmra.mxu3 %vm1230_vm7, %v2488_v14  ;;  %v5887_v59 = vpop.f32.mrf.mxu3 }
 0x608   :  { %2019 = vmax.xlane.f32.xlu2 %v2018_v42  ;;  %v5877_v51 = vpop.eup %3707  ;;  %v6578_v42 = vld [vmem:[#allocation59_spill] sm:$0xff] }
 0x609   :  { %v5879_v43 = vpop.eup %3709  ;;  %v2333_v26 = vsel %vm1230_vm7, %v5877_v51, 0.0 }
 0x60a   :  { %v2336_v41 = vsel %vm1230_vm7, %v5879_v43, 0.0  ;;  %2334 = vadd.xlane.f32.xlu1 %v2333_v26  ;;  %v3712_v27 = vpop.eup %3711 }
 0x60b   :  { %2337 = vadd.xlane.f32.xlu0 %v2336_v41  ;;  %v2453_v37 = vmul.f32 %v3712_v27, %v5733_v54  ;;  %v6579_v27 = vld [vmem:[#allocation60_spill] sm:$0xff] }
 0x60f   :  { %v5889_v31 = vpop.f32.mrf.mxu3 }
 0x617   :  { %v5891_v40 = vpop.f32.mrf.mxu3 }
 0x61f   :  { %v5893_v50 = vpop.f32.mrf.mxu3 }
 0x627   :  { %v5895_v3 = vpop.f32.mrf.mxu3 }
 0x64a   :  { %v5897_v20 = vpop.f32.mrf.mxu3 }
 0x64b   :  { %v2314_v13 = vpop.xlane.xlu2 %2313 }
 0x64c   :  { %3713 = vrcp.f32 %v2314_v13 }
 0x652   :  { %v3714_v56 = vpop.eup %3713  ;;  %v5899_v7 = vpop.f32.mrf.mxu3 }
 0x653   :  { %v2454_v57 = vmul.f32 %v3714_v56, %v5761_v61  ;;  %v2191_v23 = vpop.xlane.xlu2 %2190 }
 0x654   :  { %3715 = vrcp.f32 %v2191_v23 }
 0x655   :  { %v2489_v25 = vpack.c.bf16 %v2454_v57, %v2453_v37  ;;  %v2194_v48 = vpop.xlane.xlu1 %2193 }
 0x656   :  { %v2317_v45 = vpop.xlane.xlu0 %2316  ;;  %3717 = vrcp.f32 %v2194_v48 }
 0x657   :  { %3449 = vmatmul.msk.bf16.gmra.mxu3 %vm1230_vm7, %v2489_v25  ;;  %3719 = vrcp.f32 %v2317_v45 }
 0x65a   :  { %v2678_v16 = vpop.f32.mrf.mxu3  ;;  %v3716_v8 = vpop.eup %3715 }
 0x65b   :  { %v2320_v29 = vpop.xlane.xlu2 %2319  ;;  %v2413_v44 = vmul.f32 %v3716_v8, %v5773_v18  ;;  %v5909_v26 = vmul.f32 %v6578_v42, %v2678_v16 }
 0x65c   :  { %3721 = vrcp.f32 %v2320_v29  ;;  %v3718_v53 = vpop.eup %3717 }
 0x65d   :  { %v2414_v54 = vmul.f32 %v3718_v53, %v5779_v12  ;;  %v2005_v17 = vpop.xlane.xlu1 %2004  ;;  %v3720_v62 = vpop.eup %3719 }
 0x65e   :  { %v2008_v61 = vpop.xlane.xlu0 %2007  ;;  %v2071_v5 = vsub.f32 %v5796_v6, %v2005_v17  ;;  %v2455_v18 = vmul.f32 %v3720_v62, %v5783_v4 }
 0x65f   :  { %v2469_v35 = vpack.c.bf16 %v2414_v54, %v2413_v44  ;;  %v2072_v19 = vsub.f32 %v5804_v21, %v2008_v61 }
 0x660   :  { %v2177_v52 = vmul.f32 1.442695, %v2071_v5 }
 0x661   :  { %v2179_v41 = vmul.f32 1.442695, %v2072_v19  ;;  %3429 = vmatmul.msk.bf16.vlgmr.msrb.gmra.mxu0 %vm1230_vm7, %v2469_v35 }
 0x662   :  { %v3722_v14 = vpop.eup %3721  ;;  %v2680_v13 = vpop.f32.mrf.mxu3  ;;  %3723 = vpow2.f32 %v2177_v52 }
 0x663   :  { %v2456_v12 = vmul.f32 %v3722_v14, %v5794_v38  ;;  %v5915_v6 = vmul.f32 %v6579_v27, %v2680_v13  ;;  %v2197_v56 = vpop.xlane.xlu2 %2196  ;;  %3725 = vpow2.f32 %v2179_v41  ;;  %v6580_v14 = vld [vmem:[#allocation61_spill] sm:$0xff] }
 0x664   :  { %3727 = vrcp.f32 %v2197_v56 }
 0x665   :  { %v2810_v21 = vpack.c.bf16 %v5915_v6, %v5909_v26  ;;  %v2490_v37 = vpack.c.bf16 %v2456_v12, %v2455_v18  ;;  %v2200_v57 = vpop.xlane.xlu1 %2199  ;;  %v6581_v18 = vld [vmem:[#allocation62_spill] sm:$0xff] }
 0x666   :  { %v2323_v23 = vpop.xlane.xlu0 %2322  ;;  %3729 = vrcp.f32 %v2200_v57 }
 0x667   :  { %3450 = vmatmul.msk.bf16.gmra.mxu3 %vm1230_vm7, %v2490_v37  ;;  %3731 = vrcp.f32 %v2323_v23 }
 0x668   :  { %v5920_v25 = vpop.eup %3723 }
 0x669   :  { %v5922_v4 = vpop.eup %3725  ;;  %v2339_v48 = vsel %vm1230_vm7, %v5920_v25, 0.0 }
 0x66a   :  { %v2683_v38 = vpop.f32.mrf.mxu3  ;;  %v3728_v45 = vpop.eup %3727  ;;  %v2342_v8 = vsel %vm1230_vm7, %v5922_v4, 0.0  ;;  %2340 = vadd.xlane.f32.xlu2 %v2339_v48 }
 0x66b   :  { %v2326_v16 = vpop.xlane.xlu2 %2325  ;;  %2343 = vadd.xlane.f32.xlu1 %v2342_v8  ;;  %v2415_v44 = vmul.f32 %v3728_v45, %v5814_v28  ;;  %v5933_v42 = vmul.f32 %v6580_v14, %v2683_v38 }
 0x66c   :  { %3733 = vrcp.f32 %v2326_v16  ;;  %v3730_v29 = vpop.eup %3729 }
 0x66d   :  { %v2011_v53 = vpop.xlane.xlu1 %2010  ;;  %v2416_v54 = vmul.f32 %v3730_v29, %v5818_v15  ;;  %v3732_v5 = vpop.eup %3731 }
 0x66e   :  { %v2014_v17 = vpop.xlane.xlu0 %2013  ;;  %v2073_v61 = vsub.f32 %v5838_v32, %v2011_v53  ;;  %v2457_v28 = vmul.f32 %v3732_v5, %v5823_v30  ;;  %v6582_v5 = vld [vmem:[#allocation65_spill] sm:$0xff] }
 0x66f   :  { %v2074_v62 = vsub.f32 %v5844_v24, %v2014_v17  ;;  %v2470_v35 = vpack.c.bf16 %v2416_v54, %v2415_v44 }
 0x670   :  { %v2181_v19 = vmul.f32 1.442695, %v2073_v61 }
 0x671   :  { %v2183_v41 = vmul.f32 1.442695, %v2074_v62  ;;  %3430 = vmatmul.msk.bf16.gmra.mxu0 %vm1230_vm7, %v2470_v35  ;;  %v6583_v35 = vld [vmem:[#allocation66_spill] sm:$0xff] }
 0x672   :  { %v3734_v52 = vpop.eup %3733  ;;  %v2685_v13 = vpop.f32.mrf.mxu3  ;;  %3735 = vpow2.f32 %v2181_v19 }
 0x673   :  { %v2458_v15 = vmul.f32 %v3734_v52, %v5835_v36  ;;  %v5939_v32 = vmul.f32 %v6581_v18, %v2685_v13  ;;  %v2329_v12 = vpop.xlane.xlu2 %2328  ;;  %3737 = vpow2.f32 %v2183_v41 }
 0x675   :  { %v2811_v24 = vpack.c.bf16 %v5939_v32, %v5933_v42  ;;  %v2491_v27 = vpack.c.bf16 %v2458_v15, %v2457_v28  ;;  %v2332_v56 = vpop.xlane.xlu1 %2331 }
 0x676   :  { %v2017_v37 = vpop.xlane.xlu0 %2016  ;;  %3739 = vrcp.f32 %v2332_v56 }
 0x677   :  { %3451 = vmatmul.msk.bf16.gmra.mxu3 %vm1230_vm7, %v2491_v27  ;;  %v2075_v57 = vsub.f32 %v5858_v60, %v2017_v37  ;;  %3741 = vrcp.f32 %v2329_v12 }
 0x678   :  { %v5945_v30 = vpop.eup %3735 }
 0x679   :  { %v5947_v36 = vpop.eup %3737  ;;  %v2185_v23 = vmul.f32 1.442695, %v2075_v57  ;;  %v2345_v48 = vsel %vm1230_vm7, %v5945_v30, 0.0 }
 0x67a   :  { %v2688_v38 = vpop.f32.mrf.mxu3  ;;  %v2348_v16 = vsel %vm1230_vm7, %v5947_v36, 0.0  ;;  %2346 = vadd.xlane.f32.xlu0 %v2345_v48 }
 0x67b   :  { %v2020_v45 = vpop.xlane.xlu2 %2019  ;;  %3743 = vpow2.f32 %v2185_v23  ;;  %2349 = vadd.xlane.f32.xlu2 %v2348_v16  ;;  %v5959_v62 = vmul.f32 %v6582_v5, %v2688_v38 }
 0x67c   :  { %v2076_v8 = vsub.f32 %v5870_v9, %v2020_v45  ;;  %v3740_v60 = vpop.eup %3739 }
 0x67d   :  { %v3742_v53 = vpop.eup %3741  ;;  %v2460_v44 = vmul.f32 %v3740_v60, %v5861_v34  ;;  %v2335_v52 = vpop.xlane.xlu1 %2334 }
 0x67e   :  { %v2187_v29 = vmul.f32 1.442695, %v2076_v8  ;;  %v2459_v61 = vmul.f32 %v3742_v53, %v5853_v47  ;;  %v2338_v14 = vpop.xlane.xlu0 %2337  ;;  %v1033_v53 = vmul.f32 0.035714287, %v3952_v1 }
 0x680   :  { %3745 = vpow2.f32 %v2187_v29  ;;  %v2492_v41 = vpack.c.bf16 %v2460_v44, %v2459_v61 }
 0x681   :  { %v5955_v54 = vpop.eup %3743  ;;  %3747 = vrcp.f32 %v2335_v52 }
 0x682   :  { %v2690_v17 = vpop.f32.mrf.mxu3  ;;  %v2351_v9 = vsel %vm1230_vm7, %v5955_v54, 0.0  ;;  %3749 = vrcp.f32 %v2338_v14 }
 0x683   :  { %v5962_v19 = vmul.f32 %v6583_v35, %v2690_v17  ;;  %2352 = vadd.xlane.f32.xlu1 %v2351_v9  ;;  %v1037_v17 = vadd.f32 0.017857144, %v1033_v53 }
 0x685   :  { %v2812_v34 = vpack.c.bf16 %v5962_v19, %v5959_v62  ;;  %v1041_v9 = vfloor.f32 %v1037_v17 }
 0x686   :  { %v5968_v13 = vpop.eup %3745 }
 0x687   :  { %3452 = vmatmul.msk.bf16.gmra.mxu3 %vm1230_vm7, %v2492_v41  ;;  %v2354_v47 = vsel %vm1230_vm7, %v5968_v13, 0.0  ;;  %v3748_v28 = vpop.eup %3747  ;;  %v1045_v14 = vmul.f32 28.0, %v1041_v9  ;;  %v6590_v9 = vld [vmem:[#allocation10_spill] sm:$0xff] }
 0x688   :  { %2355 = vadd.xlane.f32.xlu0 %v2354_v47  ;;  %v3750_v15 = vpop.eup %3749  ;;  %v2461_v12 = vmul.f32 %v3748_v28, %v5877_v51 }
 0x689   :  { %v2462_v18 = vmul.f32 %v3750_v15, %v5879_v43  ;;  %v6584_v15 = vld [vmem:[#allocation21_spill] sm:$0xff] }
 0x68a   :  { %v5976_v56 = vpop.f32.mrf.mxu3 }
 0x68b   :  { %v2493_v27 = vpack.c.bf16 %v2462_v18, %v2461_v12  ;;  %v6585_v12 = vld [vmem:[#allocation23_spill] sm:$0xff] }
 0x692   :  { %v5978_v37 = vpop.f32.mrf.mxu3 }
 0x697   :  { %3453 = vmatmul.msk.bf16.gmra.mxu3 %vm1230_vm7, %v2493_v27 }
 0x6da   :  { %v5980_v57 = vpop.f32.mrf.mxu3 }
 0x6dd   :  { %v2341_v23 = vpop.xlane.xlu2 %2340 }
 0x6de   :  { %3751 = vrcp.f32 %v2341_v23  ;;  %v2344_v38 = vpop.xlane.xlu1 %2343  ;;  %v2598_v48 = vpop.f32.mrf.mxu0 }
 0x6df   :  { %3753 = vrcp.f32 %v2344_v38  ;;  %v1049_v38 = vsub.f32 %v3952_v1, %v1045_v14  ;;  %v6592_v14 = vld [vmem:[#allocation55_spill] sm:$0xff] }
 0x6e1   :  { %vm1053_vm10 = vcmp.eq.f32.partialorder %v6590_v9, %v1049_v38 }
 0x6e2   :  { %v5982_v45 = vpop.f32.mrf.mxu3 }
 0x6e4   :  { %v3752_v16 = vpop.eup %3751 }
 0x6e5   :  { %v3754_v43 = vpop.eup %3753  ;;  %v2463_v51 = vmul.f32 %v3752_v16, %v5920_v25  ;;  %v6586_v16 = vld [vmem:[#allocation20_spill] sm:$0xff] }
 0x6e6   :  { %v2464_v8 = vmul.f32 %v3754_v43, %v5922_v4  ;;  %v2600_v60 = vpop.f32.mrf.mxu0 }
 0x6e7   :  { %v2739_v43 = vmul.f32 %v6586_v16, %v2600_v60  ;;  %v6591_v60 = vld [vmem:[#allocation11_spill] sm:$0xff] }
 0x6e8   :  { %v2494_v29 = vpack.c.bf16 %v2464_v8, %v2463_v51  ;;  %vm1057_vm11 = vcmp.eq.f32.partialorder %v6591_v60, %v1049_v38 }
 0x6e9   :  { %vm3457_vm2 = vmpackc.low %vm1057_vm11, %vm1053_vm10 }
 0x6ea   :  { %v5987_v44 = vpop.f32.mrf.mxu3  ;;  %3454 = vmatmul.msk.bf16.gmra.mxu3 %vm1230_vm7, %v2494_v29  ;;  %v6587_v29 = vld [vmem:[#allocation57_spill] sm:$0xff] }
 0x6eb   :  { %v2769_v53 = vmul.f32 %v6587_v29, %v5899_v7  ;;  %v2767_v7 = vmul.f32 %v6592_v14, %v5895_v3  ;;  %v6596_v3 = vld [vmem:[#allocation52_spill] sm:$0xff]  ;;  %v6597_v29 = vld [vmem:[#allocation50_spill] sm:$0xff] }
 0x6ed   :  { %v2347_v61 = vpop.xlane.xlu0 %2346 }
 0x6ee   :  { %v2350_v5 = vpop.xlane.xlu2 %2349  ;;  %3755 = vrcp.f32 %v2347_v61  ;;  %v2603_v35 = vpop.f32.mrf.mxu0 }
 0x6ef   :  { %3757 = vrcp.f32 %v2350_v5  ;;  %v2740_v18 = vmul.f32 %v6584_v15, %v2603_v35  ;;  %v6589_v5 = vld [vmem:[#allocation56_spill] sm:$0xff] }
 0x6f0   :  { %v2768_v35 = vmul.f32 %v6589_v5, %v5897_v20 }
 0x6f2   :  { %v5990_v52 = vpop.f32.mrf.mxu3 }
 0x6f4   :  { %v3756_v25 = vpop.eup %3755 }
 0x6f5   :  { %v3758_v4 = vpop.eup %3757  ;;  %v2465_v41 = vmul.f32 %v3756_v25, %v5945_v30 }
 0x6f6   :  { %v2466_v47 = vmul.f32 %v3758_v4, %v5947_v36  ;;  %v2605_v28 = vpop.f32.mrf.mxu0  ;;  %v2353_v17 = vpop.xlane.xlu1 %2352  ;;  %v6588_v36 = vld [vmem:[#allocation19_spill] sm:$0xff]  ;;  %v2809_v4 = vpack.c.bf16 %v2769_v53, %v2768_v35  ;;  %v2763_v53 = vmul.f32 %v6597_v29, %v5887_v59  ;;  %v6599_v35 = vld [vmem:[#allocation48_spill] sm:$0xff]  ;;  %v6601_v59 = vld [vmem:[#allocation13_spill] sm:$0xff] }
 0x6f7   :  { %v2741_v27 = vmul.f32 %v6585_v12, %v2605_v28  ;;  %v2738_v61 = vmul.f32 %v6588_v36, %v2598_v48  ;;  %vm1061_vm12 = vcmp.eq.f32.partialorder %v6601_v59, %v1049_v38  ;;  %v6608_v29 = vld [vmem:[#allocation35_spill] sm:$0xff] }
 0x6f8   :  { %v2495_v23 = vpack.c.bf16 %v2466_v47, %v2465_v41  ;;  %v6593_v41 = vld [vmem:[#allocation54_spill] sm:$0xff]  ;;  %v6594_v47 = vld [vmem:[#allocation12_spill] sm:$0xff] }
 0x6f9   :  { %v2795_v51 = vpack.c.bf16 %v2741_v27, %v2740_v18  ;;  %v2794_v25 = vpack.c.bf16 %v2739_v43, %v2738_v61  ;;  %v2766_v48 = vmul.f32 %v6593_v41, %v5893_v50  ;;  %v1027_v28 = vadd.s32 128, %v6594_v47  ;;  %v6595_v18 = vld [vmem:[#allocation53_spill] sm:$0xff] }
 0x6fa   :  { %v5998_v8 = vpop.f32.mrf.mxu3  ;;  %3455 = vmatmul.msk.bf16.gmra.mxu3 %vm1230_vm7, %v2495_v23  ;;  %v2765_v12 = vmul.f32 %v6595_v18, %v5891_v40  ;;  %v3779_v23 = vmov 1.0|1.0   ;;  %v2764_v43 = vmul.f32 %v6596_v3, %v5889_v31  ;;  %v6598_v40 = vld [vmem:[#allocation49_spill] sm:$0xff]  ;;  %v6605_v18 = vld [vmem:[#allocation40_spill] sm:$0xff] }
 0x6fb   :  { %v2356_v30 = vpop.xlane.xlu0 %2355  ;;  %2835 = vmatpush.bf16.msra.mxu0 %v2795_v51  ;;  %v2808_v27 = vpack.c.bf16 %v2767_v7, %v2766_v48  ;;  %v1030_v50 = vcvt.s32.f32 %v1027_v28  ;;  %v2762_v36 = vmul.f32 %v6598_v40, %v5885_v55  ;;  %v6603_v55 = vld [vmem:[#allocation44_spill] sm:$0xff] }
 0x6fc   :  { %3759 = vrcp.f32 %v2356_v30  ;;  %v2759_v41 = vmul.f32 %v6603_v55, %v5825_v11  ;;  %v6607_v11 = vld [vmem:[#allocation36_spill] sm:$0xff] }
 0x6fd   :  { %3761 = vrcp.f32 %v2353_v17  ;;  %v2807_v17 = vpack.c.bf16 %v2765_v12, %v2764_v43  ;;  %v1034_v5 = vmul.f32 0.035714287, %v1030_v50  ;;  %v2806_v31 = vpack.c.bf16 %v2763_v53, %v2762_v36 }
 0x6fe   :  { %v2757_v12 = vmul.f32 %v6605_v18, %v5777_v22  ;;  %v2755_v43 = vmul.f32 %v6607_v11, %v5755_v58  ;;  %v2754_v53 = vmul.f32 %v6608_v29, %v5750_v46  ;;  %v6609_v58 = vld [vmem:[#allocation46_spill] sm:$0xff]  ;;  %v6618_v11 = vld [vmem:[#allocation85_spill] sm:$0xff] }
 0x6ff   :  { %2836 = vmatpush.bf16.msra.mxu0 %v2794_v25  ;;  %v2761_v25 = vmul.f32 %v6599_v35, %v5872_v63  ;;  %v6604_v63 = vld [vmem:[#allocation43_spill] sm:$0xff]  ;;  %v2782_v36 = vmul.f32 %v6609_v58, %v5998_v8  ;;  %v6613_v8 = vld [vmem:[#allocation72_spill] sm:$0xff]  ;;  %v6622_v58 = vld [vmem:[#allocation81_spill] sm:$0xff] }
 0x700   :  { %v2758_v28 = vmul.f32 %v6604_v63, %v5802_v0 }
 0x702   :  { %v3760_v15 = vpop.eup %3759  ;;  %v2710_v20 = vpop.f32.mrf.mxu3  ;;  %3458 = vmatmul.msk.bf16.vlgmr.msra.gmra.mxu0 %vm3457_vm2, %v3779_v23 }
 0x703   :  { %2848 = vmatpush.bf16.msrb.mxu0 %v2809_v4  ;;  %v3762_v16 = vpop.eup %3761  ;;  %v2468_v51 = vmul.f32 %v3760_v15, %v5968_v13  ;;  %v6600_v13 = vld [vmem:[#allocation47_spill] sm:$0xff]  ;;  %v1038_v4 = vadd.f32 0.017857144, %v1034_v5  ;;  %v2783_v40 = vmul.f32 %v5283_v39, %v2710_v20  ;;  %v6612_v20 = vld [vmem:[#allocation74_spill] sm:$0xff] }
 0x704   :  { %v2467_v30 = vmul.f32 %v3762_v16, %v5955_v54  ;;  %v2760_v7 = vmul.f32 %v6600_v13, %v5850_v49  ;;  %v6602_v54 = vld [vmem:[#allocation14_spill] sm:$0xff]  ;;  %v2804_v49 = vpack.c.bf16 %v2759_v41, %v2758_v28  ;;  %v2779_v5 = vmul.f32 %v6612_v20, %v5982_v45 }
 0x705   :  { %vm1065_vm13 = vcmp.eq.f32.partialorder %v6602_v54, %v1049_v38  ;;  %v1042_v15 = vfloor.f32 %v1038_v4  ;;  %v6615_v4 = vld [vmem:[#allocation68_spill] sm:$0xff] }
 0x706   :  { %v2496_v61 = vpack.c.bf16 %v2468_v51, %v2467_v30  ;;  %v2805_v48 = vpack.c.bf16 %v2761_v25, %v2760_v7  ;;  %vm3459_vm14 = vmpackc.low %vm1065_vm13, %vm1061_vm12  ;;  %v2802_v30 = vpack.c.bf16 %v2755_v43, %v2754_v53  ;;  %v6620_v53 = vld [vmem:[#allocation83_spill] sm:$0xff] }
 0x707   :  { %2849 = vmatpush.bf16.msrb.mxu0 %v2808_v27  ;;  %v6606_v27 = vld [vmem:[#allocation39_spill] sm:$0xff]  ;;  %v1046_v3 = vmul.f32 28.0, %v1042_v15 }
 0x708   :  { %v2756_v38 = vmul.f32 %v6606_v27, %v5763_v10 }
 0x709   :  { %v1050_v22 = vsub.f32 %v1030_v50, %v1046_v3  ;;  %v6611_v50 = vld [vmem:[#allocation77_spill] sm:$0xff] }
 0x70a   :  { %v2713_v14 = vpop.f32.mrf.mxu3  ;;  %3456 = vmatmul.msk.bf16.gmra.mxu3 %vm1230_vm7, %v2496_v61  ;;  %v2803_v51 = vpack.c.bf16 %v2757_v12, %v2756_v38  ;;  %v2816_v61 = vpack.c.bf16 %v2783_v40, %v2782_v36  ;;  %v2780_v39 = vmul.f32 %v6611_v50, %v5987_v44  ;;  %v2776_v44 = vmul.f32 %v6615_v4, %v5976_v56 }
 0x70b   :  { %2850 = vmatpush.bf16.msrb.mxu0 %v2807_v17  ;;  %v2784_v17 = vmul.f32 %v5341_v33, %v2713_v14  ;;  %vm1054_vm15 = vcmp.eq.f32.partialorder %v6590_v9, %v1050_v22  ;;  %vm1058_vm3 = vcmp.eq.f32.partialorder %v6591_v60, %v1050_v22  ;;  %v1028_v33 = vadd.s32 256, %v6594_v47 }
 0x70c   :  { %vm3461_vm4 = vmpackc.low %vm1058_vm3, %vm1054_vm15  ;;  %vm1062_vm5 = vcmp.eq.f32.partialorder %v6601_v59, %v1050_v22  ;;  %vm1066_vm6 = vcmp.eq.f32.partialorder %v6602_v54, %v1050_v22  ;;  %v6624_v50 = vmov 0.0   ;;  %vm2822_vm3 = vcmask 523264  }
 0x70d   :  { %v1031_v25 = vcvt.s32.f32 %v1028_v33  ;;  %vm3463_vm8 = vmpackc.low %vm1066_vm6, %vm1062_vm5 }
 0x70f   :  { %2851 = vmatpush.bf16.msrb.mxu0 %v2806_v31  ;;  %v2778_v31 = vmul.f32 %v6613_v8, %v5980_v57  ;;  %v1035_v7 = vmul.f32 0.035714287, %v1031_v25 }
 0x711   :  { %v2814_v13 = vpack.c.bf16 %v2779_v5, %v2778_v31  ;;  %v1039_v45 = vadd.f32 0.017857144, %v1035_v7 }
 0x712   :  { %3460 = vmatmul.msk.bf16.gmra.mxu0 %vm3459_vm14, %v3779_v23  ;;  %v2715_v16 = vpop.f32.mrf.mxu3 }
 0x713   :  { %2852 = vmatpush.bf16.msrb.mxu0 %v2805_v48  ;;  %v2785_v0 = vmul.f32 %v5352_v2, %v2715_v16  ;;  %v6610_v2 = vld [vmem:[#allocation78_spill] sm:$0xff]  ;;  %v1043_v41 = vfloor.f32 %v1039_v45 }
 0x714   :  { %v2781_v46 = vmul.f32 %v6610_v2, %v5990_v52  ;;  %v6614_v52 = vld [vmem:[#allocation70_spill] sm:$0xff] }
 0x715   :  { %v2817_v10 = vpack.c.bf16 %v2785_v0, %v2784_v17  ;;  %v2777_v14 = vmul.f32 %v6614_v52, %v5978_v37  ;;  %v1047_v37 = vmul.f32 28.0, %v1043_v41  ;;  %v6619_v0 = vld [vmem:[#allocation84_spill] sm:$0xff] }
 0x716   :  { %v2815_v35 = vpack.c.bf16 %v2781_v46, %v2780_v39 }
 0x717   :  { %2853 = vmatpush.bf16.msrb.mxu0 %v2804_v49  ;;  %v2813_v55 = vpack.c.bf16 %v2777_v14, %v2776_v44  ;;  %v1051_v56 = vsub.f32 %v1031_v25, %v1047_v37  ;;  %v6616_v49 = vld [vmem:[#allocation58_spill] sm:$0xff]  ;;  %v3516_v44 = vld [vmem:[%s6221_s3 + $0x8] sm:$0xff] }
 0x719   :  { %vm1055_vm9 = vcmp.eq.f32.partialorder %v6590_v9, %v1051_v56  ;;  %vm1059_vm10 = vcmp.eq.f32.partialorder %v6591_v60, %v1051_v56  ;;  %vm1063_vm2 = vcmp.eq.f32.partialorder %v6601_v59, %v1051_v56  ;;  %vm1067_vm12 = vcmp.eq.f32.partialorder %v6602_v54, %v1051_v56 }
 0x71a   :  { %vm3465_vm11 = vmpackc.low %vm1059_vm10, %vm1055_vm9  ;;  %v2718_v42 = vpop.f32.mrf.mxu3 }
 0x71b   :  { %2854 = vmatpush.bf16.msrb.mxu0 %v2803_v51  ;;  %vm3467_vm13 = vmpackc.low %vm1067_vm12, %vm1063_vm2 }
 0x71f   :  { %2855 = vmatpush.bf16.msrb.mxu0 %v2802_v30  ;;  %v6621_v30 = vld [vmem:[#allocation82_spill] sm:$0xff] }
 0x722   :  { %3462 = vmatmul.msk.bf16.vlgmr.msrb.gmra.mxu0 %vm3461_vm4, %v3779_v23  ;;  %v2720_v32 = vpop.f32.mrf.mxu3 }
 0x723   :  { %2867 = vmatpush.bf16.msra.mxu0 %v2817_v10  ;;  %v2787_v36 = vmul.f32 %v6622_v58, %v2720_v32  ;;  %v3522_v58 = vld [vmem:[%s6225_s7 + $0x18] sm:$0xff] }
 0x727   :  { %2868 = vmatpush.bf16.msra.mxu0 %v2816_v61  ;;  %v6623_v61 = vld [vmem:[#allocation51_spill] sm:$0xff] }
 0x728   :  { %v2786_v33 = vmul.f32 %v6623_v61, %v2718_v42 }
 0x72a   :  { %v2818_v5 = vpack.c.bf16 %v2787_v36, %v2786_v33  ;;  %v3521_v36 = vld [vmem:[%s6225_s7 + $0x10] sm:$0xff]  ;;  %v3519_v33 = vld [vmem:[%s6225_s7] sm:$0xff] }
 0x72b   :  { %2869 = vmatpush.bf16.msra.mxu0 %v2815_v35 }
 0x72f   :  { %2870 = vmatpush.bf16.msra.mxu0 %v2814_v13 }
 0x732   :  { %3464 = vmatmul.msk.bf16.gmra.mxu0 %vm3463_vm8, %v3779_v23  ;;  %vm3189_vm8 = vcmask 226304  }
 0x733   :  { %2871 = vmatpush.bf16.msra.mxu0 %v2813_v55 }
 0x737   :  { %2872 = vmatpush.bf16.msra.mxu0 %v2812_v34 }
 0x73b   :  { %2873 = vmatpush.bf16.msra.mxu0 %v2811_v24 }
 0x73f   :  { %2874 = vmatpush.bf16.msra.mxu0 %v2810_v21  ;;  %v1029_v21 = vadd.s32 384, %v6594_v47 }
 0x741   :  { %v1032_v57 = vcvt.s32.f32 %v1029_v21 }
 0x742   :  { %3466 = vmatmul.msk.bf16.vlgmr.msra.gmra.mxu0 %vm3465_vm11, %v3779_v23  ;;  %vm3219_vm11 = vcmask 5120  }
 0x743   :  { %v1036_v48 = vmul.f32 0.035714287, %v1032_v57 }
 0x745   :  { %v1040_v15 = vadd.f32 0.017857144, %v1036_v48 }
 0x747   :  { %v1044_v18 = vfloor.f32 %v1040_v15 }
 0x749   :  { %v1048_v16 = vmul.f32 28.0, %v1044_v18  ;;  %v3517_v18 = vld [vmem:[%s6223_s5] sm:$0xff] }
 0x74b   :  { %v1052_v29 = vsub.f32 %v1032_v57, %v1048_v16  ;;  %v6625_v16 = vld [vmem:[#allocation6_spill] sm:$0xff] }
 0x74d   :  { %vm1056_vm14 = vcmp.eq.f32.partialorder %v6590_v9, %v1052_v29  ;;  %vm1060_vm15 = vcmp.eq.f32.partialorder %v6591_v60, %v1052_v29  ;;  %vm1064_vm4 = vcmp.eq.f32.partialorder %v6601_v59, %v1052_v29  ;;  %vm1068_vm5 = vcmp.eq.f32.partialorder %v6602_v54, %v1052_v29  ;;  %v3515_v59 = vld [vmem:[%s6221_s3] sm:$0xff] }
 0x74e   :  { %v3344_v39 = vsel %vm1056_vm14, 1.0, %v6624_v50  ;;  %v3348_v20 = vsel %vm1060_vm15, 1.0, %v6624_v50  ;;  %v3352_v52 = vsel %vm1064_vm4, 1.0, %v6624_v50  ;;  %v3356_v14 = vsel %vm1068_vm5, 1.0, %v6624_v50 }
 0x74f   :  { %v1104_v35 = vpack.c.bf16 %v3348_v20, %v3344_v39  ;;  %v1108_v13 = vpack.c.bf16 %v3356_v14, %v3352_v52 }
 0x752   :  { %3468 = vmatmul.msk.bf16.gmra.mxu0 %vm3467_vm13, %v3779_v23  ;;  %v6617_v23 = vld [vmem:[#allocation15_spill] sm:$0xff] }
 0x76d   :  { %v2723_v24 = vpop.f32.mrf.mxu3 }
 0x76e   :  { %v2788_v40 = vmul.f32 %v6621_v30, %v2723_v24  ;;  %v6628_v30 = vld [vmem:[#allocation9_spill] sm:$0xff] }
 0x775   :  { %v2725_v62 = vpop.f32.mrf.mxu3 }
 0x776   :  { %v2789_v22 = vmul.f32 %v6620_v53, %v2725_v62 }
 0x778   :  { %v2819_v2 = vpack.c.bf16 %v2789_v22, %v2788_v40  ;;  %v6627_v22 = vld [vmem:[#allocation8_spill] sm:$0xff] }
 0x77d   :  { %v2728_v26 = vpop.f32.mrf.mxu3 }
 0x77e   :  { %v2790_v47 = vmul.f32 %v6619_v0, %v2728_v26 }
 0x77f   :  { %v2838_v6 = vpop.f32.mrf.mxu0 }
 0x785   :  { %v2730_v19 = vpop.f32.mrf.mxu3 }
 0x786   :  { %v2791_v43 = vmul.f32 %v6618_v11, %v2730_v19  ;;  %v6626_v11 = vld [vmem:[#allocation7_spill] sm:$0xff] }
 0x787   :  { %v2840_v34 = vpop.f32.mrf.mxu0 }
 0x788   :  { %v2820_v17 = vpack.c.bf16 %v2791_v43, %v2790_v47 }
 0x78d   :  { %v2733_v63 = vpop.f32.mrf.mxu3 }
 0x78e   :  { %v2792_v27 = vmul.f32 %v6616_v49, %v2733_v63  ;;  %v3536_v49 = vld [vmem:[%s6220_s4] ss:$0 sm:$0xff] }
 0x78f   :  { %v2843_v28 = vpop.f32.mrf.mxu0 }
 0x795   :  { %v2735_v12 = vpop.f32.mrf.mxu3 }
 0x796   :  { %v2793_v38 = vmul.f32 %v6617_v23, %v2735_v12 }
 0x797   :  { %v2845_v3 = vpop.f32.mrf.mxu0 }
 0x798   :  { %v2821_v51 = vpack.c.bf16 %v2793_v38, %v2792_v27 }
 0x79a   :  { %2890 = vmatpush.bf16.msrb.mxu0 %v2821_v51 }
 0x79e   :  { %2891 = vmatpush.bf16.msrb.mxu0 %v2820_v17 }
 0x79f   :  { %v2857_v10 = vpop.f32.mrf.mxu0 }
 0x7a0   :  { %v2858_v46 = vadd.f32 %v2857_v10, %v2838_v6 }
 0x7a2   :  { %2892 = vmatpush.bf16.msrb.mxu0 %v2819_v2  ;;  %v3520_v2 = vld [vmem:[%s6225_s7 + $0x8] sm:$0xff] }
 0x7a6   :  { %2893 = vmatpush.bf16.msrb.mxu0 %v2818_v5 }
 0x7a7   :  { %v2859_v25 = vpop.f32.mrf.mxu0 }
 0x7a8   :  { %v2860_v37 = vadd.f32 %v2859_v25, %v2840_v34  ;;  %v3518_v34 = vld [vmem:[%s6223_s5 + $0x8] sm:$0xff] }
 0x7a9   :  { %3469 = vmatmul.msk.bf16.vlgmr.msrb.gmra.mxu0 %vm2822_vm3, %v1104_v35 }
 0x7aa   :  { %2939 = vmatpush.bf16.msra.mxu0 %v3516_v44 }
 0x7ae   :  { %2940 = vmatpush.bf16.msra.mxu0 %v3515_v59 }
 0x7af   :  { %v2862_v8 = vpop.f32.mrf.mxu0 }
 0x7b0   :  { %v2863_v31 = vadd.f32 %v2862_v8, %v2843_v28 }
 0x7b2   :  { %2990 = vmatpush.bf16.msrb.mxu0 %v3518_v34 }
 0x7b6   :  { %2991 = vmatpush.bf16.msrb.mxu0 %v3517_v18 }
 0x7b7   :  { %v2864_v7 = vpop.f32.mrf.mxu0 }
 0x7b8   :  { %v2865_v21 = vadd.f32 %v2864_v7, %v2845_v3 }
 0x7b9   :  { %3470 = vmatmul.msk.bf16.gmra.mxu0 %vm2822_vm3, %v1108_v13 }
 0x7bf   :  { %v2876_v4 = vpop.f32.mrf.mxu0 }
 0x7c0   :  { %v2877_v56 = vadd.f32 %v2876_v4, %v2858_v46  ;;  %v3537_v46 = vld [vmem:[%s6222_s6] ss:$0 sm:$0xff] }
 0x7c7   :  { %v2878_v55 = vpop.f32.mrf.mxu0 }
 0x7c8   :  { %v2879_v42 = vadd.f32 %v2878_v55, %v2860_v37 }
 0x7cf   :  { %v2881_v54 = vpop.f32.mrf.mxu0 }
 0x7d0   :  { %v2882_v19 = vadd.f32 %v2881_v54, %v2863_v31 }
 0x7d7   :  { %v2883_v45 = vpop.f32.mrf.mxu0 }
 0x7d8   :  { %v2884_v57 = vadd.f32 %v2883_v45, %v2865_v21 }
 0x826   :  { %v2895_v41 = vpop.f32.mrf.mxu0 }
 0x827   :  { %v2896_v24 = vadd.f32 %v2895_v41, %v2877_v56 }
 0x82e   :  { %v2897_v32 = vpop.f32.mrf.mxu0 }
 0x82f   :  { %v2898_v62 = vadd.f32 %v2897_v32, %v2879_v42 }
 0x831   :  { %v2905_v26 = vpack.c.bf16 %v2898_v62, %v2896_v24 }
 0x833   :  { %3479 = vmatmul.msk.bf16.vlgmr.msra.gmra.mxu0 %vm1202_vm1, %v2905_v26 }
 0x834   :  { %3087 = vmatpush.bf16.msra.mxu0 %v3522_v58 }
 0x836   :  { %v2900_v6 = vpop.f32.mrf.mxu0 }
 0x837   :  { %v2901_v63 = vadd.f32 %v2900_v6, %v2882_v19 }
 0x838   :  { %3088 = vmatpush.bf16.msra.mxu0 %v3521_v36 }
 0x83c   :  { %3089 = vmatpush.bf16.msra.mxu0 %v3520_v2 }
 0x83e   :  { %v2902_v48 = vpop.f32.mrf.mxu0 }
 0x83f   :  { %v2903_v28 = vadd.f32 %v2902_v48, %v2884_v57 }
 0x840   :  { %3090 = vmatpush.bf16.msra.mxu0 %v3519_v33 }
 0x841   :  { %v2906_v15 = vpack.c.bf16 %v2903_v28, %v2901_v63 }
 0x843   :  { %3480 = vmatmul.msk.bf16.gmra.mxu0 %vm1202_vm1, %v2906_v15 }
 0x8b0   :  { %v2942_v12 = vpop.f32.mrf.mxu0 }
 0x8b1   :  { %v2943_v27 = vadd.f32 %v3536_v49, %v2942_v12 }
 0x8b3   :  { %v6120_v3 = vadd.f32 %v2943_v27, %v6625_v16 }
 0x8b8   :  { %v2944_v23 = vpop.f32.mrf.mxu0 }
 0x8b9   :  { %v2945_v38 = vadd.f32 %v3536_v49, %v2944_v23 }
 0x8bb   :  { %v6123_v43 = vadd.f32 %v2945_v38, %v6626_v11 }
 0x8bd   :  { %v2956_v51 = vpack.c.bf16 %v6123_v43, %v6120_v3 }
 0x8bf   :  { %3489 = vmatmul.msk.bf16.vlgmr.msrb.gmra.mxu0 %vm1202_vm1, %v2956_v51 }
 0x8c0   :  { %v2947_v0 = vpop.f32.mrf.mxu0 }
 0x8c1   :  { %v2948_v47 = vadd.f32 %v3536_v49, %v2947_v0 }
 0x8c3   :  { %v6129_v17 = vadd.f32 %v2948_v47, %v6627_v22 }
 0x8c8   :  { %v2949_v29 = vpop.f32.mrf.mxu0 }
 0x8c9   :  { %v2950_v53 = vadd.f32 %v3536_v49, %v2949_v29  ;;  %v3538_v29 = vld [vmem:[%s6224_s8] ss:$0 sm:$0xff] }
 0x8cb   :  { %v6132_v40 = vadd.f32 %v2950_v53, %v6628_v30 }
 0x8cd   :  { %v2957_v10 = vpack.c.bf16 %v6132_v40, %v6129_v17 }
 0x8cf   :  { %3490 = vmatmul.msk.bf16.gmra.mxu0 %vm1202_vm1, %v2957_v10 }
 0x93c   :  { %v2993_v61 = vpop.f32.mrf.mxu0 }
 0x93d   :  { %v2994_v39 = vadd.f32 %v3537_v46, %v2993_v61 }
 0x93f   :  { %v3003_v20 = vmul.f32 %v2994_v39, %v2994_v39 }
 0x941   :  { %v3007_v5 = vmul.f32 %v3003_v20, %v2994_v39 }
 0x943   :  { %v3011_v35 = vmul.f32 0.044715, %v3007_v5 }
 0x944   :  { %v2995_v25 = vpop.f32.mrf.mxu0 }
 0x945   :  { %v3015_v8 = vadd.f32 %v3011_v35, %v2994_v39  ;;  %v2996_v31 = vadd.f32 %v3537_v46, %v2995_v25  ;;  %v6630_v35 = vld [vmem:[#allocation2_spill] sm:$0xff] }
 0x947   :  { %v3019_v52 = vmul.f32 0.7978846, %v3015_v8  ;;  %v3004_v14 = vmul.f32 %v2996_v31, %v2996_v31  ;;  %v6631_v8 = vld [vmem:[#allocation4_spill] sm:$0xff] }
 0x949   :  { %v3008_v13 = vmul.f32 %v3004_v14, %v2996_v31  ;;  %3763 = vtanh.f32 %v3019_v52 }
 0x94b   :  { %v3012_v7 = vmul.f32 0.044715, %v3008_v13 }
 0x94c   :  { %v2998_v4 = vpop.f32.mrf.mxu0 }
 0x94d   :  { %v3016_v44 = vadd.f32 %v3012_v7, %v2996_v31  ;;  %v2999_v55 = vadd.f32 %v3537_v46, %v2998_v4 }
 0x94f   :  { %v3020_v59 = vmul.f32 0.7978846, %v3016_v44  ;;  %v3005_v54 = vmul.f32 %v2999_v55, %v2999_v55  ;;  %v3764_v45 = vpop.eup %3763 }
 0x950   :  { %v3027_v56 = vadd.f32 1.0, %v3764_v45 }
 0x951   :  { %3765 = vtanh.f32 %v3020_v59  ;;  %v3009_v41 = vmul.f32 %v3005_v54, %v2999_v55  ;;  %v6632_v59 = vld [vmem:[#allocation5_spill] sm:$0xff] }
 0x952   :  { %v3031_v21 = vmul.f32 0.5, %v3027_v56 }
 0x953   :  { %v3013_v37 = vmul.f32 0.044715, %v3009_v41  ;;  %v1109_v41 = vmul.f32 0.5, %v3952_v1 }
 0x954   :  { %v3000_v42 = vpop.f32.mrf.mxu0  ;;  %v3035_v28 = vmul.f32 %v3031_v21, %v2994_v39 }
 0x955   :  { %v3017_v32 = vadd.f32 %v3013_v37, %v2999_v55  ;;  %v3001_v24 = vadd.f32 %v3537_v46, %v3000_v42 }
 0x957   :  { %v3766_v62 = vpop.eup %3765  ;;  %v3021_v26 = vmul.f32 0.7978846, %v3017_v32  ;;  %v3006_v6 = vmul.f32 %v3001_v24, %v3001_v24 }
 0x958   :  { %v3028_v19 = vadd.f32 1.0, %v3766_v62 }
 0x959   :  { %v3010_v57 = vmul.f32 %v3006_v6, %v3001_v24  ;;  %3767 = vtanh.f32 %v3021_v26 }
 0x95a   :  { %v3032_v48 = vmul.f32 0.5, %v3028_v19 }
 0x95b   :  { %v3014_v63 = vmul.f32 0.044715, %v3010_v57 }
 0x95c   :  { %v3036_v15 = vmul.f32 %v3032_v48, %v2996_v31 }
 0x95d   :  { %v3018_v34 = vadd.f32 %v3014_v63, %v3001_v24 }
 0x95e   :  { %v3039_v18 = vpack.c.bf16 %v3036_v15, %v3035_v28 }
 0x95f   :  { %v3022_v12 = vmul.f32 0.7978846, %v3018_v34  ;;  %v3768_v49 = vpop.eup %3767 }
 0x960   :  { %3507 = vmatmul.msk.bf16.vlgmr.msra.gmra.mxu0 %vm2822_vm3, %v3039_v18  ;;  %v3029_v27 = vadd.f32 1.0, %v3768_v49 }
 0x961   :  { %3769 = vtanh.f32 %v3022_v12 }
 0x962   :  { %v3033_v38 = vmul.f32 0.5, %v3029_v27 }
 0x964   :  { %v3037_v51 = vmul.f32 %v3033_v38, %v2999_v55 }
 0x967   :  { %v3770_v23 = vpop.eup %3769 }
 0x968   :  { %v3030_v16 = vadd.f32 1.0, %v3770_v23 }
 0x96a   :  { %v3034_v11 = vmul.f32 0.5, %v3030_v16 }
 0x96c   :  { %v3038_v0 = vmul.f32 %v3034_v11, %v3001_v24  ;;  %v1110_v24 = vadd.f32 0.25, %v1109_v41 }
 0x96e   :  { %v3040_v47 = vpack.c.bf16 %v3038_v0, %v3037_v51  ;;  %v1111_v6 = vfloor.f32 %v1110_v24 }
 0x970   :  { %3508 = vmatmul.msk.bf16.gmra.mxu0 %vm2822_vm3, %v3040_v47  ;;  %vm1112_vm1 = vcmp.eq.f32.partialorder %v6590_v9, %v1111_v6  ;;  %vm1113_vm6 = vcmp.eq.f32.partialorder %v6591_v60, %v1111_v6 }
 0x971   :  { %v3357_v48 = vsel %vm1112_vm1, 1.0, %v6624_v50  ;;  %v3358_v1 = vsel %vm1113_vm6, 1.0, %v6624_v50 }
 0x9dd   :  { %v3092_v53 = vpop.f32.mrf.mxu0 }
 0x9de   :  { %v3093_v22 = vadd.f32 %v3538_v29, %v3092_v53 }
 0x9e0   :  { %v3102_v30 = vadd.f32 %v3093_v22, %v6120_v3 }
 0x9e2   :  { %3106 = vxpose.xlu2.b32.start [1/4] (short) (narrow) %v3102_v30, 32 }
 0x9e5   :  { %v3094_v10 = vpop.f32.mrf.mxu0 }
 0x9e6   :  { %v3095_v58 = vadd.f32 %v3538_v29, %v3094_v10 }
 0x9e8   :  { %v3103_v36 = vadd.f32 %v3095_v58, %v6123_v43  ;;  %v6629_v43 = vld [vmem:[#allocation3_spill] sm:$0xff] }
 0x9ea   :  { %3107 = vxpose.xlu2.b32.cont [2/4] (short) (narrow) %v3103_v36, 32 }
 0x9ed   :  { %v3097_v2 = vpop.f32.mrf.mxu0 }
 0x9ee   :  { %v3098_v46 = vadd.f32 %v3538_v29, %v3097_v2 }
 0x9f0   :  { %v3104_v61 = vadd.f32 %v3098_v46, %v6129_v17 }
 0x9f2   :  { %3108 = vxpose.xlu2.b32.cont [3/4] (short) (narrow) %v3104_v61, 32 }
 0x9f5   :  { %v3099_v33 = vpop.f32.mrf.mxu0 }
 0x9f6   :  { %v3100_v39 = vadd.f32 %v3538_v29, %v3099_v33 }
 0x9f8   :  { %v3105_v20 = vadd.f32 %v3100_v39, %v6132_v40 }
 0x9fa   :  { %3109 = vxpose.xlu2.b32.end [4/4] (short) (narrow) %v3105_v20, 32 }
 0xa7b   :  { %v3122_v5 = vpop.trf.xlu2 }
 0xa7c   :  { %3138 = vst.msk [vmem:[%s6226_s9] sm:$0xff] %vm1143_vm0, %v3122_v5  ;;  %3146 = vrot.lane.b32.xlu1 %v3122_v5, %s3780_s13  ;;  %v3163_v25 = vsub.f32 %v6630_v35, %v3122_v5 }
 0xa7e   :  { %v3167_v14 = vmul.f32 %v3163_v25, %v3163_v25 }
 0xa80   :  { %v3171_v44 = vsel %vm1230_vm7, %v3167_v14, 0.0 }
 0xa83   :  { %v3123_v3 = vpop.trf.xlu2 }
 0xa84   :  { %3139 = vst.msk [vmem:[%s6226_s9 + $0x8] sm:$0xff] %vm1143_vm0, %v3123_v3  ;;  %3148 = vrot.lane.b32.xlu0 %v3123_v3, %s3780_s13  ;;  %v3164_v17 = vsub.f32 %v6629_v43, %v3123_v3 }
 0xa86   :  { %v3168_v52 = vmul.f32 %v3164_v17, %v3164_v17 }
 0xa88   :  { %v3172_v7 = vsel %vm1230_vm7, %v3168_v52, 0.0 }
 0xa89   :  { %v3173_v45 = vadd.f32 %v3172_v7, %v3171_v44 }
 0xa8b   :  { %v3124_v40 = vpop.trf.xlu2 }
 0xa8c   :  { %3140 = vst.msk [vmem:[%s6226_s9 + $0x10] sm:$0xff] %vm1143_vm0, %v3124_v40  ;;  %v3165_v31 = vsub.f32 %v6631_v8, %v3124_v40 }
 0xa8e   :  { %v3169_v13 = vmul.f32 %v3165_v31, %v3165_v31 }
 0xa90   :  { %v3174_v55 = vsel %vm1230_vm7, %v3169_v13, 0.0 }
 0xa91   :  { %v3175_v56 = vadd.f32 %v3174_v55, %v3173_v45 }
 0xa93   :  { %v3125_v4 = vpop.trf.xlu2 }
 0xa94   :  { %3141 = vst.msk [vmem:[%s6226_s9 + $0x18] sm:$0xff] %vm1143_vm0, %v3125_v4  ;;  %v3166_v54 = vsub.f32 %v6632_v59, %v3125_v4 }
 0xa96   :  { %v3170_v37 = vmul.f32 %v3166_v54, %v3166_v54 }
 0xa98   :  { %v3176_v42 = vsel %vm1230_vm7, %v3170_v37, 0.0 }
 0xa99   :  { %v3177_v32 = vadd.f32 %v3176_v42, %v3175_v56 }
 0xa9b   :  { %v3178_v62 = vrot.slane %v3177_v32, 4 }
 0xa9d   :  { %v3179_v26 = vadd.f32 %v3178_v62, %v3177_v32 }
 0xa9f   :  { %v3180_v21 = vrot.slane %v3179_v26, 2 }
 0xaa1   :  { %v3181_v19 = vadd.f32 %v3180_v21, %v3179_v26 }
 0xaa3   :  { %v3182_v57 = vrot.slane %v3181_v19, 1 }
 0xaa5   :  { %v3183_v63 = vadd.f32 %v3182_v57, %v3181_v19 }
 0xaa7   :  { %v3184_v28 = vmul.f32 %v3357_v48, %v3183_v63  ;;  %v3185_v34 = vmul.f32 %v3358_v1, %v3183_v63 }
 0xaa9   :  { %v3186_v15 = vsel %vm1230_vm7, %v3184_v28, 0.0  ;;  %v3190_v18 = vsel %vm3189_vm8, %v3185_v34, 0.0  ;;  %vm3217_vm7 = vcmask 7168  }
 0xaaa   :  { %3187 = vadd.xlane.f32.xlu1 %v3186_v15 }
 0xaae   :  { %3191 = vadd.xlane.f32.xlu0 %v3190_v18 }
 0xac2   :  { %3150 = vrot.lane.b32.xlu0 %v3124_v40, %s3780_s13 }
 0xac3   :  { %3152 = vrot.lane.b32.xlu1 %v3125_v4, %s3780_s13 }
 0xaee   :  { %v3147_v9 = vpop.permute.xlu1 %3146 }
 0xaef   :  { %3509 = vst.msk [vmem:[%s6226_s9 + $0x20] sm:$0xff] %vm1143_vm0, %v3147_v9 }
 0xaf6   :  { %v3149_v60 = vpop.permute.xlu0 %3148 }
 0xaf7   :  { %3510 = vst.msk [vmem:[%s6226_s9 + $0x28] sm:$0xff] %vm1143_vm0, %v3149_v60 }
 0xb1d   :  { %v3188_v50 = vpop.xlane.xlu1 %3187 }
 0xb1e   :  { %3771 = vrsqrt.f32 %v3188_v50  ;;  %vm3200_vm9 = vcmp.eq.f32.partialorder %v3188_v50, inf  ;;  %v3203_v30 = vand.u32 2147483648, %v3188_v50  ;;  %vm3202_vm10 = vcmp.eq.f32.partialorder %v3188_v50, 0.0 }
 0xb21   :  { %v3192_v12 = vpop.xlane.xlu0 %3191 }
 0xb22   :  { %3773 = vrsqrt.f32 %v3192_v12  ;;  %vm3212_vm2 = vcmp.eq.f32.partialorder %v3192_v12, inf  ;;  %v3215_v46 = vand.u32 2147483648, %v3192_v12  ;;  %vm3214_vm12 = vcmp.eq.f32.partialorder %v3192_v12, 0.0 }
 0xb24   :  { %v3772_v49 = vpop.eup %3771 }
 0xb25   :  { %v3194_v27 = vmul.f32 %v3772_v49, %v3188_v50 }
 0xb27   :  { %v3195_v23 = vmul.f32 %v3772_v49, %v3194_v27 }
 0xb28   :  { %v3774_v38 = vpop.eup %3773 }
 0xb29   :  { %v3196_v16 = vmul.f32 0.5, %v3195_v23  ;;  %v3206_v11 = vmul.f32 %v3774_v38, %v3192_v12 }
 0xb2b   :  { %v3197_v51 = vsub.f32 1.5, %v3196_v16  ;;  %v3207_v0 = vmul.f32 %v3774_v38, %v3206_v11 }
 0xb2d   :  { %v3198_v47 = vmul.f32 %v3772_v49, %v3197_v51  ;;  %v3208_v29 = vmul.f32 0.5, %v3207_v0 }
 0xb2f   :  { %v3199_v53 = vmul.f32 %v3198_v47, %v3188_v50  ;;  %v3209_v22 = vsub.f32 1.5, %v3208_v29 }
 0xb31   :  { %v3201_v10 = vsel %vm3200_vm9, %v3188_v50, %v3199_v53  ;;  %v3210_v58 = vmul.f32 %v3774_v38, %v3209_v22 }
 0xb32   :  { %v3204_v36 = vsel %vm3202_vm10, %v3203_v30, %v3201_v10 }
 0xb33   :  { %3218 = vst.msk [vmem:[%s6227_s10] sm:$0xff] %vm3217_vm7, %v3204_v36  ;;  %v3211_v2 = vmul.f32 %v3210_v58, %v3192_v12 }
 0xb34   :  { %v3151_v61 = vpop.permute.xlu0 %3150 }
 0xb35   :  { %v3213_v33 = vsel %vm3212_vm2, %v3192_v12, %v3211_v2  ;;  %3511 = vst.msk [vmem:[%s6226_s9 + $0x30] sm:$0xff] %vm1143_vm0, %v3151_v61  ;;  %v3153_v39 = vpop.permute.xlu1 %3152 }
 0xb36   :  { %v3216_v20 = vsel %vm3214_vm12, %v3215_v46, %v3213_v33  ;;  %3512 = vst.msk [vmem:[%s6226_s9 + $0x38] sm:$0xff] %vm1143_vm0, %v3153_v39 }
 0xb37   :  { %3220 = vst.msk [vmem:[%s6227_s10 + $0x8] sm:$0x3f] %vm3219_vm11, %v3216_v20 }

</bundles_post_ra>
